<compile_context>
chip_gen: v7x
topology: tpu7x:2x2x1
jax: 0.10.0
libtpu: 0.0.40
codegen_flags: <defaults>
</compile_context>

<pallas_src>
import numpy as np
import jax
import jax.numpy as jnp
from jax import lax
from jax.experimental import pallas as pl
from jax.experimental.pallas import tpu as pltpu

EQNUM = 1
BN_EPS = 1e-5
SELU_ALPHA = 1.6732632423543772
SELU_SCALE = 1.0507009873554805

# Column offsets inside the packed per-row parameter slab (see block_forward).
_W_OFF, _B1_OFF, _G1_OFF, _BE1_OFF, _W2_OFF, _B2_OFF, _G2_OFF, _BE2_OFF = (
    0, 45, 50, 55, 60, 65, 66, 67)
_P_COLS = 68


def _make_block_kernel(n, h, w, lpad):
    """Kernel factory: all shapes are static Python ints closed over."""
    R = 3 * n                       # rows = groups x batch, group-major
    hp, wp = h + 2, w + 2
    l = hp * wp
    inv_cnt = 1.0 / float(n * h * w)

    # Roll-based tap extraction is only valid because the largest tap offset
    # (2*wp + 2) never pushes a *valid* output lane past the end of the true
    # padded plane (margin = wp - w - 1 = 1 with padding=1); wrapped values land
    # only in masked/discarded lanes.  Guard that statically.
    assert (h - 1) * wp + (w - 1) + 2 * wp + 2 <= l - 1, "roll-tap margin violated"
    assert lpad >= l and lpad % 128 == 0

    def kernel(x_ref, p_ref, o_ref):
        # x_ref: (R, lpad) padded input planes, flat spatial, row r = g*n + b
        # p_ref: (R, _P_COLS) per-row parameter columns (fused conv weights,
        #        biases, conv2 weights, BN gamma/beta)
        # o_ref: (R, lpad) x + y, same flat layout
        plane = x_ref[...]                                        # (R, lpad)

        # ---- validity mask, built in-kernel (no extra operand) --------------
        # lane k of a row encodes output pixel (i, j) with k = i*wp + j.
        # i = floor(k/wp) recovered exactly in f32: (k+0.5)/wp is >= 0.5/wp away
        # from any integer while the f32 product error is ~1e-5.
        idx_f = lax.broadcasted_iota(jnp.int32, (R, lpad), 1).astype(jnp.float32)
        q = jnp.floor((idx_f + 0.5) * (1.0 / wp))                 # row index i (exact)
        jcol = idx_f - q * wp                                     # col index j (exact)
        mask = jnp.where((q < h) & (jcol < w), 1.0, 0.0)          # (R, lpad)

        # per-row group-membership selector columns (R,1), for BN group stats
        row = lax.broadcasted_iota(jnp.int32, (R, 1), 0)
        sel = [jnp.where((row >= g * n) & (row < (g + 1) * n), 1.0, 0.0)
               for g in range(3)]

        def pcol(k):                                              # (R,1) param column
            return p_ref[:, k:k + 1]

        def group_scalars_to_col(vals):                           # 3 scalars -> (R,1)
            return sel[0] * vals[0] + sel[1] * vals[1] + sel[2] * vals[2]

        def bn_affine(z, gcol, bcol):
            # training-mode BatchNorm over (N,H,W) of each group's channel.
            # single-pass var = E[z^2]-E[z]^2 is fine at these magnitudes and
            # 1e-4 tolerance (two-pass would be safer for large shifts).
            zm = z * mask
            s1r = jnp.sum(zm, axis=1, keepdims=True)              # (R,1)
            s2r = jnp.sum(z * zm, axis=1, keepdims=True)          # (R,1)
            means, varis = [], []
            for g in range(3):
                s1 = jnp.sum(s1r * sel[g])
                s2 = jnp.sum(s2r * sel[g])
                m = s1 * inv_cnt
                means.append(m)
                varis.append(s2 * inv_cnt - m * m)
            mean_col = group_scalars_to_col(means)                # (R,1)
            var_col = group_scalars_to_col(varis)                 # (R,1)
            scale = gcol * lax.rsqrt(var_col + BN_EPS)
            shift = bcol - mean_col * scale
            return z * scale + shift

        # ---- fused conv0(3x3) o conv1(1x1): tap-major accumulation ----------
        accs = [None] * 5
        center = plane                      # replaced by the (dy=1,dx=1) tap below
        t = 0
        for dy in range(3):
            for dx in range(3):
                off = dy * wp + dx
                tap = plane if off == 0 else pltpu.roll(
                    plane, shift=lpad - off, axis=1)
                if dy == 1 and dx == 1:
                    center = tap            # == original x, reused for the residual
                for c in range(5):
                    term = tap * pcol(_W_OFF + c * 9 + t)
                    accs[c] = term if accs[c] is None else accs[c] + term
                t += 1

        # ---- BN1 + relu, conv2 (1x1, 5 -> 1 per group) accumulated in place --
        acc2 = None
        for c in range(5):
            z = accs[c] + pcol(_B1_OFF + c)
            z = bn_affine(z, pcol(_G1_OFF + c), pcol(_BE1_OFF + c))
            y1 = jnp.maximum(z, 0.0)
            term = y1 * pcol(_W2_OFF + c)
            acc2 = term if acc2 is None else acc2 + term

        z2 = acc2 + pcol(_B2_OFF)
        z2 = bn_affine(z2, pcol(_G2_OFF), pcol(_BE2_OFF))
        # SELU; exp(min(z,0))-1 keeps the plain EUP exp path (expm1 would only
        # matter for tiny |z|, well inside the 1e-4 tolerance)
        s = SELU_SCALE * jnp.where(
            z2 > 0.0, z2, SELU_ALPHA * (jnp.exp(jnp.minimum(z2, 0.0)) - 1.0))

        o_ref[...] = center + s             # residual; lane-dense full-block store

    return kernel


@jax.jit
def block_forward(x, w0, w1, b1, w2, b2, g1, be1, g2, be2):
    n, c, h, w = x.shape
    assert c == 3, "block.conv is Conv2d(3, 18, ...) => input must have 3 channels"
    hp, wp = h + 2, w + 2
    l = hp * wp
    lpad = ((l + 127) // 128) * 128          # lane-dense flat length (multiple of 128)
    R = 3 * n

    # Exact fusion of the class-level 3x3 conv with conv1 (both linear, grouped):
    #   w_eff[g, c, t] = sum_j w1[g, c, j] * w0[g, j, t]
    w_eff = jnp.einsum('gcj,gjt->gct',
                       w1.reshape(3, 5, 6), w0.reshape(3, 6, 9)).reshape(3, 45)

    def per_row(v):                          # (3, k) group values -> (R, k) per-row
        return jnp.repeat(v, n, axis=0)

    # One packed per-row parameter slab (replaces 8 separate SMEM operands).
    params = jnp.concatenate([
        per_row(w_eff),                      # 45 : fused 3x3 conv weights
        per_row(b1.reshape(3, 5)),           #  5 : conv1 bias
        per_row(g1.reshape(3, 5)),           #  5 : bn1 gamma
        per_row(be1.reshape(3, 5)),          #  5 : bn1 beta
        per_row(w2.reshape(3, 5)),           #  5 : conv2 weight
        per_row(b2.reshape(3, 1)),           #  1 : conv2 bias
        per_row(g2.reshape(3, 1)),           #  1 : bn2 gamma
        per_row(be2.reshape(3, 1)),          #  1 : bn2 beta
    ], axis=1)
    assert params.shape == (R, _P_COLS)

    # Padded, group-major-rows, flattened-spatial, lane-padded input: (R, lpad)
    xp = jnp.pad(x, ((0, 0), (0, 0), (1, 1), (1, 1)))
    xf = xp.transpose(1, 0, 2, 3).reshape(R, l)
    xf = jnp.pad(xf, ((0, 0), (0, lpad - l)))

    kernel = _make_block_kernel(n, h, w, lpad)
    out_slab = pl.pallas_call(
        kernel,
        out_shape=jax.ShapeDtypeStruct((R, lpad), jnp.float32),
        in_specs=[pl.BlockSpec(memory_space=pltpu.MemorySpace.VMEM),
                  pl.BlockSpec(memory_space=pltpu.MemorySpace.VMEM)],
        out_specs=pl.BlockSpec(memory_space=pltpu.MemorySpace.VMEM),
        compiler_params=pltpu.CompilerParams(
            vmem_limit_bytes=4 * 1024 * 1024),   # working set is ~50 KB
    )(xf, params)

    # Un-flatten (layout plumbing only): drop pad columns / rows, back to NCHW.
    y = out_slab[:, :h * wp].reshape(3, n, h, wp)[:, :, :, :w]
    return y.transpose(1, 0, 2, 3)


def init_params(key):
    """Deterministic synthetic parameters with the module's shapes (eqnum=1)."""
    k0, k1, k2, k3, k4 = jax.random.split(key, 5)
    w0 = 0.2 * jax.random.normal(k0, (18 * 9,), jnp.float32)   # Conv2d(3,18,3,g=3) weight, flat
    w1 = 0.2 * jax.random.normal(k1, (15 * 6,), jnp.float32)   # Conv2d(18,15,1,g=3) weight, flat
    b1 = 0.1 * jax.random.normal(k2, (15,), jnp.float32)
    w2 = 0.2 * jax.random.normal(k3, (3 * 5,), jnp.float32)    # Conv2d(15,3,1,g=3) weight, flat
    b2 = 0.1 * jax.random.normal(k4, (3,), jnp.float32)
    g1 = jnp.ones((15,), jnp.float32)    # BatchNorm2d default init: gamma=1, beta=0
    be1 = jnp.zeros((15,), jnp.float32)
    g2 = jnp.ones((3,), jnp.float32)
    be2 = jnp.zeros((3,), jnp.float32)
    return (w0, w1, b1, w2, b2, g1, be1, g2, be2)


def ref_forward(x, w0, w1, b1, w2, b2, g1, be1, g2, be2):
    """Pure-JAX reference matching the PyTorch forward (training-mode BN), unfused."""
    dn = ('NCHW', 'OIHW', 'NCHW')

    def bn(y, gamma, beta):
        m = jnp.mean(y, axis=(0, 2, 3), keepdims=True)
        v = jnp.mean((y - m) ** 2, axis=(0, 2, 3), keepdims=True)
        return gamma[None, :, None, None] * (y - m) * lax.rsqrt(v + BN_EPS) \
            + beta[None, :, None, None]

    y = lax.conv_general_dilated(x, w0.reshape(18, 1, 3, 3), (1, 1), 'SAME',
                                 dimension_numbers=dn, feature_group_count=3)
    y = lax.conv_general_dilated(y, w1.reshape(15, 6, 1, 1), (1, 1), 'VALID',
                                 dimension_numbers=dn, feature_group_count=3)
    y = y + b1[None, :, None, None]
    y = jnp.maximum(bn(y, g1, be1), 0.0)
    y = lax.conv_general_dilated(y, w2.reshape(3, 5, 1, 1), (1, 1), 'VALID',
                                 dimension_numbers=dn, feature_group_count=3)
    y = y + b2[None, :, None, None]
    y = bn(y, g2, be2)
    y = SELU_SCALE * jnp.where(y > 0.0, y,
                               SELU_ALPHA * (jnp.exp(jnp.minimum(y, 0.0)) - 1.0))
    return x + y


if __name__ == "__main__":
    key = jax.random.PRNGKey(0)
    kx, kp = jax.random.split(key)
    x = jax.random.normal(kx, (2, 3, 16, 16), jnp.float32)   # N=2, C=3, H=W=16 (NCHW)
    params = init_params(kp)

    out = block_forward(x, *params)
    out = jax.block_until_ready(out)

    ref = ref_forward(x, *params)
    assert out.shape == x.shape and out.dtype == jnp.float32
    np.testing.assert_allclose(np.asarray(out), np.asarray(ref), rtol=1e-4, atol=1e-4)
    print("KERNEL_OK")
</pallas_src>

<mosaic_0001>
module attributes {stable_mosaic.version = 11 : i64} {
  func.func @kernel(%arg0: memref<6x384xf32, #tpu.memory_space<vmem>>, %arg1: memref<6x68xf32, #tpu.memory_space<vmem>>, %arg2: memref<6x384xf32, #tpu.memory_space<vmem>>) attributes {dimension_semantics = [], scalar_prefetch = 0 : i64, scratch_operands = 0 : i64, tpu.core_type = #tpu.core_type<tc>} {
    %c0 = arith.constant 0 : index
    %c0_0 = arith.constant 0 : index
    %0 = vector.load %arg0[%c0, %c0_0] : memref<6x384xf32, #tpu.memory_space<vmem>>, vector<6x384xf32>
    %1 = tpu.iota {dimensions = array<i32: 1>} : vector<6x384xi32>
    %2 = arith.sitofp %1 : vector<6x384xi32> to vector<6x384xf32>
    %cst = arith.constant 5.000000e-01 : f32
    %3 = vector.broadcast %cst : f32 to vector<6x384xf32>
    %4 = arith.addf %2, %3 : vector<6x384xf32>
    %cst_1 = arith.constant 0.055555556 : f32
    %5 = vector.broadcast %cst_1 : f32 to vector<6x384xf32>
    %6 = arith.mulf %4, %5 : vector<6x384xf32>
    %7 = math.floor %6 : vector<6x384xf32>
    %cst_2 = arith.constant 1.800000e+01 : f32
    %8 = vector.broadcast %cst_2 : f32 to vector<6x384xf32>
    %9 = arith.mulf %7, %8 : vector<6x384xf32>
    %10 = arith.subf %2, %9 : vector<6x384xf32>
    %cst_3 = arith.constant 1.600000e+01 : f32
    %11 = vector.broadcast %cst_3 : f32 to vector<6x384xf32>
    %12 = arith.cmpf olt, %7, %11 : vector<6x384xf32>
    %cst_4 = arith.constant 1.600000e+01 : f32
    %13 = vector.broadcast %cst_4 : f32 to vector<6x384xf32>
    %14 = arith.cmpf olt, %10, %13 : vector<6x384xf32>
    %15 = arith.andi %12, %14 : vector<6x384xi1>
    %cst_5 = arith.constant 1.000000e+00 : f32
    %cst_6 = arith.constant 0.000000e+00 : f32
    %16 = vector.broadcast %cst_5 : f32 to vector<6x384xf32>
    %17 = vector.broadcast %cst_6 : f32 to vector<6x384xf32>
    %18 = arith.select %15, %16, %17 : vector<6x384xi1>, vector<6x384xf32>
    %19 = tpu.iota {dimensions = array<i32: 0>} : vector<6x1xi32>
    %c0_i32 = arith.constant 0 : i32
    %20 = vector.broadcast %c0_i32 : i32 to vector<6x1xi32>
    %21 = arith.cmpi sge, %19, %20 : vector<6x1xi32>
    %c2_i32 = arith.constant 2 : i32
    %22 = vector.broadcast %c2_i32 : i32 to vector<6x1xi32>
    %23 = arith.cmpi slt, %19, %22 : vector<6x1xi32>
    %24 = arith.andi %21, %23 : vector<6x1xi1>
    %cst_7 = arith.constant 1.000000e+00 : f32
    %cst_8 = arith.constant 0.000000e+00 : f32
    %25 = vector.broadcast %cst_7 : f32 to vector<6x1xf32>
    %26 = vector.broadcast %cst_8 : f32 to vector<6x1xf32>
    %27 = arith.select %24, %25, %26 : vector<6x1xi1>, vector<6x1xf32>
    %c2_i32_9 = arith.constant 2 : i32
    %28 = vector.broadcast %c2_i32_9 : i32 to vector<6x1xi32>
    %29 = arith.cmpi sge, %19, %28 : vector<6x1xi32>
    %c4_i32 = arith.constant 4 : i32
    %30 = vector.broadcast %c4_i32 : i32 to vector<6x1xi32>
    %31 = arith.cmpi slt, %19, %30 : vector<6x1xi32>
    %32 = arith.andi %29, %31 : vector<6x1xi1>
    %cst_10 = arith.constant 1.000000e+00 : f32
    %cst_11 = arith.constant 0.000000e+00 : f32
    %33 = vector.broadcast %cst_10 : f32 to vector<6x1xf32>
    %34 = vector.broadcast %cst_11 : f32 to vector<6x1xf32>
    %35 = arith.select %32, %33, %34 : vector<6x1xi1>, vector<6x1xf32>
    %c4_i32_12 = arith.constant 4 : i32
    %36 = vector.broadcast %c4_i32_12 : i32 to vector<6x1xi32>
    %37 = arith.cmpi sge, %19, %36 : vector<6x1xi32>
    %c6_i32 = arith.constant 6 : i32
    %38 = vector.broadcast %c6_i32 : i32 to vector<6x1xi32>
    %39 = arith.cmpi slt, %19, %38 : vector<6x1xi32>
    %40 = arith.andi %37, %39 : vector<6x1xi1>
    %cst_13 = arith.constant 1.000000e+00 : f32
    %cst_14 = arith.constant 0.000000e+00 : f32
    %41 = vector.broadcast %cst_13 : f32 to vector<6x1xf32>
    %42 = vector.broadcast %cst_14 : f32 to vector<6x1xf32>
    %43 = arith.select %40, %41, %42 : vector<6x1xi1>, vector<6x1xf32>
    %c0_15 = arith.constant 0 : index
    %c0_16 = arith.constant 0 : index
    %44 = vector.load %arg1[%c0_15, %c0_16] : memref<6x68xf32, #tpu.memory_space<vmem>>, vector<6x1xf32>
    %45 = vector.broadcast %44 : vector<6x1xf32> to vector<6x384xf32>
    %46 = arith.mulf %0, %45 : vector<6x384xf32>
    %c0_17 = arith.constant 0 : index
    %c9 = arith.constant 9 : index
    %47 = vector.load %arg1[%c0_17, %c9] : memref<6x68xf32, #tpu.memory_space<vmem>>, vector<6x1xf32>
    %48 = vector.broadcast %47 : vector<6x1xf32> to vector<6x384xf32>
    %49 = arith.mulf %0, %48 : vector<6x384xf32>
    %c0_18 = arith.constant 0 : index
    %c18 = arith.constant 18 : index
    %50 = vector.load %arg1[%c0_18, %c18] : memref<6x68xf32, #tpu.memory_space<vmem>>, vector<6x1xf32>
    %51 = vector.broadcast %50 : vector<6x1xf32> to vector<6x384xf32>
    %52 = arith.mulf %0, %51 : vector<6x384xf32>
    %c0_19 = arith.constant 0 : index
    %c27 = arith.constant 27 : index
    %53 = vector.load %arg1[%c0_19, %c27] : memref<6x68xf32, #tpu.memory_space<vmem>>, vector<6x1xf32>
    %54 = vector.broadcast %53 : vector<6x1xf32> to vector<6x384xf32>
    %55 = arith.mulf %0, %54 : vector<6x384xf32>
    %c0_20 = arith.constant 0 : index
    %c36 = arith.constant 36 : index
    %56 = vector.load %arg1[%c0_20, %c36] : memref<6x68xf32, #tpu.memory_space<vmem>>, vector<6x1xf32>
    %57 = vector.broadcast %56 : vector<6x1xf32> to vector<6x384xf32>
    %58 = arith.mulf %0, %57 : vector<6x384xf32>
    %c383_i32 = arith.constant 383 : i32
    %59 = tpu.dynamic_rotate %0 by %c383_i32 dim 1 : vector<6x384xf32>, i32 -> vector<6x384xf32>
    %c0_21 = arith.constant 0 : index
    %c1 = arith.constant 1 : index
    %60 = vector.load %arg1[%c0_21, %c1] : memref<6x68xf32, #tpu.memory_space<vmem>>, vector<6x1xf32>
    %61 = vector.broadcast %60 : vector<6x1xf32> to vector<6x384xf32>
    %62 = arith.mulf %59, %61 : vector<6x384xf32>
    %63 = arith.addf %46, %62 : vector<6x384xf32>
    %c0_22 = arith.constant 0 : index
    %c10 = arith.constant 10 : index
    %64 = vector.load %arg1[%c0_22, %c10] : memref<6x68xf32, #tpu.memory_space<vmem>>, vector<6x1xf32>
    %65 = vector.broadcast %64 : vector<6x1xf32> to vector<6x384xf32>
    %66 = arith.mulf %59, %65 : vector<6x384xf32>
    %67 = arith.addf %49, %66 : vector<6x384xf32>
    %c0_23 = arith.constant 0 : index
    %c19 = arith.constant 19 : index
    %68 = vector.load %arg1[%c0_23, %c19] : memref<6x68xf32, #tpu.memory_space<vmem>>, vector<6x1xf32>
    %69 = vector.broadcast %68 : vector<6x1xf32> to vector<6x384xf32>
    %70 = arith.mulf %59, %69 : vector<6x384xf32>
    %71 = arith.addf %52, %70 : vector<6x384xf32>
    %c0_24 = arith.constant 0 : index
    %c28 = arith.constant 28 : index
    %72 = vector.load %arg1[%c0_24, %c28] : memref<6x68xf32, #tpu.memory_space<vmem>>, vector<6x1xf32>
    %73 = vector.broadcast %72 : vector<6x1xf32> to vector<6x384xf32>
    %74 = arith.mulf %59, %73 : vector<6x384xf32>
    %75 = arith.addf %55, %74 : vector<6x384xf32>
    %c0_25 = arith.constant 0 : index
    %c37 = arith.constant 37 : index
    %76 = vector.load %arg1[%c0_25, %c37] : memref<6x68xf32, #tpu.memory_space<vmem>>, vector<6x1xf32>
    %77 = vector.broadcast %76 : vector<6x1xf32> to vector<6x384xf32>
    %78 = arith.mulf %59, %77 : vector<6x384xf32>
    %79 = arith.addf %58, %78 : vector<6x384xf32>
    %c382_i32 = arith.constant 382 : i32
    %80 = tpu.dynamic_rotate %0 by %c382_i32 dim 1 : vector<6x384xf32>, i32 -> vector<6x384xf32>
    %c0_26 = arith.constant 0 : index
    %c2 = arith.constant 2 : index
    %81 = vector.load %arg1[%c0_26, %c2] : memref<6x68xf32, #tpu.memory_space<vmem>>, vector<6x1xf32>
    %82 = vector.broadcast %81 : vector<6x1xf32> to vector<6x384xf32>
    %83 = arith.mulf %80, %82 : vector<6x384xf32>
    %84 = arith.addf %63, %83 : vector<6x384xf32>
    %c0_27 = arith.constant 0 : index
    %c11 = arith.constant 11 : index
    %85 = vector.load %arg1[%c0_27, %c11] : memref<6x68xf32, #tpu.memory_space<vmem>>, vector<6x1xf32>
    %86 = vector.broadcast %85 : vector<6x1xf32> to vector<6x384xf32>
    %87 = arith.mulf %80, %86 : vector<6x384xf32>
    %88 = arith.addf %67, %87 : vector<6x384xf32>
    %c0_28 = arith.constant 0 : index
    %c20 = arith.constant 20 : index
    %89 = vector.load %arg1[%c0_28, %c20] : memref<6x68xf32, #tpu.memory_space<vmem>>, vector<6x1xf32>
    %90 = vector.broadcast %89 : vector<6x1xf32> to vector<6x384xf32>
    %91 = arith.mulf %80, %90 : vector<6x384xf32>
    %92 = arith.addf %71, %91 : vector<6x384xf32>
    %c0_29 = arith.constant 0 : index
    %c29 = arith.constant 29 : index
    %93 = vector.load %arg1[%c0_29, %c29] : memref<6x68xf32, #tpu.memory_space<vmem>>, vector<6x1xf32>
    %94 = vector.broadcast %93 : vector<6x1xf32> to vector<6x384xf32>
    %95 = arith.mulf %80, %94 : vector<6x384xf32>
    %96 = arith.addf %75, %95 : vector<6x384xf32>
    %c0_30 = arith.constant 0 : index
    %c38 = arith.constant 38 : index
    %97 = vector.load %arg1[%c0_30, %c38] : memref<6x68xf32, #tpu.memory_space<vmem>>, vector<6x1xf32>
    %98 = vector.broadcast %97 : vector<6x1xf32> to vector<6x384xf32>
    %99 = arith.mulf %80, %98 : vector<6x384xf32>
    %100 = arith.addf %79, %99 : vector<6x384xf32>
    %c366_i32 = arith.constant 366 : i32
    %101 = tpu.dynamic_rotate %0 by %c366_i32 dim 1 : vector<6x384xf32>, i32 -> vector<6x384xf32>
    %c0_31 = arith.constant 0 : index
    %c3 = arith.constant 3 : index
    %102 = vector.load %arg1[%c0_31, %c3] : memref<6x68xf32, #tpu.memory_space<vmem>>, vector<6x1xf32>
    %103 = vector.broadcast %102 : vector<6x1xf32> to vector<6x384xf32>
    %104 = arith.mulf %101, %103 : vector<6x384xf32>
    %105 = arith.addf %84, %104 : vector<6x384xf32>
    %c0_32 = arith.constant 0 : index
    %c12 = arith.constant 12 : index
    %106 = vector.load %arg1[%c0_32, %c12] : memref<6x68xf32, #tpu.memory_space<vmem>>, vector<6x1xf32>
    %107 = vector.broadcast %106 : vector<6x1xf32> to vector<6x384xf32>
    %108 = arith.mulf %101, %107 : vector<6x384xf32>
    %109 = arith.addf %88, %108 : vector<6x384xf32>
    %c0_33 = arith.constant 0 : index
    %c21 = arith.constant 21 : index
    %110 = vector.load %arg1[%c0_33, %c21] : memref<6x68xf32, #tpu.memory_space<vmem>>, vector<6x1xf32>
    %111 = vector.broadcast %110 : vector<6x1xf32> to vector<6x384xf32>
    %112 = arith.mulf %101, %111 : vector<6x384xf32>
    %113 = arith.addf %92, %112 : vector<6x384xf32>
    %c0_34 = arith.constant 0 : index
    %c30 = arith.constant 30 : index
    %114 = vector.load %arg1[%c0_34, %c30] : memref<6x68xf32, #tpu.memory_space<vmem>>, vector<6x1xf32>
    %115 = vector.broadcast %114 : vector<6x1xf32> to vector<6x384xf32>
    %116 = arith.mulf %101, %115 : vector<6x384xf32>
    %117 = arith.addf %96, %116 : vector<6x384xf32>
    %c0_35 = arith.constant 0 : index
    %c39 = arith.constant 39 : index
    %118 = vector.load %arg1[%c0_35, %c39] : memref<6x68xf32, #tpu.memory_space<vmem>>, vector<6x1xf32>
    %119 = vector.broadcast %118 : vector<6x1xf32> to vector<6x384xf32>
    %120 = arith.mulf %101, %119 : vector<6x384xf32>
    %121 = arith.addf %100, %120 : vector<6x384xf32>
    %c365_i32 = arith.constant 365 : i32
    %122 = tpu.dynamic_rotate %0 by %c365_i32 dim 1 : vector<6x384xf32>, i32 -> vector<6x384xf32>
    %c0_36 = arith.constant 0 : index
    %c4 = arith.constant 4 : index
    %123 = vector.load %arg1[%c0_36, %c4] : memref<6x68xf32, #tpu.memory_space<vmem>>, vector<6x1xf32>
    %124 = vector.broadcast %123 : vector<6x1xf32> to vector<6x384xf32>
    %125 = arith.mulf %122, %124 : vector<6x384xf32>
    %126 = arith.addf %105, %125 : vector<6x384xf32>
    %c0_37 = arith.constant 0 : index
    %c13 = arith.constant 13 : index
    %127 = vector.load %arg1[%c0_37, %c13] : memref<6x68xf32, #tpu.memory_space<vmem>>, vector<6x1xf32>
    %128 = vector.broadcast %127 : vector<6x1xf32> to vector<6x384xf32>
    %129 = arith.mulf %122, %128 : vector<6x384xf32>
    %130 = arith.addf %109, %129 : vector<6x384xf32>
    %c0_38 = arith.constant 0 : index
    %c22 = arith.constant 22 : index
    %131 = vector.load %arg1[%c0_38, %c22] : memref<6x68xf32, #tpu.memory_space<vmem>>, vector<6x1xf32>
    %132 = vector.broadcast %131 : vector<6x1xf32> to vector<6x384xf32>
    %133 = arith.mulf %122, %132 : vector<6x384xf32>
    %134 = arith.addf %113, %133 : vector<6x384xf32>
    %c0_39 = arith.constant 0 : index
    %c31 = arith.constant 31 : index
    %135 = vector.load %arg1[%c0_39, %c31] : memref<6x68xf32, #tpu.memory_space<vmem>>, vector<6x1xf32>
    %136 = vector.broadcast %135 : vector<6x1xf32> to vector<6x384xf32>
    %137 = arith.mulf %122, %136 : vector<6x384xf32>
    %138 = arith.addf %117, %137 : vector<6x384xf32>
    %c0_40 = arith.constant 0 : index
    %c40 = arith.constant 40 : index
    %139 = vector.load %arg1[%c0_40, %c40] : memref<6x68xf32, #tpu.memory_space<vmem>>, vector<6x1xf32>
    %140 = vector.broadcast %139 : vector<6x1xf32> to vector<6x384xf32>
    %141 = arith.mulf %122, %140 : vector<6x384xf32>
    %142 = arith.addf %121, %141 : vector<6x384xf32>
    %c364_i32 = arith.constant 364 : i32
    %143 = tpu.dynamic_rotate %0 by %c364_i32 dim 1 : vector<6x384xf32>, i32 -> vector<6x384xf32>
    %c0_41 = arith.constant 0 : index
    %c5 = arith.constant 5 : index
    %144 = vector.load %arg1[%c0_41, %c5] : memref<6x68xf32, #tpu.memory_space<vmem>>, vector<6x1xf32>
    %145 = vector.broadcast %144 : vector<6x1xf32> to vector<6x384xf32>
    %146 = arith.mulf %143, %145 : vector<6x384xf32>
    %147 = arith.addf %126, %146 : vector<6x384xf32>
    %c0_42 = arith.constant 0 : index
    %c14 = arith.constant 14 : index
    %148 = vector.load %arg1[%c0_42, %c14] : memref<6x68xf32, #tpu.memory_space<vmem>>, vector<6x1xf32>
    %149 = vector.broadcast %148 : vector<6x1xf32> to vector<6x384xf32>
    %150 = arith.mulf %143, %149 : vector<6x384xf32>
    %151 = arith.addf %130, %150 : vector<6x384xf32>
    %c0_43 = arith.constant 0 : index
    %c23 = arith.constant 23 : index
    %152 = vector.load %arg1[%c0_43, %c23] : memref<6x68xf32, #tpu.memory_space<vmem>>, vector<6x1xf32>
    %153 = vector.broadcast %152 : vector<6x1xf32> to vector<6x384xf32>
    %154 = arith.mulf %143, %153 : vector<6x384xf32>
    %155 = arith.addf %134, %154 : vector<6x384xf32>
    %c0_44 = arith.constant 0 : index
    %c32 = arith.constant 32 : index
    %156 = vector.load %arg1[%c0_44, %c32] : memref<6x68xf32, #tpu.memory_space<vmem>>, vector<6x1xf32>
    %157 = vector.broadcast %156 : vector<6x1xf32> to vector<6x384xf32>
    %158 = arith.mulf %143, %157 : vector<6x384xf32>
    %159 = arith.addf %138, %158 : vector<6x384xf32>
    %c0_45 = arith.constant 0 : index
    %c41 = arith.constant 41 : index
    %160 = vector.load %arg1[%c0_45, %c41] : memref<6x68xf32, #tpu.memory_space<vmem>>, vector<6x1xf32>
    %161 = vector.broadcast %160 : vector<6x1xf32> to vector<6x384xf32>
    %162 = arith.mulf %143, %161 : vector<6x384xf32>
    %163 = arith.addf %142, %162 : vector<6x384xf32>
    %c348_i32 = arith.constant 348 : i32
    %164 = tpu.dynamic_rotate %0 by %c348_i32 dim 1 : vector<6x384xf32>, i32 -> vector<6x384xf32>
    %c0_46 = arith.constant 0 : index
    %c6 = arith.constant 6 : index
    %165 = vector.load %arg1[%c0_46, %c6] : memref<6x68xf32, #tpu.memory_space<vmem>>, vector<6x1xf32>
    %166 = vector.broadcast %165 : vector<6x1xf32> to vector<6x384xf32>
    %167 = arith.mulf %164, %166 : vector<6x384xf32>
    %168 = arith.addf %147, %167 : vector<6x384xf32>
    %c0_47 = arith.constant 0 : index
    %c15 = arith.constant 15 : index
    %169 = vector.load %arg1[%c0_47, %c15] : memref<6x68xf32, #tpu.memory_space<vmem>>, vector<6x1xf32>
    %170 = vector.broadcast %169 : vector<6x1xf32> to vector<6x384xf32>
    %171 = arith.mulf %164, %170 : vector<6x384xf32>
    %172 = arith.addf %151, %171 : vector<6x384xf32>
    %c0_48 = arith.constant 0 : index
    %c24 = arith.constant 24 : index
    %173 = vector.load %arg1[%c0_48, %c24] : memref<6x68xf32, #tpu.memory_space<vmem>>, vector<6x1xf32>
    %174 = vector.broadcast %173 : vector<6x1xf32> to vector<6x384xf32>
    %175 = arith.mulf %164, %174 : vector<6x384xf32>
    %176 = arith.addf %155, %175 : vector<6x384xf32>
    %c0_49 = arith.constant 0 : index
    %c33 = arith.constant 33 : index
    %177 = vector.load %arg1[%c0_49, %c33] : memref<6x68xf32, #tpu.memory_space<vmem>>, vector<6x1xf32>
    %178 = vector.broadcast %177 : vector<6x1xf32> to vector<6x384xf32>
    %179 = arith.mulf %164, %178 : vector<6x384xf32>
    %180 = arith.addf %159, %179 : vector<6x384xf32>
    %c0_50 = arith.constant 0 : index
    %c42 = arith.constant 42 : index
    %181 = vector.load %arg1[%c0_50, %c42] : memref<6x68xf32, #tpu.memory_space<vmem>>, vector<6x1xf32>
    %182 = vector.broadcast %181 : vector<6x1xf32> to vector<6x384xf32>
    %183 = arith.mulf %164, %182 : vector<6x384xf32>
    %184 = arith.addf %163, %183 : vector<6x384xf32>
    %c347_i32 = arith.constant 347 : i32
    %185 = tpu.dynamic_rotate %0 by %c347_i32 dim 1 : vector<6x384xf32>, i32 -> vector<6x384xf32>
    %c0_51 = arith.constant 0 : index
    %c7 = arith.constant 7 : index
    %186 = vector.load %arg1[%c0_51, %c7] : memref<6x68xf32, #tpu.memory_space<vmem>>, vector<6x1xf32>
    %187 = vector.broadcast %186 : vector<6x1xf32> to vector<6x384xf32>
    %188 = arith.mulf %185, %187 : vector<6x384xf32>
    %189 = arith.addf %168, %188 : vector<6x384xf32>
    %c0_52 = arith.constant 0 : index
    %c16 = arith.constant 16 : index
    %190 = vector.load %arg1[%c0_52, %c16] : memref<6x68xf32, #tpu.memory_space<vmem>>, vector<6x1xf32>
    %191 = vector.broadcast %190 : vector<6x1xf32> to vector<6x384xf32>
    %192 = arith.mulf %185, %191 : vector<6x384xf32>
    %193 = arith.addf %172, %192 : vector<6x384xf32>
    %c0_53 = arith.constant 0 : index
    %c25 = arith.constant 25 : index
    %194 = vector.load %arg1[%c0_53, %c25] : memref<6x68xf32, #tpu.memory_space<vmem>>, vector<6x1xf32>
    %195 = vector.broadcast %194 : vector<6x1xf32> to vector<6x384xf32>
    %196 = arith.mulf %185, %195 : vector<6x384xf32>
    %197 = arith.addf %176, %196 : vector<6x384xf32>
    %c0_54 = arith.constant 0 : index
    %c34 = arith.constant 34 : index
    %198 = vector.load %arg1[%c0_54, %c34] : memref<6x68xf32, #tpu.memory_space<vmem>>, vector<6x1xf32>
    %199 = vector.broadcast %198 : vector<6x1xf32> to vector<6x384xf32>
    %200 = arith.mulf %185, %199 : vector<6x384xf32>
    %201 = arith.addf %180, %200 : vector<6x384xf32>
    %c0_55 = arith.constant 0 : index
    %c43 = arith.constant 43 : index
    %202 = vector.load %arg1[%c0_55, %c43] : memref<6x68xf32, #tpu.memory_space<vmem>>, vector<6x1xf32>
    %203 = vector.broadcast %202 : vector<6x1xf32> to vector<6x384xf32>
    %204 = arith.mulf %185, %203 : vector<6x384xf32>
    %205 = arith.addf %184, %204 : vector<6x384xf32>
    %c346_i32 = arith.constant 346 : i32
    %206 = tpu.dynamic_rotate %0 by %c346_i32 dim 1 : vector<6x384xf32>, i32 -> vector<6x384xf32>
    %c0_56 = arith.constant 0 : index
    %c8 = arith.constant 8 : index
    %207 = vector.load %arg1[%c0_56, %c8] : memref<6x68xf32, #tpu.memory_space<vmem>>, vector<6x1xf32>
    %208 = vector.broadcast %207 : vector<6x1xf32> to vector<6x384xf32>
    %209 = arith.mulf %206, %208 : vector<6x384xf32>
    %210 = arith.addf %189, %209 : vector<6x384xf32>
    %c0_57 = arith.constant 0 : index
    %c17 = arith.constant 17 : index
    %211 = vector.load %arg1[%c0_57, %c17] : memref<6x68xf32, #tpu.memory_space<vmem>>, vector<6x1xf32>
    %212 = vector.broadcast %211 : vector<6x1xf32> to vector<6x384xf32>
    %213 = arith.mulf %206, %212 : vector<6x384xf32>
    %214 = arith.addf %193, %213 : vector<6x384xf32>
    %c0_58 = arith.constant 0 : index
    %c26 = arith.constant 26 : index
    %215 = vector.load %arg1[%c0_58, %c26] : memref<6x68xf32, #tpu.memory_space<vmem>>, vector<6x1xf32>
    %216 = vector.broadcast %215 : vector<6x1xf32> to vector<6x384xf32>
    %217 = arith.mulf %206, %216 : vector<6x384xf32>
    %218 = arith.addf %197, %217 : vector<6x384xf32>
    %c0_59 = arith.constant 0 : index
    %c35 = arith.constant 35 : index
    %219 = vector.load %arg1[%c0_59, %c35] : memref<6x68xf32, #tpu.memory_space<vmem>>, vector<6x1xf32>
    %220 = vector.broadcast %219 : vector<6x1xf32> to vector<6x384xf32>
    %221 = arith.mulf %206, %220 : vector<6x384xf32>
    %222 = arith.addf %201, %221 : vector<6x384xf32>
    %c0_60 = arith.constant 0 : index
    %c44 = arith.constant 44 : index
    %223 = vector.load %arg1[%c0_60, %c44] : memref<6x68xf32, #tpu.memory_space<vmem>>, vector<6x1xf32>
    %224 = vector.broadcast %223 : vector<6x1xf32> to vector<6x384xf32>
    %225 = arith.mulf %206, %224 : vector<6x384xf32>
    %226 = arith.addf %205, %225 : vector<6x384xf32>
    %c0_61 = arith.constant 0 : index
    %c45 = arith.constant 45 : index
    %227 = vector.load %arg1[%c0_61, %c45] : memref<6x68xf32, #tpu.memory_space<vmem>>, vector<6x1xf32>
    %228 = vector.broadcast %227 : vector<6x1xf32> to vector<6x384xf32>
    %229 = arith.addf %210, %228 : vector<6x384xf32>
    %c0_62 = arith.constant 0 : index
    %c50 = arith.constant 50 : index
    %230 = vector.load %arg1[%c0_62, %c50] : memref<6x68xf32, #tpu.memory_space<vmem>>, vector<6x1xf32>
    %c0_63 = arith.constant 0 : index
    %c55 = arith.constant 55 : index
    %231 = vector.load %arg1[%c0_63, %c55] : memref<6x68xf32, #tpu.memory_space<vmem>>, vector<6x1xf32>
    %232 = arith.mulf %229, %18 : vector<6x384xf32>
    %cst_64 = arith.constant dense<0.000000e+00> : vector<6xf32>
    %233 = vector.multi_reduction <add>, %232, %cst_64 [1] : vector<6x384xf32> to vector<6xf32>
    %234 = vector.shape_cast %233 : vector<6xf32> to vector<6x1xf32>
    %235 = arith.mulf %229, %232 : vector<6x384xf32>
    %cst_65 = arith.constant dense<0.000000e+00> : vector<6xf32>
    %236 = vector.multi_reduction <add>, %235, %cst_65 [1] : vector<6x384xf32> to vector<6xf32>
    %237 = vector.shape_cast %236 : vector<6xf32> to vector<6x1xf32>
    %238 = arith.mulf %234, %27 : vector<6x1xf32>
    %239 = vector.shape_cast %238 : vector<6x1xf32> to vector<1x6x1xf32>
    %cst_66 = arith.constant dense<0.000000e+00> : vector<1xf32>
    %240 = vector.multi_reduction <add>, %239, %cst_66 [1, 2] : vector<1x6x1xf32> to vector<1xf32>
    %241 = vector.shape_cast %240 : vector<1xf32> to vector<1x1x1xf32>
    %242 = vector.extract %241[0, 0, 0] : f32 from vector<1x1x1xf32>
    %243 = arith.mulf %237, %27 : vector<6x1xf32>
    %244 = vector.shape_cast %243 : vector<6x1xf32> to vector<1x6x1xf32>
    %cst_67 = arith.constant dense<0.000000e+00> : vector<1xf32>
    %245 = vector.multi_reduction <add>, %244, %cst_67 [1, 2] : vector<1x6x1xf32> to vector<1xf32>
    %246 = vector.shape_cast %245 : vector<1xf32> to vector<1x1x1xf32>
    %247 = vector.extract %246[0, 0, 0] : f32 from vector<1x1x1xf32>
    %cst_68 = arith.constant 0.001953125 : f32
    %248 = arith.mulf %242, %cst_68 : f32
    %cst_69 = arith.constant 0.001953125 : f32
    %249 = arith.mulf %247, %cst_69 : f32
    %250 = arith.mulf %248, %248 : f32
    %251 = arith.subf %249, %250 : f32
    %252 = arith.mulf %234, %35 : vector<6x1xf32>
    %253 = vector.shape_cast %252 : vector<6x1xf32> to vector<1x6x1xf32>
    %cst_70 = arith.constant dense<0.000000e+00> : vector<1xf32>
    %254 = vector.multi_reduction <add>, %253, %cst_70 [1, 2] : vector<1x6x1xf32> to vector<1xf32>
    %255 = vector.shape_cast %254 : vector<1xf32> to vector<1x1x1xf32>
    %256 = vector.extract %255[0, 0, 0] : f32 from vector<1x1x1xf32>
    %257 = arith.mulf %237, %35 : vector<6x1xf32>
    %258 = vector.shape_cast %257 : vector<6x1xf32> to vector<1x6x1xf32>
    %cst_71 = arith.constant dense<0.000000e+00> : vector<1xf32>
    %259 = vector.multi_reduction <add>, %258, %cst_71 [1, 2] : vector<1x6x1xf32> to vector<1xf32>
    %260 = vector.shape_cast %259 : vector<1xf32> to vector<1x1x1xf32>
    %261 = vector.extract %260[0, 0, 0] : f32 from vector<1x1x1xf32>
    %cst_72 = arith.constant 0.001953125 : f32
    %262 = arith.mulf %256, %cst_72 : f32
    %cst_73 = arith.constant 0.001953125 : f32
    %263 = arith.mulf %261, %cst_73 : f32
    %264 = arith.mulf %262, %262 : f32
    %265 = arith.subf %263, %264 : f32
    %266 = arith.mulf %234, %43 : vector<6x1xf32>
    %267 = vector.shape_cast %266 : vector<6x1xf32> to vector<1x6x1xf32>
    %cst_74 = arith.constant dense<0.000000e+00> : vector<1xf32>
    %268 = vector.multi_reduction <add>, %267, %cst_74 [1, 2] : vector<1x6x1xf32> to vector<1xf32>
    %269 = vector.shape_cast %268 : vector<1xf32> to vector<1x1x1xf32>
    %270 = vector.extract %269[0, 0, 0] : f32 from vector<1x1x1xf32>
    %271 = arith.mulf %237, %43 : vector<6x1xf32>
    %272 = vector.shape_cast %271 : vector<6x1xf32> to vector<1x6x1xf32>
    %cst_75 = arith.constant dense<0.000000e+00> : vector<1xf32>
    %273 = vector.multi_reduction <add>, %272, %cst_75 [1, 2] : vector<1x6x1xf32> to vector<1xf32>
    %274 = vector.shape_cast %273 : vector<1xf32> to vector<1x1x1xf32>
    %275 = vector.extract %274[0, 0, 0] : f32 from vector<1x1x1xf32>
    %cst_76 = arith.constant 0.001953125 : f32
    %276 = arith.mulf %270, %cst_76 : f32
    %cst_77 = arith.constant 0.001953125 : f32
    %277 = arith.mulf %275, %cst_77 : f32
    %278 = arith.mulf %276, %276 : f32
    %279 = arith.subf %277, %278 : f32
    %280 = vector.broadcast %248 : f32 to vector<6x1xf32>
    %281 = arith.mulf %27, %280 : vector<6x1xf32>
    %282 = vector.broadcast %262 : f32 to vector<6x1xf32>
    %283 = arith.mulf %35, %282 : vector<6x1xf32>
    %284 = arith.addf %281, %283 : vector<6x1xf32>
    %285 = vector.broadcast %276 : f32 to vector<6x1xf32>
    %286 = arith.mulf %43, %285 : vector<6x1xf32>
    %287 = arith.addf %284, %286 : vector<6x1xf32>
    %288 = vector.broadcast %251 : f32 to vector<6x1xf32>
    %289 = arith.mulf %27, %288 : vector<6x1xf32>
    %290 = vector.broadcast %265 : f32 to vector<6x1xf32>
    %291 = arith.mulf %35, %290 : vector<6x1xf32>
    %292 = arith.addf %289, %291 : vector<6x1xf32>
    %293 = vector.broadcast %279 : f32 to vector<6x1xf32>
    %294 = arith.mulf %43, %293 : vector<6x1xf32>
    %295 = arith.addf %292, %294 : vector<6x1xf32>
    %cst_78 = arith.constant 9.99999974E-6 : f32
    %296 = vector.broadcast %cst_78 : f32 to vector<6x1xf32>
    %297 = arith.addf %295, %296 : vector<6x1xf32>
    %298 = math.rsqrt %297 : vector<6x1xf32>
    %299 = arith.mulf %230, %298 : vector<6x1xf32>
    %300 = arith.mulf %287, %299 : vector<6x1xf32>
    %301 = arith.subf %231, %300 : vector<6x1xf32>
    %302 = vector.broadcast %299 : vector<6x1xf32> to vector<6x384xf32>
    %303 = arith.mulf %229, %302 : vector<6x384xf32>
    %304 = vector.broadcast %301 : vector<6x1xf32> to vector<6x384xf32>
    %305 = arith.addf %303, %304 : vector<6x384xf32>
    %cst_79 = arith.constant 0.000000e+00 : f32
    %306 = vector.broadcast %cst_79 : f32 to vector<6x384xf32>
    %307 = arith.maximumf %305, %306 : vector<6x384xf32>
    %c0_80 = arith.constant 0 : index
    %c60 = arith.constant 60 : index
    %308 = vector.load %arg1[%c0_80, %c60] : memref<6x68xf32, #tpu.memory_space<vmem>>, vector<6x1xf32>
    %309 = vector.broadcast %308 : vector<6x1xf32> to vector<6x384xf32>
    %310 = arith.mulf %307, %309 : vector<6x384xf32>
    %c0_81 = arith.constant 0 : index
    %c46 = arith.constant 46 : index
    %311 = vector.load %arg1[%c0_81, %c46] : memref<6x68xf32, #tpu.memory_space<vmem>>, vector<6x1xf32>
    %312 = vector.broadcast %311 : vector<6x1xf32> to vector<6x384xf32>
    %313 = arith.addf %214, %312 : vector<6x384xf32>
    %c0_82 = arith.constant 0 : index
    %c51 = arith.constant 51 : index
    %314 = vector.load %arg1[%c0_82, %c51] : memref<6x68xf32, #tpu.memory_space<vmem>>, vector<6x1xf32>
    %c0_83 = arith.constant 0 : index
    %c56 = arith.constant 56 : index
    %315 = vector.load %arg1[%c0_83, %c56] : memref<6x68xf32, #tpu.memory_space<vmem>>, vector<6x1xf32>
    %316 = arith.mulf %313, %18 : vector<6x384xf32>
    %cst_84 = arith.constant dense<0.000000e+00> : vector<6xf32>
    %317 = vector.multi_reduction <add>, %316, %cst_84 [1] : vector<6x384xf32> to vector<6xf32>
    %318 = vector.shape_cast %317 : vector<6xf32> to vector<6x1xf32>
    %319 = arith.mulf %313, %316 : vector<6x384xf32>
    %cst_85 = arith.constant dense<0.000000e+00> : vector<6xf32>
    %320 = vector.multi_reduction <add>, %319, %cst_85 [1] : vector<6x384xf32> to vector<6xf32>
    %321 = vector.shape_cast %320 : vector<6xf32> to vector<6x1xf32>
    %322 = arith.mulf %318, %27 : vector<6x1xf32>
    %323 = vector.shape_cast %322 : vector<6x1xf32> to vector<1x6x1xf32>
    %cst_86 = arith.constant dense<0.000000e+00> : vector<1xf32>
    %324 = vector.multi_reduction <add>, %323, %cst_86 [1, 2] : vector<1x6x1xf32> to vector<1xf32>
    %325 = vector.shape_cast %324 : vector<1xf32> to vector<1x1x1xf32>
    %326 = vector.extract %325[0, 0, 0] : f32 from vector<1x1x1xf32>
    %327 = arith.mulf %321, %27 : vector<6x1xf32>
    %328 = vector.shape_cast %327 : vector<6x1xf32> to vector<1x6x1xf32>
    %cst_87 = arith.constant dense<0.000000e+00> : vector<1xf32>
    %329 = vector.multi_reduction <add>, %328, %cst_87 [1, 2] : vector<1x6x1xf32> to vector<1xf32>
    %330 = vector.shape_cast %329 : vector<1xf32> to vector<1x1x1xf32>
    %331 = vector.extract %330[0, 0, 0] : f32 from vector<1x1x1xf32>
    %cst_88 = arith.constant 0.001953125 : f32
    %332 = arith.mulf %326, %cst_88 : f32
    %cst_89 = arith.constant 0.001953125 : f32
    %333 = arith.mulf %331, %cst_89 : f32
    %334 = arith.mulf %332, %332 : f32
    %335 = arith.subf %333, %334 : f32
    %336 = arith.mulf %318, %35 : vector<6x1xf32>
    %337 = vector.shape_cast %336 : vector<6x1xf32> to vector<1x6x1xf32>
    %cst_90 = arith.constant dense<0.000000e+00> : vector<1xf32>
    %338 = vector.multi_reduction <add>, %337, %cst_90 [1, 2] : vector<1x6x1xf32> to vector<1xf32>
    %339 = vector.shape_cast %338 : vector<1xf32> to vector<1x1x1xf32>
    %340 = vector.extract %339[0, 0, 0] : f32 from vector<1x1x1xf32>
    %341 = arith.mulf %321, %35 : vector<6x1xf32>
    %342 = vector.shape_cast %341 : vector<6x1xf32> to vector<1x6x1xf32>
    %cst_91 = arith.constant dense<0.000000e+00> : vector<1xf32>
    %343 = vector.multi_reduction <add>, %342, %cst_91 [1, 2] : vector<1x6x1xf32> to vector<1xf32>
    %344 = vector.shape_cast %343 : vector<1xf32> to vector<1x1x1xf32>
    %345 = vector.extract %344[0, 0, 0] : f32 from vector<1x1x1xf32>
    %cst_92 = arith.constant 0.001953125 : f32
    %346 = arith.mulf %340, %cst_92 : f32
    %cst_93 = arith.constant 0.001953125 : f32
    %347 = arith.mulf %345, %cst_93 : f32
    %348 = arith.mulf %346, %346 : f32
    %349 = arith.subf %347, %348 : f32
    %350 = arith.mulf %318, %43 : vector<6x1xf32>
    %351 = vector.shape_cast %350 : vector<6x1xf32> to vector<1x6x1xf32>
    %cst_94 = arith.constant dense<0.000000e+00> : vector<1xf32>
    %352 = vector.multi_reduction <add>, %351, %cst_94 [1, 2] : vector<1x6x1xf32> to vector<1xf32>
    %353 = vector.shape_cast %352 : vector<1xf32> to vector<1x1x1xf32>
    %354 = vector.extract %353[0, 0, 0] : f32 from vector<1x1x1xf32>
    %355 = arith.mulf %321, %43 : vector<6x1xf32>
    %356 = vector.shape_cast %355 : vector<6x1xf32> to vector<1x6x1xf32>
    %cst_95 = arith.constant dense<0.000000e+00> : vector<1xf32>
    %357 = vector.multi_reduction <add>, %356, %cst_95 [1, 2] : vector<1x6x1xf32> to vector<1xf32>
    %358 = vector.shape_cast %357 : vector<1xf32> to vector<1x1x1xf32>
    %359 = vector.extract %358[0, 0, 0] : f32 from vector<1x1x1xf32>
    %cst_96 = arith.constant 0.001953125 : f32
    %360 = arith.mulf %354, %cst_96 : f32
    %cst_97 = arith.constant 0.001953125 : f32
    %361 = arith.mulf %359, %cst_97 : f32
    %362 = arith.mulf %360, %360 : f32
    %363 = arith.subf %361, %362 : f32
    %364 = vector.broadcast %332 : f32 to vector<6x1xf32>
    %365 = arith.mulf %27, %364 : vector<6x1xf32>
    %366 = vector.broadcast %346 : f32 to vector<6x1xf32>
    %367 = arith.mulf %35, %366 : vector<6x1xf32>
    %368 = arith.addf %365, %367 : vector<6x1xf32>
    %369 = vector.broadcast %360 : f32 to vector<6x1xf32>
    %370 = arith.mulf %43, %369 : vector<6x1xf32>
    %371 = arith.addf %368, %370 : vector<6x1xf32>
    %372 = vector.broadcast %335 : f32 to vector<6x1xf32>
    %373 = arith.mulf %27, %372 : vector<6x1xf32>
    %374 = vector.broadcast %349 : f32 to vector<6x1xf32>
    %375 = arith.mulf %35, %374 : vector<6x1xf32>
    %376 = arith.addf %373, %375 : vector<6x1xf32>
    %377 = vector.broadcast %363 : f32 to vector<6x1xf32>
    %378 = arith.mulf %43, %377 : vector<6x1xf32>
    %379 = arith.addf %376, %378 : vector<6x1xf32>
    %cst_98 = arith.constant 9.99999974E-6 : f32
    %380 = vector.broadcast %cst_98 : f32 to vector<6x1xf32>
    %381 = arith.addf %379, %380 : vector<6x1xf32>
    %382 = math.rsqrt %381 : vector<6x1xf32>
    %383 = arith.mulf %314, %382 : vector<6x1xf32>
    %384 = arith.mulf %371, %383 : vector<6x1xf32>
    %385 = arith.subf %315, %384 : vector<6x1xf32>
    %386 = vector.broadcast %383 : vector<6x1xf32> to vector<6x384xf32>
    %387 = arith.mulf %313, %386 : vector<6x384xf32>
    %388 = vector.broadcast %385 : vector<6x1xf32> to vector<6x384xf32>
    %389 = arith.addf %387, %388 : vector<6x384xf32>
    %cst_99 = arith.constant 0.000000e+00 : f32
    %390 = vector.broadcast %cst_99 : f32 to vector<6x384xf32>
    %391 = arith.maximumf %389, %390 : vector<6x384xf32>
    %c0_100 = arith.constant 0 : index
    %c61 = arith.constant 61 : index
    %392 = vector.load %arg1[%c0_100, %c61] : memref<6x68xf32, #tpu.memory_space<vmem>>, vector<6x1xf32>
    %393 = vector.broadcast %392 : vector<6x1xf32> to vector<6x384xf32>
    %394 = arith.mulf %391, %393 : vector<6x384xf32>
    %395 = arith.addf %310, %394 : vector<6x384xf32>
    %c0_101 = arith.constant 0 : index
    %c47 = arith.constant 47 : index
    %396 = vector.load %arg1[%c0_101, %c47] : memref<6x68xf32, #tpu.memory_space<vmem>>, vector<6x1xf32>
    %397 = vector.broadcast %396 : vector<6x1xf32> to vector<6x384xf32>
    %398 = arith.addf %218, %397 : vector<6x384xf32>
    %c0_102 = arith.constant 0 : index
    %c52 = arith.constant 52 : index
    %399 = vector.load %arg1[%c0_102, %c52] : memref<6x68xf32, #tpu.memory_space<vmem>>, vector<6x1xf32>
    %c0_103 = arith.constant 0 : index
    %c57 = arith.constant 57 : index
    %400 = vector.load %arg1[%c0_103, %c57] : memref<6x68xf32, #tpu.memory_space<vmem>>, vector<6x1xf32>
    %401 = arith.mulf %398, %18 : vector<6x384xf32>
    %cst_104 = arith.constant dense<0.000000e+00> : vector<6xf32>
    %402 = vector.multi_reduction <add>, %401, %cst_104 [1] : vector<6x384xf32> to vector<6xf32>
    %403 = vector.shape_cast %402 : vector<6xf32> to vector<6x1xf32>
    %404 = arith.mulf %398, %401 : vector<6x384xf32>
    %cst_105 = arith.constant dense<0.000000e+00> : vector<6xf32>
    %405 = vector.multi_reduction <add>, %404, %cst_105 [1] : vector<6x384xf32> to vector<6xf32>
    %406 = vector.shape_cast %405 : vector<6xf32> to vector<6x1xf32>
    %407 = arith.mulf %403, %27 : vector<6x1xf32>
    %408 = vector.shape_cast %407 : vector<6x1xf32> to vector<1x6x1xf32>
    %cst_106 = arith.constant dense<0.000000e+00> : vector<1xf32>
    %409 = vector.multi_reduction <add>, %408, %cst_106 [1, 2] : vector<1x6x1xf32> to vector<1xf32>
    %410 = vector.shape_cast %409 : vector<1xf32> to vector<1x1x1xf32>
    %411 = vector.extract %410[0, 0, 0] : f32 from vector<1x1x1xf32>
    %412 = arith.mulf %406, %27 : vector<6x1xf32>
    %413 = vector.shape_cast %412 : vector<6x1xf32> to vector<1x6x1xf32>
    %cst_107 = arith.constant dense<0.000000e+00> : vector<1xf32>
    %414 = vector.multi_reduction <add>, %413, %cst_107 [1, 2] : vector<1x6x1xf32> to vector<1xf32>
    %415 = vector.shape_cast %414 : vector<1xf32> to vector<1x1x1xf32>
    %416 = vector.extract %415[0, 0, 0] : f32 from vector<1x1x1xf32>
    %cst_108 = arith.constant 0.001953125 : f32
    %417 = arith.mulf %411, %cst_108 : f32
    %cst_109 = arith.constant 0.001953125 : f32
    %418 = arith.mulf %416, %cst_109 : f32
    %419 = arith.mulf %417, %417 : f32
    %420 = arith.subf %418, %419 : f32
    %421 = arith.mulf %403, %35 : vector<6x1xf32>
    %422 = vector.shape_cast %421 : vector<6x1xf32> to vector<1x6x1xf32>
    %cst_110 = arith.constant dense<0.000000e+00> : vector<1xf32>
    %423 = vector.multi_reduction <add>, %422, %cst_110 [1, 2] : vector<1x6x1xf32> to vector<1xf32>
    %424 = vector.shape_cast %423 : vector<1xf32> to vector<1x1x1xf32>
    %425 = vector.extract %424[0, 0, 0] : f32 from vector<1x1x1xf32>
    %426 = arith.mulf %406, %35 : vector<6x1xf32>
    %427 = vector.shape_cast %426 : vector<6x1xf32> to vector<1x6x1xf32>
    %cst_111 = arith.constant dense<0.000000e+00> : vector<1xf32>
    %428 = vector.multi_reduction <add>, %427, %cst_111 [1, 2] : vector<1x6x1xf32> to vector<1xf32>
    %429 = vector.shape_cast %428 : vector<1xf32> to vector<1x1x1xf32>
    %430 = vector.extract %429[0, 0, 0] : f32 from vector<1x1x1xf32>
    %cst_112 = arith.constant 0.001953125 : f32
    %431 = arith.mulf %425, %cst_112 : f32
    %cst_113 = arith.constant 0.001953125 : f32
    %432 = arith.mulf %430, %cst_113 : f32
    %433 = arith.mulf %431, %431 : f32
    %434 = arith.subf %432, %433 : f32
    %435 = arith.mulf %403, %43 : vector<6x1xf32>
    %436 = vector.shape_cast %435 : vector<6x1xf32> to vector<1x6x1xf32>
    %cst_114 = arith.constant dense<0.000000e+00> : vector<1xf32>
    %437 = vector.multi_reduction <add>, %436, %cst_114 [1, 2] : vector<1x6x1xf32> to vector<1xf32>
    %438 = vector.shape_cast %437 : vector<1xf32> to vector<1x1x1xf32>
    %439 = vector.extract %438[0, 0, 0] : f32 from vector<1x1x1xf32>
    %440 = arith.mulf %406, %43 : vector<6x1xf32>
    %441 = vector.shape_cast %440 : vector<6x1xf32> to vector<1x6x1xf32>
    %cst_115 = arith.constant dense<0.000000e+00> : vector<1xf32>
    %442 = vector.multi_reduction <add>, %441, %cst_115 [1, 2] : vector<1x6x1xf32> to vector<1xf32>
    %443 = vector.shape_cast %442 : vector<1xf32> to vector<1x1x1xf32>
    %444 = vector.extract %443[0, 0, 0] : f32 from vector<1x1x1xf32>
    %cst_116 = arith.constant 0.001953125 : f32
    %445 = arith.mulf %439, %cst_116 : f32
    %cst_117 = arith.constant 0.001953125 : f32
    %446 = arith.mulf %444, %cst_117 : f32
    %447 = arith.mulf %445, %445 : f32
    %448 = arith.subf %446, %447 : f32
    %449 = vector.broadcast %417 : f32 to vector<6x1xf32>
    %450 = arith.mulf %27, %449 : vector<6x1xf32>
    %451 = vector.broadcast %431 : f32 to vector<6x1xf32>
    %452 = arith.mulf %35, %451 : vector<6x1xf32>
    %453 = arith.addf %450, %452 : vector<6x1xf32>
    %454 = vector.broadcast %445 : f32 to vector<6x1xf32>
    %455 = arith.mulf %43, %454 : vector<6x1xf32>
    %456 = arith.addf %453, %455 : vector<6x1xf32>
    %457 = vector.broadcast %420 : f32 to vector<6x1xf32>
    %458 = arith.mulf %27, %457 : vector<6x1xf32>
    %459 = vector.broadcast %434 : f32 to vector<6x1xf32>
    %460 = arith.mulf %35, %459 : vector<6x1xf32>
    %461 = arith.addf %458, %460 : vector<6x1xf32>
    %462 = vector.broadcast %448 : f32 to vector<6x1xf32>
    %463 = arith.mulf %43, %462 : vector<6x1xf32>
    %464 = arith.addf %461, %463 : vector<6x1xf32>
    %cst_118 = arith.constant 9.99999974E-6 : f32
    %465 = vector.broadcast %cst_118 : f32 to vector<6x1xf32>
    %466 = arith.addf %464, %465 : vector<6x1xf32>
    %467 = math.rsqrt %466 : vector<6x1xf32>
    %468 = arith.mulf %399, %467 : vector<6x1xf32>
    %469 = arith.mulf %456, %468 : vector<6x1xf32>
    %470 = arith.subf %400, %469 : vector<6x1xf32>
    %471 = vector.broadcast %468 : vector<6x1xf32> to vector<6x384xf32>
    %472 = arith.mulf %398, %471 : vector<6x384xf32>
    %473 = vector.broadcast %470 : vector<6x1xf32> to vector<6x384xf32>
    %474 = arith.addf %472, %473 : vector<6x384xf32>
    %cst_119 = arith.constant 0.000000e+00 : f32
    %475 = vector.broadcast %cst_119 : f32 to vector<6x384xf32>
    %476 = arith.maximumf %474, %475 : vector<6x384xf32>
    %c0_120 = arith.constant 0 : index
    %c62 = arith.constant 62 : index
    %477 = vector.load %arg1[%c0_120, %c62] : memref<6x68xf32, #tpu.memory_space<vmem>>, vector<6x1xf32>
    %478 = vector.broadcast %477 : vector<6x1xf32> to vector<6x384xf32>
    %479 = arith.mulf %476, %478 : vector<6x384xf32>
    %480 = arith.addf %395, %479 : vector<6x384xf32>
    %c0_121 = arith.constant 0 : index
    %c48 = arith.constant 48 : index
    %481 = vector.load %arg1[%c0_121, %c48] : memref<6x68xf32, #tpu.memory_space<vmem>>, vector<6x1xf32>
    %482 = vector.broadcast %481 : vector<6x1xf32> to vector<6x384xf32>
    %483 = arith.addf %222, %482 : vector<6x384xf32>
    %c0_122 = arith.constant 0 : index
    %c53 = arith.constant 53 : index
    %484 = vector.load %arg1[%c0_122, %c53] : memref<6x68xf32, #tpu.memory_space<vmem>>, vector<6x1xf32>
    %c0_123 = arith.constant 0 : index
    %c58 = arith.constant 58 : index
    %485 = vector.load %arg1[%c0_123, %c58] : memref<6x68xf32, #tpu.memory_space<vmem>>, vector<6x1xf32>
    %486 = arith.mulf %483, %18 : vector<6x384xf32>
    %cst_124 = arith.constant dense<0.000000e+00> : vector<6xf32>
    %487 = vector.multi_reduction <add>, %486, %cst_124 [1] : vector<6x384xf32> to vector<6xf32>
    %488 = vector.shape_cast %487 : vector<6xf32> to vector<6x1xf32>
    %489 = arith.mulf %483, %486 : vector<6x384xf32>
    %cst_125 = arith.constant dense<0.000000e+00> : vector<6xf32>
    %490 = vector.multi_reduction <add>, %489, %cst_125 [1] : vector<6x384xf32> to vector<6xf32>
    %491 = vector.shape_cast %490 : vector<6xf32> to vector<6x1xf32>
    %492 = arith.mulf %488, %27 : vector<6x1xf32>
    %493 = vector.shape_cast %492 : vector<6x1xf32> to vector<1x6x1xf32>
    %cst_126 = arith.constant dense<0.000000e+00> : vector<1xf32>
    %494 = vector.multi_reduction <add>, %493, %cst_126 [1, 2] : vector<1x6x1xf32> to vector<1xf32>
    %495 = vector.shape_cast %494 : vector<1xf32> to vector<1x1x1xf32>
    %496 = vector.extract %495[0, 0, 0] : f32 from vector<1x1x1xf32>
    %497 = arith.mulf %491, %27 : vector<6x1xf32>
    %498 = vector.shape_cast %497 : vector<6x1xf32> to vector<1x6x1xf32>
    %cst_127 = arith.constant dense<0.000000e+00> : vector<1xf32>
    %499 = vector.multi_reduction <add>, %498, %cst_127 [1, 2] : vector<1x6x1xf32> to vector<1xf32>
    %500 = vector.shape_cast %499 : vector<1xf32> to vector<1x1x1xf32>
    %501 = vector.extract %500[0, 0, 0] : f32 from vector<1x1x1xf32>
    %cst_128 = arith.constant 0.001953125 : f32
    %502 = arith.mulf %496, %cst_128 : f32
    %cst_129 = arith.constant 0.001953125 : f32
    %503 = arith.mulf %501, %cst_129 : f32
    %504 = arith.mulf %502, %502 : f32
    %505 = arith.subf %503, %504 : f32
    %506 = arith.mulf %488, %35 : vector<6x1xf32>
    %507 = vector.shape_cast %506 : vector<6x1xf32> to vector<1x6x1xf32>
    %cst_130 = arith.constant dense<0.000000e+00> : vector<1xf32>
    %508 = vector.multi_reduction <add>, %507, %cst_130 [1, 2] : vector<1x6x1xf32> to vector<1xf32>
    %509 = vector.shape_cast %508 : vector<1xf32> to vector<1x1x1xf32>
    %510 = vector.extract %509[0, 0, 0] : f32 from vector<1x1x1xf32>
    %511 = arith.mulf %491, %35 : vector<6x1xf32>
    %512 = vector.shape_cast %511 : vector<6x1xf32> to vector<1x6x1xf32>
    %cst_131 = arith.constant dense<0.000000e+00> : vector<1xf32>
    %513 = vector.multi_reduction <add>, %512, %cst_131 [1, 2] : vector<1x6x1xf32> to vector<1xf32>
    %514 = vector.shape_cast %513 : vector<1xf32> to vector<1x1x1xf32>
    %515 = vector.extract %514[0, 0, 0] : f32 from vector<1x1x1xf32>
    %cst_132 = arith.constant 0.001953125 : f32
    %516 = arith.mulf %510, %cst_132 : f32
    %cst_133 = arith.constant 0.001953125 : f32
    %517 = arith.mulf %515, %cst_133 : f32
    %518 = arith.mulf %516, %516 : f32
    %519 = arith.subf %517, %518 : f32
    %520 = arith.mulf %488, %43 : vector<6x1xf32>
    %521 = vector.shape_cast %520 : vector<6x1xf32> to vector<1x6x1xf32>
    %cst_134 = arith.constant dense<0.000000e+00> : vector<1xf32>
    %522 = vector.multi_reduction <add>, %521, %cst_134 [1, 2] : vector<1x6x1xf32> to vector<1xf32>
    %523 = vector.shape_cast %522 : vector<1xf32> to vector<1x1x1xf32>
    %524 = vector.extract %523[0, 0, 0] : f32 from vector<1x1x1xf32>
    %525 = arith.mulf %491, %43 : vector<6x1xf32>
    %526 = vector.shape_cast %525 : vector<6x1xf32> to vector<1x6x1xf32>
    %cst_135 = arith.constant dense<0.000000e+00> : vector<1xf32>
    %527 = vector.multi_reduction <add>, %526, %cst_135 [1, 2] : vector<1x6x1xf32> to vector<1xf32>
    %528 = vector.shape_cast %527 : vector<1xf32> to vector<1x1x1xf32>
    %529 = vector.extract %528[0, 0, 0] : f32 from vector<1x1x1xf32>
    %cst_136 = arith.constant 0.001953125 : f32
    %530 = arith.mulf %524, %cst_136 : f32
    %cst_137 = arith.constant 0.001953125 : f32
    %531 = arith.mulf %529, %cst_137 : f32
    %532 = arith.mulf %530, %530 : f32
    %533 = arith.subf %531, %532 : f32
    %534 = vector.broadcast %502 : f32 to vector<6x1xf32>
    %535 = arith.mulf %27, %534 : vector<6x1xf32>
    %536 = vector.broadcast %516 : f32 to vector<6x1xf32>
    %537 = arith.mulf %35, %536 : vector<6x1xf32>
    %538 = arith.addf %535, %537 : vector<6x1xf32>
    %539 = vector.broadcast %530 : f32 to vector<6x1xf32>
    %540 = arith.mulf %43, %539 : vector<6x1xf32>
    %541 = arith.addf %538, %540 : vector<6x1xf32>
    %542 = vector.broadcast %505 : f32 to vector<6x1xf32>
    %543 = arith.mulf %27, %542 : vector<6x1xf32>
    %544 = vector.broadcast %519 : f32 to vector<6x1xf32>
    %545 = arith.mulf %35, %544 : vector<6x1xf32>
    %546 = arith.addf %543, %545 : vector<6x1xf32>
    %547 = vector.broadcast %533 : f32 to vector<6x1xf32>
    %548 = arith.mulf %43, %547 : vector<6x1xf32>
    %549 = arith.addf %546, %548 : vector<6x1xf32>
    %cst_138 = arith.constant 9.99999974E-6 : f32
    %550 = vector.broadcast %cst_138 : f32 to vector<6x1xf32>
    %551 = arith.addf %549, %550 : vector<6x1xf32>
    %552 = math.rsqrt %551 : vector<6x1xf32>
    %553 = arith.mulf %484, %552 : vector<6x1xf32>
    %554 = arith.mulf %541, %553 : vector<6x1xf32>
    %555 = arith.subf %485, %554 : vector<6x1xf32>
    %556 = vector.broadcast %553 : vector<6x1xf32> to vector<6x384xf32>
    %557 = arith.mulf %483, %556 : vector<6x384xf32>
    %558 = vector.broadcast %555 : vector<6x1xf32> to vector<6x384xf32>
    %559 = arith.addf %557, %558 : vector<6x384xf32>
    %cst_139 = arith.constant 0.000000e+00 : f32
    %560 = vector.broadcast %cst_139 : f32 to vector<6x384xf32>
    %561 = arith.maximumf %559, %560 : vector<6x384xf32>
    %c0_140 = arith.constant 0 : index
    %c63 = arith.constant 63 : index
    %562 = vector.load %arg1[%c0_140, %c63] : memref<6x68xf32, #tpu.memory_space<vmem>>, vector<6x1xf32>
    %563 = vector.broadcast %562 : vector<6x1xf32> to vector<6x384xf32>
    %564 = arith.mulf %561, %563 : vector<6x384xf32>
    %565 = arith.addf %480, %564 : vector<6x384xf32>
    %c0_141 = arith.constant 0 : index
    %c49 = arith.constant 49 : index
    %566 = vector.load %arg1[%c0_141, %c49] : memref<6x68xf32, #tpu.memory_space<vmem>>, vector<6x1xf32>
    %567 = vector.broadcast %566 : vector<6x1xf32> to vector<6x384xf32>
    %568 = arith.addf %226, %567 : vector<6x384xf32>
    %c0_142 = arith.constant 0 : index
    %c54 = arith.constant 54 : index
    %569 = vector.load %arg1[%c0_142, %c54] : memref<6x68xf32, #tpu.memory_space<vmem>>, vector<6x1xf32>
    %c0_143 = arith.constant 0 : index
    %c59 = arith.constant 59 : index
    %570 = vector.load %arg1[%c0_143, %c59] : memref<6x68xf32, #tpu.memory_space<vmem>>, vector<6x1xf32>
    %571 = arith.mulf %568, %18 : vector<6x384xf32>
    %cst_144 = arith.constant dense<0.000000e+00> : vector<6xf32>
    %572 = vector.multi_reduction <add>, %571, %cst_144 [1] : vector<6x384xf32> to vector<6xf32>
    %573 = vector.shape_cast %572 : vector<6xf32> to vector<6x1xf32>
    %574 = arith.mulf %568, %571 : vector<6x384xf32>
    %cst_145 = arith.constant dense<0.000000e+00> : vector<6xf32>
    %575 = vector.multi_reduction <add>, %574, %cst_145 [1] : vector<6x384xf32> to vector<6xf32>
    %576 = vector.shape_cast %575 : vector<6xf32> to vector<6x1xf32>
    %577 = arith.mulf %573, %27 : vector<6x1xf32>
    %578 = vector.shape_cast %577 : vector<6x1xf32> to vector<1x6x1xf32>
    %cst_146 = arith.constant dense<0.000000e+00> : vector<1xf32>
    %579 = vector.multi_reduction <add>, %578, %cst_146 [1, 2] : vector<1x6x1xf32> to vector<1xf32>
    %580 = vector.shape_cast %579 : vector<1xf32> to vector<1x1x1xf32>
    %581 = vector.extract %580[0, 0, 0] : f32 from vector<1x1x1xf32>
    %582 = arith.mulf %576, %27 : vector<6x1xf32>
    %583 = vector.shape_cast %582 : vector<6x1xf32> to vector<1x6x1xf32>
    %cst_147 = arith.constant dense<0.000000e+00> : vector<1xf32>
    %584 = vector.multi_reduction <add>, %583, %cst_147 [1, 2] : vector<1x6x1xf32> to vector<1xf32>
    %585 = vector.shape_cast %584 : vector<1xf32> to vector<1x1x1xf32>
    %586 = vector.extract %585[0, 0, 0] : f32 from vector<1x1x1xf32>
    %cst_148 = arith.constant 0.001953125 : f32
    %587 = arith.mulf %581, %cst_148 : f32
    %cst_149 = arith.constant 0.001953125 : f32
    %588 = arith.mulf %586, %cst_149 : f32
    %589 = arith.mulf %587, %587 : f32
    %590 = arith.subf %588, %589 : f32
    %591 = arith.mulf %573, %35 : vector<6x1xf32>
    %592 = vector.shape_cast %591 : vector<6x1xf32> to vector<1x6x1xf32>
    %cst_150 = arith.constant dense<0.000000e+00> : vector<1xf32>
    %593 = vector.multi_reduction <add>, %592, %cst_150 [1, 2] : vector<1x6x1xf32> to vector<1xf32>
    %594 = vector.shape_cast %593 : vector<1xf32> to vector<1x1x1xf32>
    %595 = vector.extract %594[0, 0, 0] : f32 from vector<1x1x1xf32>
    %596 = arith.mulf %576, %35 : vector<6x1xf32>
    %597 = vector.shape_cast %596 : vector<6x1xf32> to vector<1x6x1xf32>
    %cst_151 = arith.constant dense<0.000000e+00> : vector<1xf32>
    %598 = vector.multi_reduction <add>, %597, %cst_151 [1, 2] : vector<1x6x1xf32> to vector<1xf32>
    %599 = vector.shape_cast %598 : vector<1xf32> to vector<1x1x1xf32>
    %600 = vector.extract %599[0, 0, 0] : f32 from vector<1x1x1xf32>
    %cst_152 = arith.constant 0.001953125 : f32
    %601 = arith.mulf %595, %cst_152 : f32
    %cst_153 = arith.constant 0.001953125 : f32
    %602 = arith.mulf %600, %cst_153 : f32
    %603 = arith.mulf %601, %601 : f32
    %604 = arith.subf %602, %603 : f32
    %605 = arith.mulf %573, %43 : vector<6x1xf32>
    %606 = vector.shape_cast %605 : vector<6x1xf32> to vector<1x6x1xf32>
    %cst_154 = arith.constant dense<0.000000e+00> : vector<1xf32>
    %607 = vector.multi_reduction <add>, %606, %cst_154 [1, 2] : vector<1x6x1xf32> to vector<1xf32>
    %608 = vector.shape_cast %607 : vector<1xf32> to vector<1x1x1xf32>
    %609 = vector.extract %608[0, 0, 0] : f32 from vector<1x1x1xf32>
    %610 = arith.mulf %576, %43 : vector<6x1xf32>
    %611 = vector.shape_cast %610 : vector<6x1xf32> to vector<1x6x1xf32>
    %cst_155 = arith.constant dense<0.000000e+00> : vector<1xf32>
    %612 = vector.multi_reduction <add>, %611, %cst_155 [1, 2] : vector<1x6x1xf32> to vector<1xf32>
    %613 = vector.shape_cast %612 : vector<1xf32> to vector<1x1x1xf32>
    %614 = vector.extract %613[0, 0, 0] : f32 from vector<1x1x1xf32>
    %cst_156 = arith.constant 0.001953125 : f32
    %615 = arith.mulf %609, %cst_156 : f32
    %cst_157 = arith.constant 0.001953125 : f32
    %616 = arith.mulf %614, %cst_157 : f32
    %617 = arith.mulf %615, %615 : f32
    %618 = arith.subf %616, %617 : f32
    %619 = vector.broadcast %587 : f32 to vector<6x1xf32>
    %620 = arith.mulf %27, %619 : vector<6x1xf32>
    %621 = vector.broadcast %601 : f32 to vector<6x1xf32>
    %622 = arith.mulf %35, %621 : vector<6x1xf32>
    %623 = arith.addf %620, %622 : vector<6x1xf32>
    %624 = vector.broadcast %615 : f32 to vector<6x1xf32>
    %625 = arith.mulf %43, %624 : vector<6x1xf32>
    %626 = arith.addf %623, %625 : vector<6x1xf32>
    %627 = vector.broadcast %590 : f32 to vector<6x1xf32>
    %628 = arith.mulf %27, %627 : vector<6x1xf32>
    %629 = vector.broadcast %604 : f32 to vector<6x1xf32>
    %630 = arith.mulf %35, %629 : vector<6x1xf32>
    %631 = arith.addf %628, %630 : vector<6x1xf32>
    %632 = vector.broadcast %618 : f32 to vector<6x1xf32>
    %633 = arith.mulf %43, %632 : vector<6x1xf32>
    %634 = arith.addf %631, %633 : vector<6x1xf32>
    %cst_158 = arith.constant 9.99999974E-6 : f32
    %635 = vector.broadcast %cst_158 : f32 to vector<6x1xf32>
    %636 = arith.addf %634, %635 : vector<6x1xf32>
    %637 = math.rsqrt %636 : vector<6x1xf32>
    %638 = arith.mulf %569, %637 : vector<6x1xf32>
    %639 = arith.mulf %626, %638 : vector<6x1xf32>
    %640 = arith.subf %570, %639 : vector<6x1xf32>
    %641 = vector.broadcast %638 : vector<6x1xf32> to vector<6x384xf32>
    %642 = arith.mulf %568, %641 : vector<6x384xf32>
    %643 = vector.broadcast %640 : vector<6x1xf32> to vector<6x384xf32>
    %644 = arith.addf %642, %643 : vector<6x384xf32>
    %cst_159 = arith.constant 0.000000e+00 : f32
    %645 = vector.broadcast %cst_159 : f32 to vector<6x384xf32>
    %646 = arith.maximumf %644, %645 : vector<6x384xf32>
    %c0_160 = arith.constant 0 : index
    %c64 = arith.constant 64 : index
    %647 = vector.load %arg1[%c0_160, %c64] : memref<6x68xf32, #tpu.memory_space<vmem>>, vector<6x1xf32>
    %648 = vector.broadcast %647 : vector<6x1xf32> to vector<6x384xf32>
    %649 = arith.mulf %646, %648 : vector<6x384xf32>
    %650 = arith.addf %565, %649 : vector<6x384xf32>
    %c0_161 = arith.constant 0 : index
    %c65 = arith.constant 65 : index
    %651 = vector.load %arg1[%c0_161, %c65] : memref<6x68xf32, #tpu.memory_space<vmem>>, vector<6x1xf32>
    %652 = vector.broadcast %651 : vector<6x1xf32> to vector<6x384xf32>
    %653 = arith.addf %650, %652 : vector<6x384xf32>
    %c0_162 = arith.constant 0 : index
    %c66 = arith.constant 66 : index
    %654 = vector.load %arg1[%c0_162, %c66] : memref<6x68xf32, #tpu.memory_space<vmem>>, vector<6x1xf32>
    %c0_163 = arith.constant 0 : index
    %c67 = arith.constant 67 : index
    %655 = vector.load %arg1[%c0_163, %c67] : memref<6x68xf32, #tpu.memory_space<vmem>>, vector<6x1xf32>
    %656 = arith.mulf %653, %18 : vector<6x384xf32>
    %cst_164 = arith.constant dense<0.000000e+00> : vector<6xf32>
    %657 = vector.multi_reduction <add>, %656, %cst_164 [1] : vector<6x384xf32> to vector<6xf32>
    %658 = vector.shape_cast %657 : vector<6xf32> to vector<6x1xf32>
    %659 = arith.mulf %653, %656 : vector<6x384xf32>
    %cst_165 = arith.constant dense<0.000000e+00> : vector<6xf32>
    %660 = vector.multi_reduction <add>, %659, %cst_165 [1] : vector<6x384xf32> to vector<6xf32>
    %661 = vector.shape_cast %660 : vector<6xf32> to vector<6x1xf32>
    %662 = arith.mulf %658, %27 : vector<6x1xf32>
    %663 = vector.shape_cast %662 : vector<6x1xf32> to vector<1x6x1xf32>
    %cst_166 = arith.constant dense<0.000000e+00> : vector<1xf32>
    %664 = vector.multi_reduction <add>, %663, %cst_166 [1, 2] : vector<1x6x1xf32> to vector<1xf32>
    %665 = vector.shape_cast %664 : vector<1xf32> to vector<1x1x1xf32>
    %666 = vector.extract %665[0, 0, 0] : f32 from vector<1x1x1xf32>
    %667 = arith.mulf %661, %27 : vector<6x1xf32>
    %668 = vector.shape_cast %667 : vector<6x1xf32> to vector<1x6x1xf32>
    %cst_167 = arith.constant dense<0.000000e+00> : vector<1xf32>
    %669 = vector.multi_reduction <add>, %668, %cst_167 [1, 2] : vector<1x6x1xf32> to vector<1xf32>
    %670 = vector.shape_cast %669 : vector<1xf32> to vector<1x1x1xf32>
    %671 = vector.extract %670[0, 0, 0] : f32 from vector<1x1x1xf32>
    %cst_168 = arith.constant 0.001953125 : f32
    %672 = arith.mulf %666, %cst_168 : f32
    %cst_169 = arith.constant 0.001953125 : f32
    %673 = arith.mulf %671, %cst_169 : f32
    %674 = arith.mulf %672, %672 : f32
    %675 = arith.subf %673, %674 : f32
    %676 = arith.mulf %658, %35 : vector<6x1xf32>
    %677 = vector.shape_cast %676 : vector<6x1xf32> to vector<1x6x1xf32>
    %cst_170 = arith.constant dense<0.000000e+00> : vector<1xf32>
    %678 = vector.multi_reduction <add>, %677, %cst_170 [1, 2] : vector<1x6x1xf32> to vector<1xf32>
    %679 = vector.shape_cast %678 : vector<1xf32> to vector<1x1x1xf32>
    %680 = vector.extract %679[0, 0, 0] : f32 from vector<1x1x1xf32>
    %681 = arith.mulf %661, %35 : vector<6x1xf32>
    %682 = vector.shape_cast %681 : vector<6x1xf32> to vector<1x6x1xf32>
    %cst_171 = arith.constant dense<0.000000e+00> : vector<1xf32>
    %683 = vector.multi_reduction <add>, %682, %cst_171 [1, 2] : vector<1x6x1xf32> to vector<1xf32>
    %684 = vector.shape_cast %683 : vector<1xf32> to vector<1x1x1xf32>
    %685 = vector.extract %684[0, 0, 0] : f32 from vector<1x1x1xf32>
    %cst_172 = arith.constant 0.001953125 : f32
    %686 = arith.mulf %680, %cst_172 : f32
    %cst_173 = arith.constant 0.001953125 : f32
    %687 = arith.mulf %685, %cst_173 : f32
    %688 = arith.mulf %686, %686 : f32
    %689 = arith.subf %687, %688 : f32
    %690 = arith.mulf %658, %43 : vector<6x1xf32>
    %691 = vector.shape_cast %690 : vector<6x1xf32> to vector<1x6x1xf32>
    %cst_174 = arith.constant dense<0.000000e+00> : vector<1xf32>
    %692 = vector.multi_reduction <add>, %691, %cst_174 [1, 2] : vector<1x6x1xf32> to vector<1xf32>
    %693 = vector.shape_cast %692 : vector<1xf32> to vector<1x1x1xf32>
    %694 = vector.extract %693[0, 0, 0] : f32 from vector<1x1x1xf32>
    %695 = arith.mulf %661, %43 : vector<6x1xf32>
    %696 = vector.shape_cast %695 : vector<6x1xf32> to vector<1x6x1xf32>
    %cst_175 = arith.constant dense<0.000000e+00> : vector<1xf32>
    %697 = vector.multi_reduction <add>, %696, %cst_175 [1, 2] : vector<1x6x1xf32> to vector<1xf32>
    %698 = vector.shape_cast %697 : vector<1xf32> to vector<1x1x1xf32>
    %699 = vector.extract %698[0, 0, 0] : f32 from vector<1x1x1xf32>
    %cst_176 = arith.constant 0.001953125 : f32
    %700 = arith.mulf %694, %cst_176 : f32
    %cst_177 = arith.constant 0.001953125 : f32
    %701 = arith.mulf %699, %cst_177 : f32
    %702 = arith.mulf %700, %700 : f32
    %703 = arith.subf %701, %702 : f32
    %704 = vector.broadcast %672 : f32 to vector<6x1xf32>
    %705 = arith.mulf %27, %704 : vector<6x1xf32>
    %706 = vector.broadcast %686 : f32 to vector<6x1xf32>
    %707 = arith.mulf %35, %706 : vector<6x1xf32>
    %708 = arith.addf %705, %707 : vector<6x1xf32>
    %709 = vector.broadcast %700 : f32 to vector<6x1xf32>
    %710 = arith.mulf %43, %709 : vector<6x1xf32>
    %711 = arith.addf %708, %710 : vector<6x1xf32>
    %712 = vector.broadcast %675 : f32 to vector<6x1xf32>
    %713 = arith.mulf %27, %712 : vector<6x1xf32>
    %714 = vector.broadcast %689 : f32 to vector<6x1xf32>
    %715 = arith.mulf %35, %714 : vector<6x1xf32>
    %716 = arith.addf %713, %715 : vector<6x1xf32>
    %717 = vector.broadcast %703 : f32 to vector<6x1xf32>
    %718 = arith.mulf %43, %717 : vector<6x1xf32>
    %719 = arith.addf %716, %718 : vector<6x1xf32>
    %cst_178 = arith.constant 9.99999974E-6 : f32
    %720 = vector.broadcast %cst_178 : f32 to vector<6x1xf32>
    %721 = arith.addf %719, %720 : vector<6x1xf32>
    %722 = math.rsqrt %721 : vector<6x1xf32>
    %723 = arith.mulf %654, %722 : vector<6x1xf32>
    %724 = arith.mulf %711, %723 : vector<6x1xf32>
    %725 = arith.subf %655, %724 : vector<6x1xf32>
    %726 = vector.broadcast %723 : vector<6x1xf32> to vector<6x384xf32>
    %727 = arith.mulf %653, %726 : vector<6x384xf32>
    %728 = vector.broadcast %725 : vector<6x1xf32> to vector<6x384xf32>
    %729 = arith.addf %727, %728 : vector<6x384xf32>
    %cst_179 = arith.constant 0.000000e+00 : f32
    %730 = vector.broadcast %cst_179 : f32 to vector<6x384xf32>
    %731 = arith.cmpf ogt, %729, %730 : vector<6x384xf32>
    %cst_180 = arith.constant 0.000000e+00 : f32
    %732 = vector.broadcast %cst_180 : f32 to vector<6x384xf32>
    %733 = arith.minimumf %729, %732 : vector<6x384xf32>
    %734 = math.exp %733 : vector<6x384xf32>
    %cst_181 = arith.constant 1.000000e+00 : f32
    %735 = vector.broadcast %cst_181 : f32 to vector<6x384xf32>
    %736 = arith.subf %734, %735 : vector<6x384xf32>
    %cst_182 = arith.constant 1.67326319 : f32
    %737 = vector.broadcast %cst_182 : f32 to vector<6x384xf32>
    %738 = arith.mulf %737, %736 : vector<6x384xf32>
    %739 = arith.select %731, %729, %738 : vector<6x384xi1>, vector<6x384xf32>
    %cst_183 = arith.constant 1.05070102 : f32
    %740 = vector.broadcast %cst_183 : f32 to vector<6x384xf32>
    %741 = arith.mulf %740, %739 : vector<6x384xf32>
    %742 = arith.addf %122, %741 : vector<6x384xf32>
    %c0_184 = arith.constant 0 : index
    %c0_185 = arith.constant 0 : index
    %743 = vector.load %arg2[%c0_184, %c0_185] : memref<6x384xf32, #tpu.memory_space<vmem>>, vector<6x384xf32>
    tpu.vector_store %arg2[%c0_184, %c0_185], %742 {strides = array<i32>} : memref<6x384xf32, #tpu.memory_space<vmem>>, vector<6x384xf32>,
    return
  }
}

</mosaic_0001>

<bundles_post_ra>
// kernel: block_forward.1
= control target key start
LH: loop header
LB: loop body
LE: loop exit
PB: predicated region body
PF: predicated region fallthrough
CT: control target
= control target key end

     0   :  { %v1795_v0 = vmov 1   ;;  %v1796_v1 = vmov 0   ;;  %v1797_v3 = vmov 10   ;;  %v1798_v4 = vmov 9   ;;  %s1806_s13 = smov 127   ;;  %s1812_s18 = smov 126   ;;  %s2838_s1 = inlined_call_operand.vmem [shape: f32[6,68], index: 1, kind: input, shape index: {}]   ;;  %s2839_s0 = inlined_call_operand.vmem [shape: f32[6,384], index: 0, kind: input, shape index: {}]   ;;  %s2840_s2 = inlined_call_operand.vmem [shape: f32[6,384], index: 2, kind: output, shape index: {}]  }
   0x1   :  { %1709 = vset.pattern.permute.xlu1 %v1795_v0  ;;  %1707 = vset.pattern.permute.xlu0 %v1796_v1  ;;  %v1892_v2 = vld [vmem:[%s2838_s1] sm:$0x3f]  ;;  %v1799_v5 = vmov 18   ;;  %v1800_v6 = vmov 19   ;;  %v1801_v7 = vmov 2   ;;  %v1802_v8 = vmov 27  }
   0x2   :  { %110 = vperm.xlu1 %1709, %v1892_v2   ;;  %65 = vperm.xlu0 %1707, %v1892_v2   ;;  %v1803_v9 = vmov 11   ;;  %v1804_v10 = vmov 3   ;;  %v1907_v11 = vld [vmem:[%s2839_s0] sm:$0x3f]  ;;  %v1805_v12 = vmov 28   ;;  %v1807_v14 = vmov 29  }
   0x3   :  { %v1914_v13 = vld [vmem:[%s2839_s0 + $0x10] sm:$0x3f]  ;;  %v1808_v15 = vmov 20   ;;  %v1809_v16 = vmov 12   ;;  %v1810_v17 = vmov 13   ;;  %v1811_v18 = vmov 36  }
   0x4   :  { %v1925_v19 = vld [vmem:[%s2839_s0 + $0x8] sm:$0x3f]  ;;  %v1813_v20 = vmov 30   ;;  %v1814_v21 = vmov 37   ;;  %v1815_v22 = vmov 14   ;;  %v1816_v23 = vmov 21  }
   0x5   :  { %s1817_s0 = smov 110   ;;  %v1818_v24 = vmov 31   ;;  %v1819_v25 = vmov 4   ;;  %v1820_v26 = vmov 15   ;;  %v1821_v27 = vmov 38   ;;  %s1822_s19 = smov 109  }
   0x6   :  { %1710 = vset.pattern.permute.xlu1 %v1797_v3  ;;  %1708 = vset.pattern.permute.xlu0 %v1798_v4  ;;  %v1823_v28 = vmov 32   ;;  %v1824_v29 = vmov 22   ;;  %v1825_v30 = vmov 16   ;;  %v1826_v31 = vmov 5   ;;  %s1827_s20 = smov 108   ;;  %s1831_s21 = smov 92  }
   0x7   :  { %120 = vperm.xlu1 %1710, %v1892_v2   ;;  %72 = vperm.xlu0 %1708, %v1892_v2   ;;  %v1828_v32 = vmov 33   ;;  %v1829_v33 = vmov 39   ;;  %v1830_v34 = vmov 17   ;;  %v1832_v35 = vmov 34   ;;  %s1835_s22 = smov 91   ;;  %s1839_s23 = smov 90  }
   0x8   :  { %v1833_v36 = vmov 23   ;;  %v1834_v37 = vmov 6   ;;  %v1836_v38 = vmov 43   ;;  %v1837_v39 = vmov 40  }
   0x9   :  { %v1838_v40 = vmov 46   ;;  %v1840_v41 = vmov 47   ;;  %v1841_v42 = vmov 24   ;;  %v1842_v43 = vmov 7  }
   0xa   :  { %v1843_v45 = vmov 41   ;;  %v1844_v48 = vmov 25   ;;  %v1845_v50 = vmov 8   ;;  %v1846_v52 = vmov 42  }
   0xb   :  { %1711 = vset.pattern.permute.xlu1 %v1799_v5  ;;  %1712 = vset.pattern.permute.xlu0 %v1800_v6  ;;  %v1847_v56 = vmov 26   ;;  %v1848_v58 = vmov 35   ;;  %v1849_v63 = vmov 45   ;;  %v1850_v4 = vmov 44  }
   0xc   :  { %79 = vperm.xlu1 %1711, %v1892_v2   ;;  %130 = vperm.xlu0 %1712, %v1892_v2   ;;  %v14_v6 = vlaneseq }
  0x10   :  { %1713 = vset.pattern.permute.xlu1 %v1801_v7  ;;  %1715 = vset.pattern.permute.xlu0 %v1802_v8  ;;  %v49_v8 = vshrl.u32 %v14_v6, 7 }
  0x11   :  { %170 = vperm.xlu1 %1713, %v1892_v2   ;;  %86 = vperm.xlu0 %1715, %v1892_v2  }
  0x12   :  { %vm54_vm0 = vcmp.ge.s32.totalorder %v49_v8, 2  ;;  %vm55_vm1 = vcmp.lt.s32.totalorder %v49_v8, 4  ;;  %vm58_vm2 = vcmp.ge.s32.totalorder %v49_v8, 4  ;;  %vm59_vm3 = vcmp.lt.s32.totalorder %v49_v8, 6 }
  0x13   :  { %vm51_vm4 = vcmp.lt.s32.totalorder %v49_v8, 2  ;;  %vm56_vm5 = vmand %vm54_vm0, %vm55_vm1 }
  0x14   :  { %vm60_vm6 = vmand %vm58_vm2, %vm59_vm3 }
  0x15   :  { %1714 = vset.pattern.permute.xlu1 %v1803_v9  ;;  %1718 = vset.pattern.permute.xlu0 %v1804_v10 }
  0x16   :  { %180 = vperm.xlu1 %1714, %v1892_v2   ;;  %230 = vperm.xlu0 %1718, %v1892_v2  }
  0x1a   :  { %1716 = vset.pattern.permute.xlu1 %v1805_v12  ;;  %99 = vrot.lane.b32.xlu0 %v1907_v11, %s1806_s13  ;;  %v1851_v12 = vmov 48  }
  0x1b   :  { %140 = vperm.xlu1 %1716, %v1892_v2   ;;  %1722 = vset.pattern.permute.xlu0 %v1807_v14 }
  0x1e   :  { %103 = vrot.lane.b32.xlu0 %v1914_v13, %s1806_s13 }
  0x1f   :  { %1717 = vset.pattern.permute.xlu1 %v1808_v15 }
  0x20   :  { %190 = vperm.xlu1 %1717, %v1892_v2  }
  0x22   :  { %200 = vperm.xlu0 %1722, %v1892_v2  }
  0x24   :  { %1719 = vset.pattern.permute.xlu1 %v1809_v16  ;;  %v1852_v16 = vmov 49  }
  0x25   :  { %240 = vperm.xlu1 %1719, %v1892_v2  }
  0x26   :  { %1725 = vset.pattern.permute.xlu0 %v1810_v17  ;;  %v2841_v17 = vmov 0.0  }
  0x27   :  { %300 = vperm.xlu0 %1725, %v1892_v2  }
  0x29   :  { %1720 = vset.pattern.permute.xlu1 %v1811_v18  ;;  %v2043_v18 = vsel %vm51_vm4, 1.0, %v2841_v17 }
  0x2a   :  { %93 = vperm.xlu1 %1720, %v1892_v2   ;;  %2869 = vst [vmem:[#allocation3_spill] sm:$0xff] %v2043_v18 }
  0x2b   :  { %163 = vrot.lane.b32.xlu0 %v1914_v13, %s1812_s18 }
  0x2c   :  { %1727 = vset.pattern.permute.xlu0 %v1813_v20 }
  0x2e   :  { %101 = vrot.lane.b32.xlu1 %v1925_v19, %s1806_s13 }
  0x2f   :  { %1721 = vset.pattern.permute.xlu1 %v1814_v21  ;;  %260 = vperm.xlu0 %1727, %v1892_v2   ;;  %v2049_v21 = vsel %vm56_vm5, 1.0, %v2841_v17 }
  0x30   :  { %2871 = vst [vmem:[#allocation5_spill] sm:$0xff] %v2049_v21 }
  0x32   :  { %150 = vperm.xlu1 %1721, %v1892_v2  }
  0x33   :  { %1730 = vset.pattern.permute.xlu0 %v1815_v22  ;;  %v2052_v22 = vsel %vm60_vm6, 1.0, %v2841_v17 }
  0x34   :  { %360 = vperm.xlu0 %1730, %v1892_v2   ;;  %2872 = vst [vmem:[#allocation6_spill] sm:$0xff] %v2052_v22 }
  0x36   :  { %1723 = vset.pattern.permute.xlu1 %v1816_v23 }
  0x37   :  { %250 = vperm.xlu1 %1723, %v1892_v2  }
  0x38   :  { %223 = vrot.lane.b32.xlu0 %v1914_v13, %s1817_s0 }
  0x39   :  { %1732 = vset.pattern.permute.xlu0 %v1818_v24 }
  0x3b   :  { %1724 = vset.pattern.permute.xlu1 %v1819_v25 }
  0x3c   :  { %290 = vperm.xlu1 %1724, %v1892_v2   ;;  %320 = vperm.xlu0 %1732, %v1892_v2  }
  0x40   :  { %159 = vrot.lane.b32.xlu1 %v1907_v11, %s1812_s18  ;;  %1735 = vset.pattern.permute.xlu0 %v1820_v26 }
  0x41   :  { %1726 = vset.pattern.permute.xlu1 %v1821_v27  ;;  %420 = vperm.xlu0 %1735, %v1892_v2  }
  0x44   :  { %161 = vrot.lane.b32.xlu1 %v1925_v19, %s1812_s18 }
  0x45   :  { %283 = vrot.lane.b32.xlu0 %v1914_v13, %s1822_s19 }
  0x46   :  { %1737 = vset.pattern.permute.xlu0 %v1823_v28 }
  0x48   :  { %210 = vperm.xlu1 %1726, %v1892_v2  }
  0x49   :  { %380 = vperm.xlu0 %1737, %v1892_v2  }
  0x4c   :  { %1728 = vset.pattern.permute.xlu1 %v1824_v29 }
  0x4d   :  { %310 = vperm.xlu1 %1728, %v1892_v2   ;;  %1740 = vset.pattern.permute.xlu0 %v1825_v30 }
  0x4e   :  { %480 = vperm.xlu0 %1740, %v1892_v2  }
  0x51   :  { %1729 = vset.pattern.permute.xlu1 %v1826_v31 }
  0x52   :  { %350 = vperm.xlu1 %1729, %v1892_v2   ;;  %343 = vrot.lane.b32.xlu0 %v1914_v13, %s1827_s20 }
  0x53   :  { %1742 = vset.pattern.permute.xlu0 %v1828_v32 }
  0x56   :  { %219 = vrot.lane.b32.xlu1 %v1907_v11, %s1817_s0  ;;  %440 = vperm.xlu0 %1742, %v1892_v2  }
  0x57   :  { %1731 = vset.pattern.permute.xlu1 %v1829_v33 }
  0x5a   :  { %221 = vrot.lane.b32.xlu1 %v1925_v19, %s1817_s0  ;;  %1745 = vset.pattern.permute.xlu0 %v1830_v34 }
  0x5b   :  { %540 = vperm.xlu0 %1745, %v1892_v2  }
  0x5e   :  { %270 = vperm.xlu1 %1731, %v1892_v2  }
  0x5f   :  { %403 = vrot.lane.b32.xlu0 %v1914_v13, %s1831_s21 }
  0x60   :  { %1747 = vset.pattern.permute.xlu0 %v1832_v35  ;;  %v2078_v35 = vand.u32 127, %v14_v6 }
  0x62   :  { %1733 = vset.pattern.permute.xlu1 %v1833_v36  ;;  %v2081_v36 = vadd.s32 256, %v2078_v35  ;;  %vm105_vm7 = vcmp.lt.s32.totalorder %v2078_v35, 127  ;;  %vm165_vm8 = vcmp.lt.s32.totalorder %v2078_v35, 126  ;;  %vm225_vm9 = vcmp.lt.s32.totalorder %v2078_v35, 110 }
  0x63   :  { %370 = vperm.xlu1 %1733, %v1892_v2   ;;  %500 = vperm.xlu0 %1747, %v1892_v2   ;;  %vm285_vm12 = vcmp.lt.s32.totalorder %v2078_v35, 109  ;;  %vm345_vm4 = vcmp.lt.s32.totalorder %v2078_v35, 108  ;;  %vm405_vm5 = vcmp.lt.s32.totalorder %v2078_v35, 92  ;;  %vm465_vm6 = vcmp.lt.s32.totalorder %v2078_v35, 91 }
  0x67   :  { %1734 = vset.pattern.permute.xlu1 %v1834_v37  ;;  %461 = vrot.lane.b32.xlu0 %v1925_v19, %s1835_s22 }
  0x68   :  { %410 = vperm.xlu1 %1734, %v1892_v2   ;;  %1749 = vset.pattern.permute.xlu0 %v1836_v38 }
  0x6b   :  { %510 = vperm.xlu0 %1749, %v1892_v2  }
  0x6c   :  { %279 = vrot.lane.b32.xlu1 %v1907_v11, %s1822_s19 }
  0x6d   :  { %1736 = vset.pattern.permute.xlu1 %v1837_v39  ;;  %v2843_v39 = vcvt.s32.f32 %v2081_v36 }
  0x6f   :  { %1752 = vset.pattern.permute.xlu0 %v1838_v40 }
  0x70   :  { %281 = vrot.lane.b32.xlu1 %v1925_v19, %s1822_s19  ;;  %738 = vperm.xlu0 %1752, %v1892_v2  }
  0x74   :  { %330 = vperm.xlu1 %1736, %v1892_v2   ;;  %523 = vrot.lane.b32.xlu0 %v1914_v13, %s1839_s23 }
  0x75   :  { %1754 = vset.pattern.permute.xlu0 %v1840_v41 }
  0x78   :  { %1738 = vset.pattern.permute.xlu1 %v1841_v42  ;;  %897 = vperm.xlu0 %1754, %v1892_v2   ;;  %v2093_v42 = vadd.s32 128, %v2078_v35 }
  0x79   :  { %430 = vperm.xlu1 %1738, %v1892_v2  }
  0x7d   :  { %1739 = vset.pattern.permute.xlu1 %v1842_v43  ;;  %v2846_v43 = vcvt.s32.f32 %v2078_v35 }
  0x7e   :  { %470 = vperm.xlu1 %1739, %v1892_v2  }
  0x7f   :  { %v21_v8 = vadd.f32 0.5, %v2846_v43 }
  0x81   :  { %v1975_v44 = vpop.permute.xlu1 %110  ;;  %v2008_v59 = vpop.permute.xlu0 %65 }
  0x82   :  { %339 = vrot.lane.b32.xlu1 %v1907_v11, %s1827_s20 }
  0x83   :  { %1741 = vset.pattern.permute.xlu1 %v1843_v45  ;;  %v23_v45 = vadd.f32 0.5, %v2843_v39 }
  0x86   :  { %v1979_v46 = vpop.permute.xlu1 %120  ;;  %341 = vrot.lane.b32.xlu1 %v1925_v19, %s1827_s20  ;;  %v2014_v61 = vpop.permute.xlu0 %72 }
  0x87   :  { %v75_v6 = vmul.f32 %v2014_v61, %v1907_v11 }
  0x8a   :  { %390 = vperm.xlu1 %1741, %v1892_v2  }
  0x8b   :  { %v1984_v47 = vpop.permute.xlu1 %79  ;;  %v2022_v1 = vpop.permute.xlu0 %130 }
  0x8c   :  { %v82_v21 = vmul.f32 %v1984_v47, %v1907_v11 }
  0x8e   :  { %1743 = vset.pattern.permute.xlu1 %v1844_v48  ;;  %v2849_v48 = vcvt.s32.f32 %v2093_v42 }
  0x8f   :  { %490 = vperm.xlu1 %1743, %v1892_v2  }
  0x90   :  { %v1987_v49 = vpop.permute.xlu1 %170  ;;  %v2028_v5 = vpop.permute.xlu0 %86  ;;  %v22_v22 = vadd.f32 0.5, %v2849_v48 }
  0x91   :  { %v91_v18 = vmul.f32 %v2028_v5, %v1914_v13 }
  0x93   :  { %1744 = vset.pattern.permute.xlu1 %v1845_v50 }
  0x94   :  { %530 = vperm.xlu1 %1744, %v1892_v2  }
  0x95   :  { %v1990_v51 = vpop.permute.xlu1 %180  ;;  %v2035_v9 = vpop.permute.xlu0 %230 }
  0x98   :  { %399 = vrot.lane.b32.xlu1 %v1907_v11, %s1831_s21 }
  0x99   :  { %1746 = vset.pattern.permute.xlu1 %v1846_v52  ;;  %v100_v15 = vpop.permute.xlu0 %99 }
  0x9a   :  { %v1994_v53 = vpop.permute.xlu1 %140 }
  0x9c   :  { %401 = vrot.lane.b32.xlu1 %v1925_v19, %s1831_s21 }
  0x9d   :  { %v104_v23 = vpop.permute.xlu0 %103 }
  0x9e   :  { %v108_v50 = vsel %vm105_vm7, %v104_v23, %v100_v15 }
  0x9f   :  { %v1998_v54 = vpop.permute.xlu1 %190  ;;  %v115_v17 = vmul.f32 %v1975_v44, %v108_v50  ;;  %v125_v39 = vmul.f32 %v1979_v46, %v108_v50  ;;  %v135_v43 = vmul.f32 %v2022_v1, %v108_v50 }
  0xa0   :  { %450 = vperm.xlu1 %1746, %v1892_v2  }
  0xa1   :  { %v2056_v25 = vpop.permute.xlu0 %200 }
  0xa4   :  { %v2001_v55 = vpop.permute.xlu1 %240  ;;  %1748 = vset.pattern.permute.xlu1 %v1847_v56  ;;  %v68_v56 = vmul.f32 %v2008_v59, %v1907_v11 }
  0xa5   :  { %550 = vperm.xlu1 %1748, %v1892_v2  }
  0xa6   :  { %v2060_v27 = vpop.permute.xlu0 %300 }
  0xa7   :  { %2874 = vst [vmem:[#allocation8_spill] sm:$0xff] %v2060_v27 }
  0xa9   :  { %v2004_v57 = vpop.permute.xlu1 %93  ;;  %459 = vrot.lane.b32.xlu1 %v1907_v11, %s1835_s22 }
  0xaa   :  { %1750 = vset.pattern.permute.xlu1 %v1848_v58  ;;  %v2066_v29 = vpop.permute.xlu0 %163  ;;  %v69_v58 = vmul.f32 %v2008_v59, %v1925_v19 }
  0xad   :  { %v2010_v60 = vpop.permute.xlu1 %101  ;;  %463 = vrot.lane.b32.xlu1 %v1914_v13, %s1835_s22 }
  0xae   :  { %v2070_v31 = vpop.permute.xlu0 %260  ;;  %v106_v48 = vsel %vm105_vm7, %v2010_v60, %v104_v23 }
  0xb1   :  { %v2016_v62 = vpop.permute.xlu1 %150  ;;  %560 = vperm.xlu1 %1750, %v1892_v2  }
  0xb3   :  { %v2074_v33 = vpop.permute.xlu0 %360 }
  0xb4   :  { %2878 = vst [vmem:[#allocation12_spill] sm:$0xff] %v2074_v33  ;;  %v2147_v33 = vmul.f32 0.055555556, %v21_v8 }
  0xb5   :  { %1751 = vset.pattern.permute.xlu1 %v1849_v63 }
  0xb6   :  { %v2019_v0 = vpop.permute.xlu1 %250  ;;  %580 = vperm.xlu1 %1751, %v1892_v2  }
  0xb7   :  { %v2083_v37 = vpop.permute.xlu0 %223 }
  0xba   :  { %519 = vrot.lane.b32.xlu1 %v1907_v11, %s1839_s23 }
  0xbb   :  { %v2026_v3 = vpop.permute.xlu1 %290  ;;  %1753 = vset.pattern.permute.xlu1 %v1850_v4  ;;  %v2088_v40 = vpop.permute.xlu0 %320  ;;  %v70_v4 = vmul.f32 %v2008_v59, %v1914_v13  ;;  %v76_v59 = vmul.f32 %v2014_v61, %v1925_v19 }
  0xbc   :  { %2868 = vst [vmem:[#allocation2_spill] sm:$0xff] %v2026_v3  ;;  %2880 = vst [vmem:[#allocation14_spill] sm:$0xff] %v2088_v40 }
  0xbd   :  { %v118_v23 = vadd.f32 %v115_v17, %v70_v4  ;;  %v124_v17 = vmul.f32 %v1979_v46, %v106_v48 }
  0xbe   :  { %521 = vrot.lane.b32.xlu1 %v1925_v19, %s1839_s23 }
  0xbf   :  { %v2032_v7 = vpop.permute.xlu1 %159 }
  0xc0   :  { %v2109_v63 = vpop.permute.xlu0 %420 }
  0xc1   :  { %2883 = vst [vmem:[#allocation17_spill] sm:$0xff] %v2109_v63 }
  0xc2   :  { %570 = vperm.xlu1 %1753, %v1892_v2  }
  0xc3   :  { %v2037_v10 = vpop.permute.xlu1 %161 }
  0xc6   :  { %1755 = vset.pattern.permute.xlu1 %v1851_v12  ;;  %v2117_v12 = vmul.f32 0.055555556, %v23_v45  ;;  %v83_v45 = vmul.f32 %v1984_v47, %v1925_v19 }
  0xc7   :  { %1056 = vperm.xlu1 %1755, %v1892_v2   ;;  %v2040_v14 = vpop.permute.xlu1 %210 }
  0xcb   :  { %1756 = vset.pattern.permute.xlu1 %v1852_v16  ;;  %v77_v16 = vmul.f32 %v2014_v61, %v1914_v13  ;;  %v107_v61 = vsel %vm105_vm7, %v100_v15, %v2010_v60  ;;  %v2154_v60 = vmul.f32 0.055555556, %v22_v22  ;;  %v98_v22 = vmul.f32 %v2004_v57, %v1914_v13 }
  0xcc   :  { %1215 = vperm.xlu1 %1756, %v1892_v2   ;;  %v2046_v20 = vpop.permute.xlu1 %310  ;;  %v123_v27 = vmul.f32 %v1979_v46, %v107_v61  ;;  %vm525_vm7 = vcmp.lt.s32.totalorder %v2078_v35, 90 }
  0xcd   :  { %2870 = vst [vmem:[#allocation4_spill] sm:$0xff] %v2046_v20  ;;  %v128_v40 = vadd.f32 %v125_v39, %v77_v16  ;;  %v2152_v20 = vpop.permute.xlu0 %283  ;;  %v127_v16 = vadd.f32 %v124_v17, %v76_v59 }
  0xce   :  { %2885 = vst [vmem:[#allocation19_spill] sm:$0xff] %v2152_v20  ;;  %v126_v4 = vadd.f32 %v123_v27, %v75_v6 }
  0xd1   :  { %v2054_v24 = vpop.permute.xlu1 %350 }
  0xd2   :  { %2873 = vst [vmem:[#allocation7_spill] sm:$0xff] %v2054_v24  ;;  %v29_v24 = vfloor.f32 %v2117_v12  ;;  %v96_v12 = vmul.f32 %v2004_v57, %v1907_v11 }
  0xd4   :  { %vm2207_vm10 = vcmp.lt.f32.partialorder %v29_v24, 16.0 }
  0xd5   :  { %v2058_v26 = vpop.permute.xlu1 %219 }
  0xd9   :  { %v2062_v28 = vpop.permute.xlu1 %221 }
  0xdd   :  { %v2064_v2 = vpop.permute.xlu1 %270 }
  0xde   :  { %2875 = vst [vmem:[#allocation9_spill] sm:$0xff] %v2064_v2 }
  0xe2   :  { %v2068_v30 = vpop.permute.xlu1 %370 }
  0xe3   :  { %2876 = vst [vmem:[#allocation10_spill] sm:$0xff] %v2068_v30  ;;  %v89_v30 = vmul.f32 %v2028_v5, %v1907_v11  ;;  %v168_v11 = vsel %vm165_vm8, %v2066_v29, %v2032_v7 }
  0xe4   :  { %v175_v20 = vmul.f32 %v1987_v49, %v168_v11  ;;  %v185_v27 = vmul.f32 %v1990_v51, %v168_v11 }
  0xe7   :  { %v2072_v32 = vpop.permute.xlu1 %410 }
  0xe8   :  { %2877 = vst [vmem:[#allocation11_spill] sm:$0xff] %v2072_v32  ;;  %v84_v32 = vmul.f32 %v1984_v47, %v1914_v13  ;;  %v114_v47 = vmul.f32 %v1975_v44, %v106_v48  ;;  %v28_v13 = vfloor.f32 %v2154_v60  ;;  %v2888_v60 = vcvt.s32.f32 %v2081_v36 }
  0xe9   :  { %v166_v36 = vsel %vm165_vm8, %v2037_v10, %v2066_v29 }
  0xea   :  { %v138_v15 = vadd.f32 %v135_v43, %v84_v32  ;;  %v133_v32 = vmul.f32 %v2022_v1, %v107_v61  ;;  %v32_v43 = vmul.f32 18.0, %v29_v24  ;;  %vm2235_vm15 = vcmp.lt.f32.partialorder %v28_v13, 16.0 }
  0xeb   :  { %v2076_v34 = vpop.permute.xlu1 %279 }
  0xec   :  { %v136_v2 = vadd.f32 %v133_v32, %v82_v21  ;;  %v205_v21 = vmul.f32 %v2056_v25, %v168_v11 }
  0xef   :  { %v2085_v38 = vpop.permute.xlu1 %281 }
  0xf0   :  { %2879 = vst [vmem:[#allocation13_spill] sm:$0xff] %v2085_v38  ;;  %v155_v38 = vmul.f32 %v2016_v62, %v108_v50 }
  0xf3   :  { %v2090_v41 = vpop.permute.xlu1 %330 }
  0xf4   :  { %2881 = vst [vmem:[#allocation15_spill] sm:$0xff] %v2090_v41  ;;  %v90_v41 = vmul.f32 %v2028_v5, %v1925_v19  ;;  %v97_v5 = vmul.f32 %v2004_v57, %v1925_v19  ;;  %v2177_v19 = vpop.permute.xlu0 %380  ;;  %v117_v57 = vadd.f32 %v114_v47, %v69_v58  ;;  %v31_v58 = vmul.f32 18.0, %v28_v13 }
  0xf5   :  { %2887 = vst [vmem:[#allocation21_spill] sm:$0xff] %v2177_v19 }
  0xf8   :  { %v2102_v52 = vpop.permute.xlu1 %430  ;;  %v2200_v47 = vpop.permute.xlu0 %480 }
  0xf9   :  { %2882 = vst [vmem:[#allocation16_spill] sm:$0xff] %v2102_v52  ;;  %v145_v52 = vmul.f32 %v1994_v53, %v108_v50 }
  0xfb   :  { %v148_v8 = vadd.f32 %v145_v52, %v91_v18  ;;  %v134_v18 = vmul.f32 %v2022_v1, %v106_v48  ;;  %v143_v52 = vmul.f32 %v1994_v53, %v107_v61  ;;  %v153_v1 = vmul.f32 %v2016_v62, %v107_v61 }
  0xfd   :  { %v2141_v63 = vpop.permute.xlu1 %470  ;;  %v146_v50 = vadd.f32 %v143_v52, %v89_v30  ;;  %v156_v6 = vadd.f32 %v153_v1, %v96_v12  ;;  %v188_v12 = vadd.f32 %v185_v27, %v128_v40  ;;  %v204_v40 = vmul.f32 %v2056_v25, %v166_v36 }
  0xfe   :  { %2884 = vst [vmem:[#allocation18_spill] sm:$0xff] %v2141_v63  ;;  %v113_v63 = vmul.f32 %v1975_v44, %v107_v61  ;;  %v27_v44 = vfloor.f32 %v2147_v33  ;;  %v144_v33 = vmul.f32 %v1994_v53, %v106_v48  ;;  %v195_v53 = vmul.f32 %v1998_v54, %v168_v11 }
  0xff   :  { %v158_v61 = vadd.f32 %v155_v38, %v98_v22  ;;  %v178_v38 = vadd.f32 %v175_v20, %v118_v23  ;;  %v174_v22 = vmul.f32 %v1987_v49, %v166_v36 }
 0x100   :  { %v116_v46 = vadd.f32 %v113_v63, %v68_v56  ;;  %v30_v19 = vmul.f32 18.0, %v27_v44  ;;  %v35_v56 = vsub.f32 %v2888_v60, %v32_v43  ;;  %v147_v63 = vadd.f32 %v144_v33, %v90_v41 }
 0x101   :  { %v2164_v39 = vpop.permute.xlu1 %339  ;;  %v184_v43 = vmul.f32 %v1990_v51, %v166_v36  ;;  %vm2227_vm13 = vcmp.lt.f32.partialorder %v27_v44, 16.0  ;;  %v177_v52 = vadd.f32 %v174_v22, %v117_v57  ;;  %v215_v44 = vmul.f32 %v2040_v14, %v168_v11 }
 0x102   :  { %2886 = vst [vmem:[#allocation20_spill] sm:$0xff] %v2164_v39  ;;  %v154_v39 = vmul.f32 %v2016_v62, %v106_v48  ;;  %v167_v48 = vsel %vm165_vm8, %v2032_v7, %v2037_v10  ;;  %v137_v62 = vadd.f32 %v134_v18, %v83_v45  ;;  %v2889_v45 = vcvt.s32.f32 %v2078_v35 }
 0x103   :  { %v173_v7 = vmul.f32 %v1987_v49, %v167_v48  ;;  %vm41_vm11 = vcmp.lt.f32.partialorder %v35_v56, 16.0  ;;  %v2892_v10 = vcvt.s32.f32 %v2093_v42  ;;  %v183_v32 = vmul.f32 %v1990_v51, %v167_v48  ;;  %v2907_v49 = vld [vmem:[#allocation4_spill] sm:$0xff] }
 0x104   :  { %v157_v59 = vadd.f32 %v154_v39, %v97_v5  ;;  %v33_v30 = vsub.f32 %v2889_v45, %v30_v19  ;;  %v198_v5 = vadd.f32 %v195_v53, %v138_v15  ;;  %v208_v39 = vadd.f32 %v205_v21, %v148_v8  ;;  %v2233_v8 = vpop.permute.xlu0 %343  ;;  %vm2243_vm1 = vmand %vm2207_vm10, %vm41_vm11  ;;  %v2900_v45 = vld [vmem:[#allocation19_spill] sm:$0xff] }
 0x105   :  { %v2184_v3 = vpop.permute.xlu1 %341  ;;  %v34_v29 = vsub.f32 %v2892_v10, %v31_v58  ;;  %v193_v24 = vmul.f32 %v1998_v54, %v167_v48  ;;  %v194_v18 = vmul.f32 %v1998_v54, %v166_v36  ;;  %v203_v20 = vmul.f32 %v2056_v25, %v167_v48 }
 0x106   :  { %v176_v23 = vadd.f32 %v173_v7, %v116_v46  ;;  %v228_v42 = vsel %vm225_vm9, %v2083_v37, %v2058_v26  ;;  %vm39_vm14 = vcmp.lt.f32.partialorder %v33_v30, 16.0  ;;  %v213_v51 = vmul.f32 %v2040_v14, %v167_v48 }
 0x107   :  { %v214_v54 = vmul.f32 %v2040_v14, %v166_v36  ;;  %vm40_vm0 = vcmp.lt.f32.partialorder %v34_v29, 16.0  ;;  %v186_v19 = vadd.f32 %v183_v32, %v126_v4  ;;  %v187_v46 = vadd.f32 %v184_v43, %v127_v16  ;;  %vm42_vm2 = vmand %vm2227_vm13, %vm39_vm14 }
 0x108   :  { %v235_v1 = vmul.f32 %v2035_v9, %v228_v42  ;;  %v245_v13 = vmul.f32 %v2001_v55, %v228_v42  ;;  %v255_v60 = vmul.f32 %v2019_v0, %v228_v42  ;;  %v227_v57 = vsel %vm225_vm9, %v2058_v26, %v2062_v28  ;;  %vm43_vm3 = vmand %vm2235_vm15, %vm40_vm0  ;;  %v2265_v48 = vpop.permute.xlu0 %440 }
 0x109   :  { %v2202_v17 = vpop.permute.xlu1 %390  ;;  %v196_v14 = vadd.f32 %v193_v24, %v136_v2  ;;  %v197_v11 = vadd.f32 %v194_v18, %v137_v62  ;;  %v206_v4 = vadd.f32 %v203_v20, %v146_v50  ;;  %v265_v16 = vmul.f32 %v2070_v31, %v228_v42  ;;  %v2903_v24 = vld [vmem:[#allocation2_spill] sm:$0xff]  ;;  %v2904_v18 = vld [vmem:[#allocation13_spill] sm:$0xff] }
 0x10a   :  { %v207_v56 = vadd.f32 %v204_v40, %v147_v63  ;;  %v216_v27 = vadd.f32 %v213_v51, %v156_v6  ;;  %v217_v53 = vadd.f32 %v214_v54, %v157_v59  ;;  %v226_v26 = vsel %vm225_vm9, %v2062_v28, %v2083_v37  ;;  %v2908_v54 = vld [vmem:[#allocation14_spill] sm:$0xff] }
 0x10b   :  { %v218_v2 = vadd.f32 %v215_v44, %v158_v61  ;;  %v233_v62 = vmul.f32 %v2035_v9, %v227_v57  ;;  %v2899_v50 = vmov 0.0   ;;  %v238_v6 = vadd.f32 %v235_v1, %v178_v38 }
 0x10c   :  { %v2272_v21 = vsel %vm42_vm2, 1.0, %v2899_v50  ;;  %v2277_v63 = vsel %vm2243_vm1, 1.0, %v2899_v50  ;;  %v248_v59 = vadd.f32 %v245_v13, %v188_v12  ;;  %v258_v28 = vadd.f32 %v255_v60, %v198_v5  ;;  %v2314_v20 = vpop.permute.xlu0 %540 }
 0x10d   :  { %v2280_v37 = vsel %vm43_vm3, 1.0, %v2899_v50  ;;  %v268_v36 = vadd.f32 %v265_v16, %v208_v39  ;;  %v234_v61 = vmul.f32 %v2035_v9, %v226_v26  ;;  %v243_v7 = vmul.f32 %v2001_v55, %v227_v57  ;;  %v2902_v39 = vld [vmem:[#allocation9_spill] sm:$0xff] }
 0x10e   :  { %v2225_v15 = vpop.permute.xlu1 %490  ;;  %v2288_v30 = vsel %vm285_vm12, %v2900_v45, %v2076_v34  ;;  %v244_v41 = vmul.f32 %v2001_v55, %v226_v26  ;;  %v253_v38 = vmul.f32 %v2019_v0, %v227_v57  ;;  %v254_v12 = vmul.f32 %v2019_v0, %v226_v26 }
 0x10f   :  { %2901 = vst [vmem:[#allocation19_spill] sm:$0xff] %v2288_v30  ;;  %v263_v5 = vmul.f32 %v2070_v31, %v227_v57  ;;  %v236_v29 = vadd.f32 %v233_v62, %v176_v23  ;;  %v264_v9 = vmul.f32 %v2070_v31, %v226_v26  ;;  %v273_v22 = vmul.f32 %v2902_v39, %v227_v57  ;;  %v2906_v23 = vld [vmem:[#allocation8_spill] sm:$0xff] }
 0x110   :  { %v274_v32 = vmul.f32 %v2902_v39, %v226_v26  ;;  %v275_v43 = vmul.f32 %v2902_v39, %v228_v42  ;;  %v295_v55 = vmul.f32 %v2903_v24, %v2288_v30  ;;  %v2306_v0 = vsel %vm285_vm12, %v2904_v18, %v2900_v45  ;;  %v2909_v45 = vld [vmem:[#allocation20_spill] sm:$0xff]  ;;  %v2911_v39 = vld [vmem:[#allocation7_spill] sm:$0xff] }
 0x111   :  { %2905 = vst [vmem:[#allocation9_spill] sm:$0xff] %v2306_v0  ;;  %v2312_v31 = vsel %vm285_vm12, %v2076_v34, %v2904_v18  ;;  %v237_v40 = vadd.f32 %v234_v61, %v177_v52  ;;  %v305_v42 = vmul.f32 %v2906_v23, %v2288_v30  ;;  %v315_v51 = vmul.f32 %v2907_v49, %v2288_v30  ;;  %v2914_v18 = vld [vmem:[#allocation21_spill] sm:$0xff] }
 0x112   :  { %v325_v25 = vmul.f32 %v2908_v54, %v2288_v30  ;;  %v246_v44 = vadd.f32 %v243_v7, %v186_v19  ;;  %v247_v33 = vadd.f32 %v244_v41, %v187_v46  ;;  %v256_v1 = vadd.f32 %v253_v38, %v196_v14  ;;  %v2910_v41 = vld [vmem:[#allocation15_spill] sm:$0xff] }
 0x113   :  { %v2267_v58 = vpop.permute.xlu1 %530  ;;  %v257_v13 = vadd.f32 %v254_v12, %v197_v11  ;;  %v266_v34 = vadd.f32 %v263_v5, %v206_v4  ;;  %v267_v57 = vadd.f32 %v264_v9, %v207_v56  ;;  %v293_v52 = vmul.f32 %v2903_v24, %v2312_v31 }
 0x114   :  { %v294_v16 = vmul.f32 %v2903_v24, %v2306_v0  ;;  %v276_v26 = vadd.f32 %v273_v22, %v216_v27  ;;  %v277_v62 = vadd.f32 %v274_v32, %v217_v53  ;;  %v278_v50 = vadd.f32 %v275_v43, %v218_v2  ;;  %v404_v53 = vpop.permute.xlu0 %403  ;;  %v2912_v32 = vld [vmem:[#allocation12_spill] sm:$0xff] }
 0x115   :  { %v298_v61 = vadd.f32 %v295_v55, %v238_v6  ;;  %v303_v19 = vmul.f32 %v2906_v23, %v2312_v31  ;;  %v308_v46 = vadd.f32 %v305_v42, %v248_v59  ;;  %v318_v14 = vadd.f32 %v315_v51, %v258_v28 }
 0x116   :  { %v328_v11 = vadd.f32 %v325_v25, %v268_v36  ;;  %v304_v4 = vmul.f32 %v2906_v23, %v2306_v0  ;;  %v313_v56 = vmul.f32 %v2907_v49, %v2312_v31  ;;  %v314_v7 = vmul.f32 %v2907_v49, %v2306_v0 }
 0x117   :  { %v2294_v10 = vpop.permute.xlu1 %399  ;;  %v348_v27 = vsel %vm345_vm4, %v2233_v8, %v2909_v45  ;;  %v323_v6 = vmul.f32 %v2908_v54, %v2312_v31  ;;  %v324_v59 = vmul.f32 %v2908_v54, %v2306_v0  ;;  %v296_v28 = vadd.f32 %v293_v52, %v236_v29  ;;  %v2913_v29 = vld [vmem:[#allocation10_spill] sm:$0xff] }
 0x118   :  { %v297_v36 = vadd.f32 %v294_v16, %v237_v40  ;;  %v333_v38 = vmul.f32 %v2910_v41, %v2312_v31  ;;  %v334_v12 = vmul.f32 %v2910_v41, %v2306_v0  ;;  %v335_v5 = vmul.f32 %v2910_v41, %v2288_v30  ;;  %v2365_v49 = vpop.permute.xlu0 %500 }
 0x119   :  { %v347_v9 = vsel %vm345_vm4, %v2909_v45, %v2184_v3  ;;  %v355_v22 = vmul.f32 %v2911_v39, %v348_v27  ;;  %v365_v43 = vmul.f32 %v2912_v32, %v348_v27  ;;  %v375_v24 = vmul.f32 %v2913_v29, %v348_v27 }
 0x11a   :  { %v346_v55 = vsel %vm345_vm4, %v2184_v3, %v2233_v8  ;;  %v385_v40 = vmul.f32 %v2914_v18, %v348_v27  ;;  %v306_v23 = vadd.f32 %v303_v19, %v246_v44  ;;  %v307_v42 = vadd.f32 %v304_v4, %v247_v33 }
 0x11b   :  { %v2322_v60 = vpop.permute.xlu1 %401  ;;  %v317_v51 = vadd.f32 %v314_v7, %v257_v13  ;;  %v353_v54 = vmul.f32 %v2911_v39, %v347_v9  ;;  %v316_v52 = vadd.f32 %v313_v56, %v256_v1  ;;  %v326_v16 = vadd.f32 %v323_v6, %v266_v34 }
 0x11c   :  { %v327_v45 = vadd.f32 %v324_v59, %v267_v57  ;;  %v336_v41 = vadd.f32 %v333_v38, %v276_v26  ;;  %v337_v30 = vadd.f32 %v334_v12, %v277_v62  ;;  %v354_v3 = vmul.f32 %v2911_v39, %v346_v55  ;;  %v462_v56 = vpop.permute.xlu0 %461  ;;  %v2915_v59 = vld [vmem:[#allocation11_spill] sm:$0xff] }
 0x11d   :  { %v363_v8 = vmul.f32 %v2912_v32, %v347_v9  ;;  %v338_v44 = vadd.f32 %v335_v5, %v278_v50  ;;  %v358_v33 = vadd.f32 %v355_v22, %v298_v61  ;;  %v368_v19 = vadd.f32 %v365_v43, %v308_v46  ;;  %v2916_v5 = vld [vmem:[#allocation17_spill] sm:$0xff] }
 0x11e   :  { %v378_v4 = vadd.f32 %v375_v24, %v318_v14  ;;  %v388_v13 = vadd.f32 %v385_v40, %v328_v11  ;;  %v364_v7 = vmul.f32 %v2912_v32, %v346_v55  ;;  %v373_v0 = vmul.f32 %v2913_v29, %v347_v9 }
 0x11f   :  { %v2341_v2 = vpop.permute.xlu1 %450  ;;  %v408_v1 = vsel %vm405_vm5, %v404_v53, %v2294_v10  ;;  %v356_v34 = vadd.f32 %v353_v54, %v296_v28  ;;  %v374_v57 = vmul.f32 %v2913_v29, %v346_v55  ;;  %v383_v26 = vmul.f32 %v2914_v18, %v347_v9 }
 0x120   :  { %v384_v62 = vmul.f32 %v2914_v18, %v346_v55  ;;  %v357_v61 = vadd.f32 %v354_v3, %v297_v36  ;;  %v366_v46 = vadd.f32 %v363_v8, %v306_v23  ;;  %v393_v14 = vmul.f32 %v2202_v17, %v347_v9  ;;  %v2917_v9 = vld [vmem:[#allocation16_spill] sm:$0xff]  ;;  %v511_v23 = vpop.permute.xlu0 %510 }
 0x121   :  { %v394_v11 = vmul.f32 %v2202_v17, %v346_v55  ;;  %v395_v6 = vmul.f32 %v2202_v17, %v348_v27  ;;  %v415_v38 = vmul.f32 %v2915_v59, %v408_v1  ;;  %v406_v28 = vsel %vm405_vm5, %v2322_v60, %v404_v53 }
 0x122   :  { %v407_v12 = vsel %vm405_vm5, %v2294_v10, %v2322_v60  ;;  %v367_v36 = vadd.f32 %v364_v7, %v307_v42  ;;  %v425_v39 = vmul.f32 %v2916_v5, %v408_v1  ;;  %v435_v22 = vmul.f32 %v2917_v9, %v408_v1 }
 0x123   :  { %v445_v32 = vmul.f32 %v2265_v48, %v408_v1  ;;  %v377_v17 = vadd.f32 %v374_v57, %v317_v51  ;;  %v376_v27 = vadd.f32 %v373_v0, %v316_v52  ;;  %v386_v29 = vadd.f32 %v383_v26, %v326_v16 }
 0x124   :  { %v2368_v25 = vpop.permute.xlu1 %550  ;;  %v387_v24 = vadd.f32 %v384_v62, %v327_v45  ;;  %v413_v55 = vmul.f32 %v2915_v59, %v407_v12  ;;  %v414_v53 = vmul.f32 %v2915_v59, %v406_v28  ;;  %v396_v18 = vadd.f32 %v393_v14, %v336_v41  ;;  %v2410_v57 = vpop.permute.xlu0 %738  ;;  %v2918_v62 = vld [vmem:[#allocation18_spill] sm:$0xff] }
 0x125   :  { %v397_v40 = vadd.f32 %v394_v11, %v337_v30  ;;  %v418_v10 = vadd.f32 %v415_v38, %v358_v33  ;;  %v423_v60 = vmul.f32 %v2916_v5, %v407_v12  ;;  %v424_v42 = vmul.f32 %v2916_v5, %v406_v28 }
 0x126   :  { %v398_v54 = vadd.f32 %v395_v6, %v338_v44  ;;  %v428_v3 = vadd.f32 %v425_v39, %v368_v19  ;;  %v438_v0 = vadd.f32 %v435_v22, %v378_v4  ;;  %v448_v52 = vadd.f32 %v445_v32, %v388_v13 }
 0x127   :  { %v433_v16 = vmul.f32 %v2917_v9, %v407_v12  ;;  %v434_v45 = vmul.f32 %v2917_v9, %v406_v28  ;;  %v443_v30 = vmul.f32 %v2265_v48, %v407_v12  ;;  %v444_v41 = vmul.f32 %v2265_v48, %v406_v28 }
 0x128   :  { %v460_v50 = vpop.permute.xlu1 %459  ;;  %v416_v33 = vadd.f32 %v413_v55, %v356_v34  ;;  %v417_v44 = vadd.f32 %v414_v53, %v357_v61  ;;  %v453_v19 = vmul.f32 %v2341_v2, %v407_v12  ;;  %v454_v7 = vmul.f32 %v2341_v2, %v406_v28 }
 0x129   :  { %v467_v51 = vsel %vm465_vm6, %v460_v50, %v462_v56  ;;  %v426_v4 = vadd.f32 %v423_v60, %v366_v46  ;;  %v427_v13 = vadd.f32 %v424_v42, %v367_v36  ;;  %v455_v26 = vmul.f32 %v2341_v2, %v408_v1 }
 0x12a   :  { %v473_v14 = vmul.f32 %v2918_v62, %v467_v51  ;;  %v483_v11 = vmul.f32 %v2200_v47, %v467_v51  ;;  %v493_v48 = vmul.f32 %v2225_v15, %v467_v51  ;;  %v503_v6 = vmul.f32 %v2365_v49, %v467_v51 }
 0x12b   :  { %v437_v59 = vadd.f32 %v434_v45, %v377_v17  ;;  %v436_v38 = vadd.f32 %v433_v16, %v376_v27  ;;  %v446_v46 = vadd.f32 %v443_v30, %v386_v29  ;;  %v456_v28 = vadd.f32 %v453_v19, %v396_v18 }
 0x12c   :  { %v464_v43 = vpop.permute.xlu1 %463  ;;  %v457_v12 = vadd.f32 %v454_v7, %v397_v40  ;;  %v513_v2 = vmul.f32 %v511_v23, %v467_v51  ;;  %v447_v36 = vadd.f32 %v444_v41, %v387_v24  ;;  %v458_v5 = vadd.f32 %v455_v26, %v398_v54 }
 0x12d   :  { %v466_v34 = vsel %vm465_vm6, %v462_v56, %v464_v43  ;;  %v468_v61 = vsel %vm465_vm6, %v464_v43, %v460_v50  ;;  %v476_v22 = vadd.f32 %v473_v14, %v416_v33  ;;  %v486_v50 = vadd.f32 %v483_v11, %v426_v4  ;;  %v524_v43 = vpop.permute.xlu0 %523 }
 0x12e   :  { %v474_v39 = vmul.f32 %v2918_v62, %v466_v34  ;;  %v475_v9 = vmul.f32 %v2918_v62, %v468_v61  ;;  %v484_v56 = vmul.f32 %v2200_v47, %v466_v34  ;;  %v485_v32 = vmul.f32 %v2200_v47, %v468_v61 }
 0x12f   :  { %v496_v17 = vadd.f32 %v493_v48, %v436_v38  ;;  %v494_v27 = vmul.f32 %v2225_v15, %v466_v34  ;;  %v495_v29 = vmul.f32 %v2225_v15, %v468_v61  ;;  %v504_v55 = vmul.f32 %v2365_v49, %v466_v34 }
 0x130   :  { %v2406_v8 = vpop.permute.xlu1 %560  ;;  %v506_v24 = vadd.f32 %v503_v6, %v446_v46  ;;  %v516_v53 = vadd.f32 %v513_v2, %v456_v28  ;;  %v505_v18 = vmul.f32 %v2365_v49, %v468_v61  ;;  %v514_v40 = vmul.f32 %v511_v23, %v466_v34 }
 0x131   :  { %v515_v60 = vmul.f32 %v511_v23, %v468_v61  ;;  %v477_v54 = vadd.f32 %v474_v39, %v417_v44  ;;  %v478_v51 = vadd.f32 %v475_v9, %v418_v10  ;;  %v487_v16 = vadd.f32 %v484_v56, %v427_v13  ;;  %v898_v6 = vpop.permute.xlu0 %897 }
 0x132   :  { %v488_v45 = vadd.f32 %v485_v32, %v428_v3  ;;  %v497_v33 = vadd.f32 %v494_v27, %v437_v59  ;;  %v498_v19 = vadd.f32 %v495_v29, %v438_v0  ;;  %v507_v7 = vadd.f32 %v504_v55, %v447_v36 }
 0x133   :  { %v508_v44 = vadd.f32 %v505_v18, %v448_v52  ;;  %v517_v10 = vadd.f32 %v514_v40, %v457_v12  ;;  %v518_v13 = vadd.f32 %v515_v60, %v458_v5  ;;  %vm589_vm8 = vcmask 1045504  }
 0x134   :  { %vm608_vm9 = vcmask 5120  }
 0x135   :  { %v2421_v1 = vpop.permute.xlu1 %580 }
 0x139   :  { %v520_v42 = vpop.permute.xlu1 %519 }
 0x13a   :  { %v528_v47 = vsel %vm525_vm7, %v524_v43, %v520_v42 }
 0x13b   :  { %v535_v30 = vmul.f32 %v2267_v58, %v528_v47  ;;  %v545_v15 = vmul.f32 %v2314_v20, %v528_v47  ;;  %v555_v41 = vmul.f32 %v2368_v25, %v528_v47  ;;  %v565_v49 = vmul.f32 %v2406_v8, %v528_v47 }
 0x13d   :  { %v538_v23 = vadd.f32 %v535_v30, %v478_v51  ;;  %v522_v4 = vpop.permute.xlu1 %521  ;;  %v548_v26 = vadd.f32 %v545_v15, %v488_v45  ;;  %v558_v14 = vadd.f32 %v555_v41, %v498_v19  ;;  %v568_v38 = vadd.f32 %v565_v49, %v508_v44 }
 0x13e   :  { %v526_v3 = vsel %vm525_vm7, %v522_v4, %v524_v43  ;;  %v527_v62 = vsel %vm525_vm7, %v520_v42, %v522_v4 }
 0x13f   :  { %v533_v11 = vmul.f32 %v2267_v58, %v527_v62  ;;  %v534_v0 = vmul.f32 %v2267_v58, %v526_v3  ;;  %v543_v48 = vmul.f32 %v2314_v20, %v527_v62  ;;  %v544_v34 = vmul.f32 %v2314_v20, %v526_v3 }
 0x140   :  { %v553_v52 = vmul.f32 %v2368_v25, %v527_v62  ;;  %v554_v61 = vmul.f32 %v2368_v25, %v526_v3  ;;  %v563_v59 = vmul.f32 %v2406_v8, %v527_v62  ;;  %v2448_v9 = vadd.f32 %v898_v6, %v558_v14 }
 0x141   :  { %v536_v35 = vadd.f32 %v533_v11, %v476_v22  ;;  %v537_v46 = vadd.f32 %v534_v0, %v477_v54  ;;  %v546_v28 = vadd.f32 %v543_v48, %v486_v50  ;;  %v547_v12 = vadd.f32 %v544_v34, %v487_v16  ;;  %v571_v2 = vpop.permute.xlu1 %570 }
 0x142   :  { %v557_v36 = vadd.f32 %v554_v61, %v497_v33  ;;  %v556_v58 = vadd.f32 %v553_v52, %v496_v17  ;;  %v573_v5 = vmul.f32 %v571_v2, %v527_v62  ;;  %v574_v39 = vmul.f32 %v571_v2, %v526_v3 }
 0x143   :  { %v575_v20 = vmul.f32 %v571_v2, %v528_v47  ;;  %v564_v56 = vmul.f32 %v2406_v8, %v526_v3  ;;  %v2452_v25 = vadd.f32 %v2421_v1, %v536_v35  ;;  %v566_v22 = vadd.f32 %v563_v59, %v506_v24 }
 0x144   :  { %v2454_v32 = vadd.f32 %v898_v6, %v556_v58  ;;  %v2456_v43 = vadd.f32 %v898_v6, %v557_v36  ;;  %v576_v50 = vadd.f32 %v573_v5, %v516_v53  ;;  %v577_v29 = vadd.f32 %v574_v39, %v517_v10 }
 0x145   :  { %v567_v27 = vadd.f32 %v564_v56, %v507_v7  ;;  %v2459_v17 = vadd.f32 %v2421_v1, %v537_v46  ;;  %v2462_v55 = vadd.f32 %v2421_v1, %v538_v23  ;;  %v586_v8 = vmul.f32 %v2452_v25, %v2272_v21 }
 0x146   :  { %v1057_v18 = vpop.permute.xlu1 %1056  ;;  %v2467_v40 = vadd.f32 %v2410_v57, %v546_v28  ;;  %v2470_v60 = vadd.f32 %v2410_v57, %v547_v12  ;;  %v2473_v24 = vadd.f32 %v2410_v57, %v548_v26  ;;  %v578_v54 = vadd.f32 %v575_v20, %v518_v13 }
 0x147   :  { %v2475_v53 = vadd.f32 %v1057_v18, %v566_v22  ;;  %v2477_v42 = vadd.f32 %v1057_v18, %v567_v27  ;;  %v587_v1 = vmul.f32 %v2459_v17, %v2280_v37  ;;  %v588_v51 = vmul.f32 %v2462_v55, %v2277_v63 }
 0x148   :  { %v590_v16 = vsel %vm589_vm8, %v586_v8, 0.0  ;;  %v597_v47 = vmul.f32 %v586_v8, %v2452_v25  ;;  %v744_v45 = vmul.f32 %v2467_v40, %v2272_v21  ;;  %v745_v15 = vmul.f32 %v2470_v60, %v2280_v37 }
 0x149   :  { %v591_v57 = vsel %vm589_vm8, %v587_v1, 0.0  ;;  %v598_v30 = vmul.f32 %v587_v1, %v2459_v17  ;;  %v746_v41 = vmul.f32 %v2473_v24, %v2277_v63  ;;  %v2493_v33 = vadd.f32 %v1057_v18, %v568_v38 }
 0x14a   :  { %v592_v19 = vadd.f32 %v591_v57, %v590_v16  ;;  %v599_v7 = vmul.f32 %v588_v51, %v2462_v55  ;;  %v600_v49 = vsel %vm589_vm8, %v597_v47, 0.0  ;;  %v593_v4 = vsel %vm589_vm8, %v588_v51, 0.0 }
 0x14b   :  { %v1216_v23 = vpop.permute.xlu1 %1215  ;;  %v601_v44 = vsel %vm589_vm8, %v598_v30, 0.0  ;;  %v747_v10 = vsel %vm589_vm8, %v744_v45, 0.0  ;;  %v748_v13 = vsel %vm589_vm8, %v745_v15, 0.0  ;;  %v750_v14 = vsel %vm589_vm8, %v746_v41, 0.0 }
 0x14c   :  { %v2501_v26 = vadd.f32 %v1216_v23, %v576_v50  ;;  %v2503_v3 = vadd.f32 %v1216_v23, %v577_v29  ;;  %v594_v62 = vadd.f32 %v593_v4, %v592_v19  ;;  %v2506_v11 = vadd.f32 %v1216_v23, %v578_v54 }
 0x14d   :  { %v602_v0 = vadd.f32 %v601_v44, %v600_v49  ;;  %v749_v48 = vadd.f32 %v748_v13, %v747_v10  ;;  %v903_v34 = vmul.f32 %v2454_v32, %v2272_v21  ;;  %v603_v61 = vsel %vm589_vm8, %v599_v7, 0.0 }
 0x14e   :  { %v1221_v52 = vmul.f32 %v2501_v26, %v2272_v21  ;;  %595 = vadd.xlane.f32.xlu0 %v594_v62  ;;  %v904_v6 = vmul.f32 %v2456_v43, %v2280_v37  ;;  %v905_v59 = vmul.f32 %v2448_v9, %v2277_v63  ;;  %v1222_v38 = vmul.f32 %v2503_v3, %v2280_v37 }
 0x14f   :  { %v604_v35 = vadd.f32 %v603_v61, %v602_v0  ;;  %v906_v46 = vsel %vm589_vm8, %v903_v34, 0.0  ;;  %v754_v28 = vmul.f32 %v744_v45, %v2467_v40  ;;  %v751_v12 = vadd.f32 %v750_v14, %v749_v48 }
 0x150   :  { %v907_v2 = vsel %vm589_vm8, %v904_v6, 0.0  ;;  %v755_v36 = vmul.f32 %v745_v15, %v2470_v60  ;;  %v756_v58 = vmul.f32 %v746_v41, %v2473_v24  ;;  %v1062_v20 = vmul.f32 %v2475_v53, %v2272_v21 }
 0x151   :  { %605 = vadd.xlane.f32.xlu1 %v604_v35  ;;  %v908_v5 = vadd.f32 %v907_v2, %v906_v46  ;;  %v757_v39 = vsel %vm589_vm8, %v754_v28, 0.0  ;;  %v1063_v56 = vmul.f32 %v2477_v42, %v2280_v37  ;;  %v909_v22 = vsel %vm589_vm8, %v905_v59, 0.0 }
 0x152   :  { %752 = vadd.xlane.f32.xlu0 %v751_v12  ;;  %v758_v50 = vsel %vm589_vm8, %v755_v36, 0.0  ;;  %v1064_v27 = vmul.f32 %v2493_v33, %v2277_v63  ;;  %v913_v29 = vmul.f32 %v903_v34, %v2454_v32  ;;  %v1065_v54 = vsel %vm589_vm8, %v1062_v20, 0.0 }
 0x153   :  { %v910_v18 = vadd.f32 %v909_v22, %v908_v5  ;;  %v759_v8 = vadd.f32 %v758_v50, %v757_v39  ;;  %v1066_v1 = vsel %vm589_vm8, %v1063_v56, 0.0  ;;  %v760_v51 = vsel %vm589_vm8, %v756_v58, 0.0  ;;  %v2920_v22 = vld [vmem:[#allocation5_spill] sm:$0xff] }
 0x154   :  { %v1067_v16 = vadd.f32 %v1066_v1, %v1065_v54  ;;  %v914_v47 = vmul.f32 %v904_v6, %v2456_v43  ;;  %v915_v45 = vmul.f32 %v905_v59, %v2448_v9  ;;  %v1068_v30 = vsel %vm589_vm8, %v1064_v27, 0.0 }
 0x155   :  { %911 = vadd.xlane.f32.xlu1 %v910_v18  ;;  %v761_v57 = vadd.f32 %v760_v51, %v759_v8  ;;  %v916_v15 = vsel %vm589_vm8, %v913_v29, 0.0  ;;  %v1224_v41 = vsel %vm589_vm8, %v1221_v52, 0.0  ;;  %v1223_v49 = vmul.f32 %v2506_v11, %v2277_v63  ;;  %v2921_v51 = vld [vmem:[#allocation6_spill] sm:$0xff] }
 0x156   :  { %v1069_v19 = vadd.f32 %v1068_v30, %v1067_v16  ;;  %v917_v7 = vsel %vm589_vm8, %v914_v47, 0.0  ;;  %v1225_v23 = vsel %vm589_vm8, %v1222_v38, 0.0  ;;  %v919_v44 = vsel %vm589_vm8, %v915_v45, 0.0 }
 0x157   :  { %762 = vadd.xlane.f32.xlu0 %v761_v57  ;;  %v918_v4 = vadd.f32 %v917_v7, %v916_v15  ;;  %v1226_v10 = vadd.f32 %v1225_v23, %v1224_v41  ;;  %v1072_v13 = vmul.f32 %v1062_v20, %v2475_v53  ;;  %v1073_v62 = vmul.f32 %v1063_v56, %v2477_v42  ;;  %v2919_v20 = vld [vmem:[#allocation3_spill] sm:$0xff] }
 0x158   :  { %v1074_v14 = vmul.f32 %v1064_v27, %v2493_v33  ;;  %v1231_v0 = vmul.f32 %v1221_v52, %v2501_v26  ;;  %v1232_v48 = vmul.f32 %v1222_v38, %v2503_v3  ;;  %v1227_v6 = vsel %vm589_vm8, %v1223_v49, 0.0 }
 0x159   :  { %1070 = vadd.xlane.f32.xlu1 %v1069_v19  ;;  %v920_v34 = vadd.f32 %v919_v44, %v918_v4  ;;  %v1075_v61 = vsel %vm589_vm8, %v1072_v13, 0.0  ;;  %v1076_v59 = vsel %vm589_vm8, %v1073_v62, 0.0  ;;  %v1228_v28 = vadd.f32 %v1227_v6, %v1226_v10 }
 0x15a   :  { %v1234_v35 = vsel %vm589_vm8, %v1231_v0, 0.0  ;;  %v1235_v46 = vsel %vm589_vm8, %v1232_v48, 0.0  ;;  %v1077_v12 = vadd.f32 %v1076_v59, %v1075_v61  ;;  %v1078_v2 = vsel %vm589_vm8, %v1074_v14, 0.0 }
 0x15b   :  { %921 = vadd.xlane.f32.xlu0 %v920_v34  ;;  %v1233_v52 = vmul.f32 %v1223_v49, %v2506_v11  ;;  %v1236_v36 = vadd.f32 %v1235_v46, %v1234_v35 }
 0x15c   :  { %v1079_v38 = vadd.f32 %v1078_v2, %v1077_v12 }
 0x15d   :  { %1229 = vadd.xlane.f32.xlu1 %v1228_v28  ;;  %v1237_v58 = vsel %vm589_vm8, %v1233_v52, 0.0 }
 0x15e   :  { %v1238_v5 = vadd.f32 %v1237_v58, %v1236_v36 }
 0x15f   :  { %1080 = vadd.xlane.f32.xlu0 %v1079_v38 }
 0x163   :  { %1239 = vadd.xlane.f32.xlu0 %v1238_v5 }
 0x1db   :  { %v596_v39 = vpop.xlane.xlu0 %595 }
 0x1dc   :  { %v607_v56 = vmul.f32 %v596_v39, %v2919_v20  ;;  %v634_v50 = vmul.f32 %v596_v39, %v2920_v22  ;;  %v660_v16 = vmul.f32 %v596_v39, %v2921_v51 }
 0x1de   :  { %v606_v27 = vpop.xlane.xlu1 %605  ;;  %v609_v29 = vsel %vm608_vm9, %v607_v56, 0.0  ;;  %v635_v47 = vsel %vm608_vm9, %v634_v50, 0.0  ;;  %v661_v41 = vsel %vm608_vm9, %v660_v16, 0.0 }
 0x1df   :  { %610 = vadd.xlane.f32.xlu1 %v609_v29  ;;  %v619_v18 = vmul.f32 %v606_v27, %v2919_v20  ;;  %v753_v8 = vpop.xlane.xlu0 %752  ;;  %v645_v1 = vmul.f32 %v606_v27, %v2920_v22  ;;  %v671_v57 = vmul.f32 %v606_v27, %v2921_v51 }
 0x1e0   :  { %v764_v30 = vmul.f32 %v753_v8, %v2919_v20  ;;  %v790_v49 = vmul.f32 %v753_v8, %v2920_v22  ;;  %v816_v10 = vmul.f32 %v753_v8, %v2921_v51 }
 0x1e1   :  { %v620_v54 = vsel %vm608_vm9, %v619_v18, 0.0  ;;  %v646_v45 = vsel %vm608_vm9, %v645_v1, 0.0  ;;  %v672_v19 = vsel %vm608_vm9, %v671_v57, 0.0 }
 0x1e2   :  { %621 = vadd.xlane.f32.xlu0 %v620_v54  ;;  %v765_v23 = vsel %vm608_vm9, %v764_v30, 0.0  ;;  %v791_v13 = vsel %vm608_vm9, %v790_v49, 0.0  ;;  %v912_v62 = vpop.xlane.xlu1 %911  ;;  %v817_v61 = vsel %vm608_vm9, %v816_v10, 0.0 }
 0x1e3   :  { %636 = vadd.xlane.f32.xlu1 %v635_v47  ;;  %v923_v48 = vmul.f32 %v912_v62, %v2919_v20  ;;  %v949_v35 = vmul.f32 %v912_v62, %v2920_v22  ;;  %v975_v2 = vmul.f32 %v912_v62, %v2921_v51 }
 0x1e4   :  { %v763_v15 = vpop.xlane.xlu0 %762 }
 0x1e5   :  { %v775_v7 = vmul.f32 %v763_v15, %v2919_v20  ;;  %v801_v44 = vmul.f32 %v763_v15, %v2920_v22  ;;  %v827_v0 = vmul.f32 %v763_v15, %v2921_v51  ;;  %v924_v46 = vsel %vm608_vm9, %v923_v48, 0.0 }
 0x1e6   :  { %647 = vadd.xlane.f32.xlu0 %v646_v45  ;;  %v950_v52 = vsel %vm608_vm9, %v949_v35, 0.0  ;;  %v1071_v38 = vpop.xlane.xlu1 %1070  ;;  %v976_v56 = vsel %vm608_vm9, %v975_v2, 0.0 }
 0x1e7   :  { %662 = vadd.xlane.f32.xlu1 %v661_v41  ;;  %v776_v4 = vsel %vm608_vm9, %v775_v7, 0.0  ;;  %v802_v14 = vsel %vm608_vm9, %v801_v44, 0.0  ;;  %v828_v6 = vsel %vm608_vm9, %v827_v0, 0.0  ;;  %v1082_v5 = vmul.f32 %v1071_v38, %v2919_v20 }
 0x1e8   :  { %v922_v34 = vpop.xlane.xlu0 %921  ;;  %v1108_v29 = vmul.f32 %v1071_v38, %v2920_v22  ;;  %v1134_v1 = vmul.f32 %v1071_v38, %v2921_v51 }
 0x1e9   :  { %v934_v59 = vmul.f32 %v922_v34, %v2919_v20  ;;  %v960_v12 = vmul.f32 %v922_v34, %v2920_v22  ;;  %v986_v58 = vmul.f32 %v922_v34, %v2921_v51  ;;  %v1083_v18 = vsel %vm608_vm9, %v1082_v5, 0.0 }
 0x1ea   :  { %673 = vadd.xlane.f32.xlu0 %v672_v19  ;;  %v1109_v16 = vsel %vm608_vm9, %v1108_v29, 0.0  ;;  %v1230_v47 = vpop.xlane.xlu1 %1229  ;;  %v1135_v41 = vsel %vm608_vm9, %v1134_v1, 0.0  ;;  %v1854_v29 = vmov 50  }
 0x1eb   :  { %766 = vadd.xlane.f32.xlu1 %v765_v23  ;;  %v935_v28 = vsel %vm608_vm9, %v934_v59, 0.0  ;;  %v961_v36 = vsel %vm608_vm9, %v960_v12, 0.0  ;;  %v987_v50 = vsel %vm608_vm9, %v986_v58, 0.0  ;;  %v1241_v30 = vmul.f32 %v1230_v47, %v2919_v20 }
 0x1ec   :  { %v1081_v39 = vpop.xlane.xlu0 %1080  ;;  %v1267_v49 = vmul.f32 %v1230_v47, %v2920_v22  ;;  %v1293_v10 = vmul.f32 %v1230_v47, %v2921_v51  ;;  %1757 = vset.pattern.permute.xlu1 %v1854_v29  ;;  %v1855_v29 = vmov 51  }
 0x1ed   :  { %v1093_v27 = vmul.f32 %v1081_v39, %v2919_v20  ;;  %v1119_v54 = vmul.f32 %v1081_v39, %v2920_v22  ;;  %v1145_v57 = vmul.f32 %v1081_v39, %v2921_v51  ;;  %v1242_v23 = vsel %vm608_vm9, %v1241_v30, 0.0  ;;  %1758 = vset.pattern.permute.xlu0 %v1855_v29 }
 0x1ee   :  { %777 = vadd.xlane.f32.xlu0 %v776_v4  ;;  %v1294_v0 = vsel %vm608_vm9, %v1293_v10, 0.0 }
 0x1ef   :  { %792 = vadd.xlane.f32.xlu1 %v791_v13  ;;  %v1094_v8 = vsel %vm608_vm9, %v1093_v27, 0.0  ;;  %v1120_v45 = vsel %vm608_vm9, %v1119_v54, 0.0  ;;  %v1146_v19 = vsel %vm608_vm9, %v1145_v57, 0.0  ;;  %v1268_v13 = vsel %vm608_vm9, %v1267_v49, 0.0 }
 0x1f0   :  { %v1240_v15 = vpop.xlane.xlu0 %1239 }
 0x1f1   :  { %v1252_v7 = vmul.f32 %v1240_v15, %v2919_v20  ;;  %v1278_v44 = vmul.f32 %v1240_v15, %v2920_v22 }
 0x1f2   :  { %803 = vadd.xlane.f32.xlu0 %v802_v14  ;;  %v1304_v14 = vmul.f32 %v1240_v15, %v2921_v51 }
 0x1f3   :  { %818 = vadd.xlane.f32.xlu1 %v817_v61  ;;  %v1253_v4 = vsel %vm608_vm9, %v1252_v7, 0.0  ;;  %v1279_v62 = vsel %vm608_vm9, %v1278_v44, 0.0 }
 0x1f4   :  { %v1305_v48 = vsel %vm608_vm9, %v1304_v14, 0.0 }
 0x1f6   :  { %829 = vadd.xlane.f32.xlu0 %v828_v6 }
 0x1f7   :  { %925 = vadd.xlane.f32.xlu1 %v924_v46 }
 0x1fa   :  { %936 = vadd.xlane.f32.xlu0 %v935_v28 }
 0x1fb   :  { %951 = vadd.xlane.f32.xlu1 %v950_v52 }
 0x1fe   :  { %962 = vadd.xlane.f32.xlu0 %v961_v36 }
 0x1ff   :  { %977 = vadd.xlane.f32.xlu1 %v976_v56 }
 0x202   :  { %988 = vadd.xlane.f32.xlu0 %v987_v50 }
 0x203   :  { %1084 = vadd.xlane.f32.xlu1 %v1083_v18 }
 0x206   :  { %1095 = vadd.xlane.f32.xlu0 %v1094_v8 }
 0x207   :  { %1110 = vadd.xlane.f32.xlu1 %v1109_v16 }
 0x20a   :  { %1121 = vadd.xlane.f32.xlu0 %v1120_v45 }
 0x20b   :  { %1136 = vadd.xlane.f32.xlu1 %v1135_v41 }
 0x20e   :  { %1147 = vadd.xlane.f32.xlu0 %v1146_v19 }
 0x20f   :  { %1243 = vadd.xlane.f32.xlu1 %v1242_v23 }
 0x212   :  { %1254 = vadd.xlane.f32.xlu0 %v1253_v4 }
 0x213   :  { %1269 = vadd.xlane.f32.xlu1 %v1268_v13 }
 0x216   :  { %1280 = vadd.xlane.f32.xlu0 %v1279_v62 }
 0x217   :  { %1295 = vadd.xlane.f32.xlu1 %v1294_v0 }
 0x21a   :  { %1306 = vadd.xlane.f32.xlu0 %v1305_v48 }
 0x26c   :  { %v611_v34 = vpop.xlane.xlu1 %610 }
 0x26d   :  { %v612_v61 = vrot.slane %v611_v34, 4 }
 0x26f   :  { %v613_v6 = vadd.f32 %v612_v61, %v611_v34  ;;  %v622_v59 = vpop.xlane.xlu0 %621 }
 0x270   :  { %v623_v35 = vrot.slane %v622_v59, 4  ;;  %v637_v46 = vpop.xlane.xlu1 %636 }
 0x271   :  { %v614_v28 = vrot.slane %v613_v6, 2  ;;  %v638_v12 = vrot.slane %v637_v46, 4 }
 0x272   :  { %v624_v2 = vadd.f32 %v623_v35, %v622_v59 }
 0x273   :  { %v639_v52 = vadd.f32 %v638_v12, %v637_v46  ;;  %v648_v38 = vpop.xlane.xlu0 %647  ;;  %v615_v36 = vadd.f32 %v614_v28, %v613_v6 }
 0x274   :  { %v625_v58 = vrot.slane %v624_v2, 2  ;;  %v649_v5 = vrot.slane %v648_v38, 4  ;;  %v663_v39 = vpop.xlane.xlu1 %662 }
 0x275   :  { %v640_v56 = vrot.slane %v639_v52, 2  ;;  %v664_v50 = vrot.slane %v663_v39, 4  ;;  %v616_v27 = vrot.slane %v615_v36, 1 }
 0x276   :  { %v650_v18 = vadd.f32 %v649_v5, %v648_v38  ;;  %v626_v8 = vadd.f32 %v625_v58, %v624_v2 }
 0x277   :  { %v665_v54 = vadd.f32 %v664_v50, %v663_v39  ;;  %v674_v1 = vpop.xlane.xlu0 %673  ;;  %v617_v16 = vadd.f32 %v616_v27, %v615_v36  ;;  %v641_v47 = vadd.f32 %v640_v56, %v639_v52 }
 0x278   :  { %v651_v45 = vrot.slane %v650_v18, 2  ;;  %v675_v57 = vrot.slane %v674_v1, 4  ;;  %v767_v30 = vpop.xlane.xlu1 %766  ;;  %v627_v15 = vrot.slane %v626_v8, 1 }
 0x279   :  { %v666_v41 = vrot.slane %v665_v54, 2  ;;  %v768_v19 = vrot.slane %v767_v30, 4  ;;  %1556 = vpush %v617_v16  ;;  %v642_v7 = vrot.slane %v641_v47, 1 }
 0x27a   :  { %v676_v49 = vadd.f32 %v675_v57, %v674_v1  ;;  %v628_v23 = vadd.f32 %v627_v15, %v626_v8  ;;  %v652_v4 = vadd.f32 %v651_v45, %v650_v18 }
 0x27b   :  { %v769_v44 = vadd.f32 %v768_v19, %v767_v30  ;;  %v778_v10 = vpop.xlane.xlu0 %777  ;;  %v643_v13 = vadd.f32 %v642_v7, %v641_v47  ;;  %v667_v62 = vadd.f32 %v666_v41, %v665_v54 }
 0x27c   :  { %v677_v14 = vrot.slane %v676_v49, 2  ;;  %v779_v0 = vrot.slane %v778_v10, 4  ;;  %1558 = vpush %v628_v23  ;;  %v793_v48 = vpop.xlane.xlu1 %792  ;;  %v653_v34 = vrot.slane %v652_v4, 1 }
 0x27d   :  { %v770_v61 = vrot.slane %v769_v44, 2  ;;  %v794_v6 = vrot.slane %v793_v48, 4  ;;  %1560 = vpush %v643_v13  ;;  %v668_v59 = vrot.slane %v667_v62, 1 }
 0x27e   :  { %v780_v35 = vadd.f32 %v779_v0, %v778_v10  ;;  %v654_v46 = vadd.f32 %v653_v34, %v652_v4  ;;  %v678_v28 = vadd.f32 %v677_v14, %v676_v49 }
 0x27f   :  { %v795_v12 = vadd.f32 %v794_v6, %v793_v48  ;;  %v804_v2 = vpop.xlane.xlu0 %803  ;;  %v669_v52 = vadd.f32 %v668_v59, %v667_v62  ;;  %v771_v38 = vadd.f32 %v770_v61, %v769_v44 }
 0x280   :  { %v781_v36 = vrot.slane %v780_v35, 2  ;;  %v805_v58 = vrot.slane %v804_v2, 4  ;;  %1562 = vpush %v654_v46  ;;  %v819_v5 = vpop.xlane.xlu1 %818  ;;  %v679_v39 = vrot.slane %v678_v28, 1 }
 0x281   :  { %v796_v56 = vrot.slane %v795_v12, 2  ;;  %v820_v50 = vrot.slane %v819_v5, 4  ;;  %1564 = vpush %v669_v52  ;;  %v772_v27 = vrot.slane %v771_v38, 1 }
 0x282   :  { %v806_v18 = vadd.f32 %v805_v58, %v804_v2  ;;  %v680_v8 = vadd.f32 %v679_v39, %v678_v28  ;;  %v782_v54 = vadd.f32 %v781_v36, %v780_v35 }
 0x283   :  { %v821_v1 = vadd.f32 %v820_v50, %v819_v5  ;;  %v830_v16 = vpop.xlane.xlu0 %829  ;;  %v773_v47 = vadd.f32 %v772_v27, %v771_v38  ;;  %v797_v45 = vadd.f32 %v796_v56, %v795_v12 }
 0x284   :  { %v807_v57 = vrot.slane %v806_v18, 2  ;;  %v831_v30 = vrot.slane %v830_v16, 4  ;;  %1566 = vpush %v680_v8  ;;  %v926_v15 = vpop.xlane.xlu1 %925  ;;  %v783_v41 = vrot.slane %v782_v54, 1 }
 0x285   :  { %v822_v19 = vrot.slane %v821_v1, 2  ;;  %v927_v7 = vrot.slane %v926_v15, 4  ;;  %1568 = vpush %v773_v47  ;;  %v798_v49 = vrot.slane %v797_v45, 1 }
 0x286   :  { %v832_v23 = vadd.f32 %v831_v30, %v830_v16  ;;  %v784_v4 = vadd.f32 %v783_v41, %v782_v54  ;;  %v808_v44 = vadd.f32 %v807_v57, %v806_v18 }
 0x287   :  { %v928_v10 = vadd.f32 %v927_v7, %v926_v15  ;;  %v937_v13 = vpop.xlane.xlu0 %936  ;;  %v799_v62 = vadd.f32 %v798_v49, %v797_v45  ;;  %v823_v14 = vadd.f32 %v822_v19, %v821_v1 }
 0x288   :  { %v833_v0 = vrot.slane %v832_v23, 2  ;;  %v938_v48 = vrot.slane %v937_v13, 4  ;;  %1570 = vpush %v784_v4  ;;  %v952_v34 = vpop.xlane.xlu1 %951  ;;  %v809_v61 = vrot.slane %v808_v44, 1 }
 0x289   :  { %v929_v6 = vrot.slane %v928_v10, 2  ;;  %v953_v59 = vrot.slane %v952_v34, 4  ;;  %1572 = vpush %v799_v62  ;;  %v824_v35 = vrot.slane %v823_v14, 1 }
 0x28a   :  { %v939_v46 = vadd.f32 %v938_v48, %v937_v13  ;;  %v810_v28 = vadd.f32 %v809_v61, %v808_v44  ;;  %v834_v12 = vadd.f32 %v833_v0, %v832_v23 }
 0x28b   :  { %v954_v2 = vadd.f32 %v953_v59, %v952_v34  ;;  %v963_v52 = vpop.xlane.xlu0 %962  ;;  %v825_v38 = vadd.f32 %v824_v35, %v823_v14  ;;  %v930_v36 = vadd.f32 %v929_v6, %v928_v10 }
 0x28c   :  { %v940_v58 = vrot.slane %v939_v46, 2  ;;  %v964_v5 = vrot.slane %v963_v52, 4  ;;  %1574 = vpush %v810_v28  ;;  %v978_v39 = vpop.xlane.xlu1 %977  ;;  %v835_v56 = vrot.slane %v834_v12, 1 }
 0x28d   :  { %v955_v50 = vrot.slane %v954_v2, 2  ;;  %v979_v27 = vrot.slane %v978_v39, 4  ;;  %1576 = vpush %v825_v38  ;;  %v931_v29 = vrot.slane %v930_v36, 1 }
 0x28e   :  { %v965_v18 = vadd.f32 %v964_v5, %v963_v52  ;;  %v836_v8 = vadd.f32 %v835_v56, %v834_v12  ;;  %v941_v54 = vadd.f32 %v940_v58, %v939_v46 }
 0x28f   :  { %v980_v1 = vadd.f32 %v979_v27, %v978_v39  ;;  %v989_v16 = vpop.xlane.xlu0 %988  ;;  %v932_v47 = vadd.f32 %v931_v29, %v930_v36  ;;  %v956_v45 = vadd.f32 %v955_v50, %v954_v2 }
 0x290   :  { %v966_v57 = vrot.slane %v965_v18, 2  ;;  %v990_v30 = vrot.slane %v989_v16, 4  ;;  %1578 = vpush %v836_v8  ;;  %v1085_v15 = vpop.xlane.xlu1 %1084  ;;  %v942_v41 = vrot.slane %v941_v54, 1 }
 0x291   :  { %v981_v19 = vrot.slane %v980_v1, 2  ;;  %v1086_v7 = vrot.slane %v1085_v15, 4  ;;  %1580 = vpush %v932_v47  ;;  %v957_v49 = vrot.slane %v956_v45, 1 }
 0x292   :  { %v991_v23 = vadd.f32 %v990_v30, %v989_v16  ;;  %v943_v4 = vadd.f32 %v942_v41, %v941_v54  ;;  %v967_v44 = vadd.f32 %v966_v57, %v965_v18 }
 0x293   :  { %v1087_v10 = vadd.f32 %v1086_v7, %v1085_v15  ;;  %v1096_v13 = vpop.xlane.xlu0 %1095  ;;  %v958_v62 = vadd.f32 %v957_v49, %v956_v45  ;;  %v982_v14 = vadd.f32 %v981_v19, %v980_v1 }
 0x294   :  { %v992_v0 = vrot.slane %v991_v23, 2  ;;  %v1097_v48 = vrot.slane %v1096_v13, 4  ;;  %1582 = vpush %v943_v4  ;;  %v1111_v34 = vpop.xlane.xlu1 %1110  ;;  %v968_v61 = vrot.slane %v967_v44, 1 }
 0x295   :  { %v1088_v6 = vrot.slane %v1087_v10, 2  ;;  %v1112_v59 = vrot.slane %v1111_v34, 4  ;;  %1584 = vpush %v958_v62  ;;  %v983_v35 = vrot.slane %v982_v14, 1 }
 0x296   :  { %v1098_v46 = vadd.f32 %v1097_v48, %v1096_v13  ;;  %v969_v28 = vadd.f32 %v968_v61, %v967_v44  ;;  %v993_v12 = vadd.f32 %v992_v0, %v991_v23 }
 0x297   :  { %v1113_v2 = vadd.f32 %v1112_v59, %v1111_v34  ;;  %v1122_v52 = vpop.xlane.xlu0 %1121  ;;  %v984_v38 = vadd.f32 %v983_v35, %v982_v14  ;;  %v1089_v36 = vadd.f32 %v1088_v6, %v1087_v10 }
 0x298   :  { %v1099_v58 = vrot.slane %v1098_v46, 2  ;;  %v1123_v5 = vrot.slane %v1122_v52, 4  ;;  %1586 = vpush %v969_v28  ;;  %v1137_v39 = vpop.xlane.xlu1 %1136  ;;  %v994_v56 = vrot.slane %v993_v12, 1 }
 0x299   :  { %v1114_v50 = vrot.slane %v1113_v2, 2  ;;  %v1138_v27 = vrot.slane %v1137_v39, 4  ;;  %1588 = vpush %v984_v38  ;;  %v1090_v29 = vrot.slane %v1089_v36, 1 }
 0x29a   :  { %v1124_v18 = vadd.f32 %v1123_v5, %v1122_v52  ;;  %v995_v8 = vadd.f32 %v994_v56, %v993_v12  ;;  %v1100_v54 = vadd.f32 %v1099_v58, %v1098_v46 }
 0x29b   :  { %v1139_v1 = vadd.f32 %v1138_v27, %v1137_v39  ;;  %v1148_v16 = vpop.xlane.xlu0 %1147  ;;  %v1091_v47 = vadd.f32 %v1090_v29, %v1089_v36  ;;  %v1115_v45 = vadd.f32 %v1114_v50, %v1113_v2 }
 0x29c   :  { %v1125_v57 = vrot.slane %v1124_v18, 2  ;;  %v1149_v30 = vrot.slane %v1148_v16, 4  ;;  %1590 = vpush %v995_v8  ;;  %v1244_v15 = vpop.xlane.xlu1 %1243  ;;  %v1101_v41 = vrot.slane %v1100_v54, 1 }
 0x29d   :  { %v1140_v19 = vrot.slane %v1139_v1, 2  ;;  %v1245_v7 = vrot.slane %v1244_v15, 4  ;;  %1592 = vpush %v1091_v47  ;;  %v1116_v49 = vrot.slane %v1115_v45, 1 }
 0x29e   :  { %v1150_v23 = vadd.f32 %v1149_v30, %v1148_v16  ;;  %v1102_v4 = vadd.f32 %v1101_v41, %v1100_v54  ;;  %v1126_v44 = vadd.f32 %v1125_v57, %v1124_v18 }
 0x29f   :  { %v1246_v10 = vadd.f32 %v1245_v7, %v1244_v15  ;;  %v1255_v13 = vpop.xlane.xlu0 %1254  ;;  %v1117_v62 = vadd.f32 %v1116_v49, %v1115_v45  ;;  %v1141_v14 = vadd.f32 %v1140_v19, %v1139_v1 }
 0x2a0   :  { %v1151_v0 = vrot.slane %v1150_v23, 2  ;;  %v1256_v48 = vrot.slane %v1255_v13, 4  ;;  %1594 = vpush %v1102_v4  ;;  %v1270_v34 = vpop.xlane.xlu1 %1269  ;;  %v1127_v61 = vrot.slane %v1126_v44, 1 }
 0x2a1   :  { %v1247_v6 = vrot.slane %v1246_v10, 2  ;;  %v1271_v59 = vrot.slane %v1270_v34, 4  ;;  %1596 = vpush %v1117_v62  ;;  %v1142_v35 = vrot.slane %v1141_v14, 1 }
 0x2a2   :  { %v1257_v46 = vadd.f32 %v1256_v48, %v1255_v13  ;;  %v1128_v28 = vadd.f32 %v1127_v61, %v1126_v44  ;;  %v1152_v12 = vadd.f32 %v1151_v0, %v1150_v23 }
 0x2a3   :  { %v1272_v2 = vadd.f32 %v1271_v59, %v1270_v34  ;;  %v1281_v52 = vpop.xlane.xlu0 %1280  ;;  %v1143_v38 = vadd.f32 %v1142_v35, %v1141_v14  ;;  %v1248_v36 = vadd.f32 %v1247_v6, %v1246_v10 }
 0x2a4   :  { %v1258_v58 = vrot.slane %v1257_v46, 2  ;;  %v1282_v5 = vrot.slane %v1281_v52, 4  ;;  %1598 = vpush %v1128_v28  ;;  %v1296_v39 = vpop.xlane.xlu1 %1295  ;;  %v1153_v56 = vrot.slane %v1152_v12, 1 }
 0x2a5   :  { %v1273_v50 = vrot.slane %v1272_v2, 2  ;;  %v1297_v27 = vrot.slane %v1296_v39, 4  ;;  %1600 = vpush %v1143_v38  ;;  %v1249_v29 = vrot.slane %v1248_v36, 1 }
 0x2a6   :  { %v1283_v18 = vadd.f32 %v1282_v5, %v1281_v52  ;;  %v1154_v8 = vadd.f32 %v1153_v56, %v1152_v12  ;;  %v1259_v54 = vadd.f32 %v1258_v58, %v1257_v46 }
 0x2a7   :  { %v1298_v1 = vadd.f32 %v1297_v27, %v1296_v39  ;;  %v1307_v16 = vpop.xlane.xlu0 %1306  ;;  %v1250_v47 = vadd.f32 %v1249_v29, %v1248_v36  ;;  %v1274_v45 = vadd.f32 %v1273_v50, %v1272_v2 }
 0x2a8   :  { %v1284_v57 = vrot.slane %v1283_v18, 2  ;;  %v1308_v30 = vrot.slane %v1307_v16, 4  ;;  %1602 = vpush %v1154_v8  ;;  %v1260_v15 = vrot.slane %v1259_v54, 1 }
 0x2a9   :  { %v1299_v41 = vrot.slane %v1298_v1, 2  ;;  %1604 = vpush %v1250_v47  ;;  %v1275_v19 = vrot.slane %v1274_v45, 1 }
 0x2aa   :  { %v1309_v7 = vadd.f32 %v1308_v30, %v1307_v16  ;;  %s1557_s24 = spop %1556  ;;  %v1261_v49 = vadd.f32 %v1260_v15, %v1259_v54  ;;  %v1285_v23 = vadd.f32 %v1284_v57, %v1283_v18 }
 0x2ab   :  { %s2620_s25 = smul.f32 0.001953125, %s1557_s24  ;;  %v1276_v4 = vadd.f32 %v1275_v19, %v1274_v45  ;;  %v1300_v44 = vadd.f32 %v1299_v41, %v1298_v1  ;;  %v2671_v41 = vld [vmem:[%s2838_s1] sm:$0x3f] }
 0x2ac   :  { %v1310_v10 = vrot.slane %v1309_v7, 2  ;;  %1606 = vpush %v1261_v49  ;;  %v1286_v13 = vrot.slane %v1285_v23, 1 }
 0x2ad   :  { %s632_s26 = smul.f32 %s2620_s25, %s2620_s25  ;;  %s1559_s27 = spop %1558  ;;  %1608 = vpush %v1276_v4  ;;  %v1301_v62 = vrot.slane %v1300_v44, 1  ;;  %v686_v56 = vstv %s2620_s25 }
 0x2ae   :  { %s631_s28 = smul.f32 0.001953125, %s1559_s27  ;;  %s1561_s29 = spop %1560  ;;  %v1287_v14 = vadd.f32 %v1286_v13, %v1285_v23  ;;  %v1311_v0 = vadd.f32 %v1310_v10, %v1309_v7  ;;  %v687_v1 = vmul.f32 %v686_v56, %v2919_v20 }
 0x2af   :  { %s2624_s30 = smul.f32 0.001953125, %s1561_s29  ;;  %v1302_v48 = vadd.f32 %v1301_v62, %v1300_v44 }
 0x2b0   :  { %s633_s3 = ssub.f32 %s631_s28, %s632_s26  ;;  %1610 = vpush %v1287_v14  ;;  %v1312_v34 = vrot.slane %v1311_v0, 1 }
 0x2b1   :  { %s658_s4 = smul.f32 %s2624_s30, %s2624_s30  ;;  %s1563_s5 = spop %1562  ;;  %1612 = vpush %v1302_v48  ;;  %v688_v5 = vstv %s2624_s30 }
 0x2b2   :  { %s657_s6 = smul.f32 0.001953125, %s1563_s5  ;;  %s1565_s7 = spop %1564  ;;  %v1313_v61 = vadd.f32 %v1312_v34, %v1311_v0  ;;  %v694_v6 = vstv %s633_s3  ;;  %v689_v29 = vmul.f32 %v688_v5, %v2920_v22 }
 0x2b3   :  { %s2628_s8 = smul.f32 0.001953125, %s1565_s7  ;;  %v695_v46 = vmul.f32 %v694_v6, %v2919_v20 }
 0x2b4   :  { %s659_s9 = ssub.f32 %s657_s6, %s658_s4  ;;  %1614 = vpush %v1313_v61  ;;  %v690_v45 = vadd.f32 %v689_v29, %v687_v1 }
 0x2b5   :  { %s684_s10 = smul.f32 %s2628_s8, %s2628_s8  ;;  %s1567_s11 = spop %1566  ;;  %v691_v50 = vstv %s2628_s8 }
 0x2b6   :  { %v696_v59 = vstv %s659_s9  ;;  %s683_s12 = smul.f32 0.001953125, %s1567_s11  ;;  %s1569_s13 = spop %1568  ;;  %v692_v16 = vmul.f32 %v691_v50, %v2921_v51 }
 0x2b7   :  { %v697_v35 = vmul.f32 %v696_v59, %v2920_v22  ;;  %s2633_s14 = smul.f32 0.001953125, %s1569_s13 }
 0x2b8   :  { %s685_s15 = ssub.f32 %s683_s12, %s684_s10  ;;  %v693_v15 = vadd.f32 %v692_v16, %v690_v45 }
 0x2b9   :  { %s788_s16 = smul.f32 %s2633_s14, %s2633_s14  ;;  %s1571_s17 = spop %1570  ;;  %v698_v12 = vadd.f32 %v697_v35, %v695_v46  ;;  %v842_v10 = vstv %s2633_s14 }
 0x2ba   :  { %v699_v28 = vstv %s685_s15  ;;  %s787_s18 = smul.f32 0.001953125, %s1571_s17  ;;  %s1573_s0 = spop %1572  ;;  %v843_v61 = vmul.f32 %v842_v10, %v2919_v20 }
 0x2bb   :  { %v700_v2 = vmul.f32 %v699_v28, %v2921_v51  ;;  %s2639_s19 = smul.f32 0.001953125, %s1573_s0 }
 0x2bc   :  { %s789_s20 = ssub.f32 %s787_s18, %s788_s16 }
 0x2bd   :  { %v701_v52 = vadd.f32 %v700_v2, %v698_v12  ;;  %s814_s21 = smul.f32 %s2639_s19, %s2639_s19  ;;  %s1575_s22 = spop %1574  ;;  %v844_v4 = vstv %s2639_s19 }
 0x2be   :  { %s813_s23 = smul.f32 0.001953125, %s1575_s22  ;;  %s1577_s24 = spop %1576  ;;  %v850_v36 = vstv %s789_s20  ;;  %v845_v14 = vmul.f32 %v844_v4, %v2920_v22 }
 0x2bf   :  { %v702_v38 = vadd.f32 1e-05, %v701_v52  ;;  %s2643_s26 = smul.f32 0.001953125, %s1577_s24  ;;  %v851_v27 = vmul.f32 %v850_v36, %v2919_v20 }
 0x2c0   :  { %s815_s27 = ssub.f32 %s813_s23, %s814_s21  ;;  %v846_v35 = vadd.f32 %v845_v14, %v843_v61 }
 0x2c1   :  { %1776 = vrsqrt.f32 %v702_v38  ;;  %s840_s28 = smul.f32 %s2643_s26, %s2643_s26  ;;  %s1579_s29 = spop %1578  ;;  %v847_v13 = vstv %s2643_s26 }
 0x2c2   :  { %v852_v58 = vstv %s815_s27  ;;  %s839_s3 = smul.f32 0.001953125, %s1579_s29  ;;  %s1581_s4 = spop %1580  ;;  %v848_v6 = vmul.f32 %v847_v13, %v2921_v51 }
 0x2c3   :  { %v853_v39 = vmul.f32 %v852_v58, %v2920_v22  ;;  %s2649_s5 = smul.f32 0.001953125, %s1581_s4  ;;  %s1856_s27 = smov 5  }
 0x2c4   :  { %s841_s6 = ssub.f32 %s839_s3, %s840_s28  ;;  %v849_v12 = vadd.f32 %v848_v6, %v846_v35 }
 0x2c5   :  { %s947_s7 = smul.f32 %s2649_s5, %s2649_s5  ;;  %s1583_s9 = spop %1582  ;;  %v854_v8 = vadd.f32 %v853_v39, %v851_v27  ;;  %v1001_v39 = vstv %s2649_s5 }
 0x2c6   :  { %v855_v18 = vstv %s841_s6  ;;  %s946_s10 = smul.f32 0.001953125, %s1583_s9  ;;  %s1585_s11 = spop %1584 }
 0x2c7   :  { %v856_v54 = vmul.f32 %v855_v18, %v2921_v51  ;;  %s2658_s30 = smul.f32 0.001953125, %s1585_s11 }
 0x2c8   :  { %s2662_s25 = ssub.f32 %s946_s10, %s947_s7 }
 0x2c9   :  { %v857_v47 = vadd.f32 %v856_v54, %v854_v8  ;;  %s973_s8 = smul.f32 %s2658_s30, %s2658_s30  ;;  %s1587_s12 = spop %1586  ;;  %v1003_v58 = vstv %s2658_s30  ;;  %v1002_v54 = vmul.f32 %v1001_v39, %v2919_v20 }
 0x2ca   :  { %s972_s13 = smul.f32 0.001953125, %s1587_s12  ;;  %s1589_s15 = spop %1588  ;;  %v1009_v7 = vstv %s2662_s25  ;;  %v1004_v27 = vmul.f32 %v1003_v58, %v2920_v22 }
 0x2cb   :  { %v1777_v57 = vpop.eup %1776  ;;  %v858_v30 = vadd.f32 1e-05, %v857_v47  ;;  %s2666_s16 = smul.f32 0.001953125, %s1589_s15  ;;  %v1010_v62 = vmul.f32 %v1009_v7, %v2919_v20 }
 0x2cc   :  { %s974_s17 = ssub.f32 %s972_s13, %s973_s8  ;;  %v2674_v19 = vmul.f32 %v2671_v41, %v1777_v57  ;;  %v1005_v47 = vadd.f32 %v1004_v27, %v1002_v54 }
 0x2cd   :  { %1778 = vrsqrt.f32 %v858_v30  ;;  %s999_s20 = smul.f32 %s2666_s16, %s2666_s16  ;;  %s1591_s21 = spop %1590  ;;  %v1006_v56 = vstv %s2666_s16 }
 0x2ce   :  { %v1011_v49 = vstv %s974_s17  ;;  %s998_s22 = smul.f32 0.001953125, %s1591_s21  ;;  %s1593_s23 = spop %1592  ;;  %v705_v23 = vmul.f32 %v2674_v19, %v693_v15  ;;  %v1007_v1 = vmul.f32 %v1006_v56, %v2921_v51 }
 0x2cf   :  { %v1012_v44 = vmul.f32 %v1011_v49, %v2920_v22  ;;  %s2682_s1 = smul.f32 0.001953125, %s1593_s23 }
 0x2d0   :  { %s1000_s24 = ssub.f32 %s998_s22, %s999_s20  ;;  %707 = vrot.lane.b32.xlu1 %v705_v23, %s1856_s27  ;;  %v1008_v30 = vadd.f32 %v1007_v1, %v1005_v47  ;;  %v1859_v47 = vmov 62  }
 0x2d1   :  { %s1106_s28 = smul.f32 %s2682_s1, %s2682_s1  ;;  %s1595_s29 = spop %1594  ;;  %v1013_v48 = vadd.f32 %v1012_v44, %v1010_v62  ;;  %v1160_v10 = vstv %s2682_s1 }
 0x2d2   :  { %v1014_v0 = vstv %s1000_s24  ;;  %s1105_s19 = smul.f32 0.001953125, %s1595_s29  ;;  %s1597_s3 = spop %1596  ;;  %v1161_v61 = vmul.f32 %v1160_v10, %v2919_v20 }
 0x2d3   :  { %v1015_v34 = vmul.f32 %v1014_v0, %v2921_v51  ;;  %s2692_s4 = smul.f32 0.001953125, %s1597_s3 }
 0x2d4   :  { %s1107_s14 = ssub.f32 %s1105_s19, %s1106_s28 }
 0x2d5   :  { %v1016_v59 = vadd.f32 %v1015_v34, %v1013_v48  ;;  %s1132_s26 = smul.f32 %s2692_s4, %s2692_s4  ;;  %s1599_s6 = spop %1598  ;;  %v1162_v4 = vstv %s2692_s4 }
 0x2d6   :  { %s1131_s7 = smul.f32 0.001953125, %s1599_s6  ;;  %s1601_s9 = spop %1600  ;;  %v1168_v52 = vstv %s1107_s14  ;;  %v1163_v14 = vmul.f32 %v1162_v4, %v2920_v22 }
 0x2d7   :  { %v1779_v46 = vpop.eup %1778  ;;  %v1017_v28 = vadd.f32 1e-05, %v1016_v59  ;;  %s2698_s10 = smul.f32 0.001953125, %s1601_s9  ;;  %v1169_v50 = vmul.f32 %v1168_v52, %v2919_v20 }
 0x2d8   :  { %s1133_s11 = ssub.f32 %s1131_s7, %s1132_s26  ;;  %v2701_v2 = vmul.f32 %v2671_v41, %v1779_v46  ;;  %v1164_v35 = vadd.f32 %v1163_v14, %v1161_v61 }
 0x2d9   :  { %1780 = vrsqrt.f32 %v1017_v28  ;;  %s1158_s25 = smul.f32 %s2698_s10, %s2698_s10  ;;  %s1603_s8 = spop %1602  ;;  %v1165_v13 = vstv %s2698_s10 }
 0x2da   :  { %v1170_v38 = vstv %s1133_s11  ;;  %s1157_s12 = smul.f32 0.001953125, %s1603_s8  ;;  %s1605_s13 = spop %1604  ;;  %v861_v36 = vmul.f32 %v2701_v2, %v849_v12  ;;  %v1166_v6 = vmul.f32 %v1165_v13, %v2921_v51 }
 0x2db   :  { %v1171_v5 = vmul.f32 %v1170_v38, %v2920_v22  ;;  %s2708_s15 = smul.f32 0.001953125, %s1605_s13 }
 0x2dc   :  { %s1159_s17 = ssub.f32 %s1157_s12, %s1158_s25  ;;  %863 = vrot.lane.b32.xlu0 %v861_v36, %s1856_s27  ;;  %v1167_v12 = vadd.f32 %v1166_v6, %v1164_v35  ;;  %v1869_v6 = vmov 64  }
 0x2dd   :  { %s1265_s18 = smul.f32 %s2708_s15, %s2708_s15  ;;  %s1607_s0 = spop %1606  ;;  %v1172_v18 = vadd.f32 %v1171_v5, %v1169_v50  ;;  %v1319_v58 = vstv %s2708_s15 }
 0x2de   :  { %v1173_v29 = vstv %s1159_s17  ;;  %s1264_s20 = smul.f32 0.001953125, %s1607_s0  ;;  %s1609_s30 = spop %1608  ;;  %v1320_v56 = vmul.f32 %v1319_v58, %v2919_v20 }
 0x2df   :  { %v1174_v8 = vmul.f32 %v1173_v29, %v2921_v51  ;;  %s2718_s21 = smul.f32 0.001953125, %s1609_s30 }
 0x2e0   :  { %s1266_s5 = ssub.f32 %s1264_s20, %s1265_s18 }
 0x2e1   :  { %v1175_v16 = vadd.f32 %v1174_v8, %v1172_v18  ;;  %s1291_s16 = smul.f32 %s2718_s21, %s2718_s21  ;;  %s1611_s22 = spop %1610  ;;  %v1321_v36 = vstv %s2718_s21  ;;  %v1857_v8 = vmov 53  }
 0x2e2   :  { %s1290_s23 = smul.f32 0.001953125, %s1611_s22  ;;  %s1613_s24 = spop %1612  ;;  %v1327_v7 = vstv %s1266_s5  ;;  %v1322_v39 = vmul.f32 %v1321_v36, %v2920_v22 }
 0x2e3   :  { %v1781_v45 = vpop.eup %1780  ;;  %v1176_v57 = vadd.f32 1e-05, %v1175_v16  ;;  %s2724_s28 = smul.f32 0.001953125, %s1613_s24  ;;  %v1328_v62 = vmul.f32 %v1327_v7, %v2919_v20  ;;  %v1858_v16 = vmov 61   ;;  %v1864_v7 = vmov 63   ;;  %s1873_s21 = smov 1  }
 0x2e4   :  { %s1292_s29 = ssub.f32 %s1290_s23, %s1291_s16  ;;  %v1019_v15 = vmul.f32 %v2671_v41, %v1781_v45  ;;  %v1323_v27 = vadd.f32 %v1322_v39, %v1320_v56  ;;  %v1861_v45 = vmov 55  }
 0x2e5   :  { %1782 = vrsqrt.f32 %v1176_v57  ;;  %s1317_s19 = smul.f32 %s2724_s28, %s2724_s28  ;;  %s1615_s3 = spop %1614  ;;  %v1324_v5 = vstv %s2724_s28  ;;  %v1862_v57 = vmov 60  }
 0x2e6   :  { %v1329_v49 = vstv %s1292_s29  ;;  %s1316_s14 = smul.f32 0.001953125, %s1615_s3  ;;  %v1020_v23 = vmul.f32 %v1019_v15, %v1008_v30  ;;  %v1325_v50 = vmul.f32 %v1324_v5, %v2921_v51  ;;  %v1863_v30 = vmov 54  }
 0x2e7   :  { %v1330_v44 = vmul.f32 %v1329_v49, %v2920_v22 }
 0x2e8   :  { %s1318_s26 = ssub.f32 %s1316_s14, %s1317_s19  ;;  %1022 = vrot.lane.b32.xlu1 %v1020_v23, %s1856_s27  ;;  %v1326_v18 = vadd.f32 %v1325_v50, %v1323_v27  ;;  %v1865_v23 = vmov 56  }
 0x2e9   :  { %v1331_v48 = vadd.f32 %v1330_v44, %v1328_v62  ;;  %v1866_v44 = vmov 57   ;;  %v1867_v62 = vmov 58  }
 0x2ea   :  { %v1332_v0 = vstv %s1318_s26 }
 0x2eb   :  { %v1333_v34 = vmul.f32 %v1332_v0, %v2921_v51 }
 0x2ed   :  { %v1334_v59 = vadd.f32 %v1333_v34, %v1331_v48  ;;  %v1868_v48 = vmov 59  }
 0x2ef   :  { %v1783_v46 = vpop.eup %1782  ;;  %v1335_v28 = vadd.f32 1e-05, %v1334_v59  ;;  %v1870_v59 = vmov 65  }
 0x2f0   :  { %v1178_v52 = vmul.f32 %v2671_v41, %v1783_v46 }
 0x2f1   :  { %1784 = vrsqrt.f32 %v1335_v28 }
 0x2f2   :  { %v1179_v38 = vmul.f32 %v1178_v52, %v1167_v12 }
 0x2f4   :  { %1181 = vrot.lane.b32.xlu1 %v1179_v38, %s1856_s27 }
 0x2f8   :  { %713 = vperm.xlu1 %1757, %v2674_v19   ;;  %v1860_v19 = vmov 52  }
 0x2fb   :  { %v1785_v29 = vpop.eup %1784 }
 0x2fc   :  { %1760 = vset.pattern.permute.xlu1 %v1857_v8  ;;  %v1337_v54 = vmul.f32 %v2671_v41, %v1785_v29 }
 0x2fd   :  { %1187 = vperm.xlu1 %1760, %v1178_v52  }
 0x2fe   :  { %v1338_v1 = vmul.f32 %v1337_v54, %v1326_v18 }
 0x300   :  { %1340 = vrot.lane.b32.xlu0 %v1338_v1, %s1856_s27 }
 0x301   :  { %1762 = vset.pattern.permute.xlu1 %v1858_v16 }
 0x302   :  { %887 = vperm.xlu1 %1762, %v2671_v41  }
 0x304   :  { %869 = vperm.xlu0 %1758, %v2701_v2  }
 0x306   :  { %1764 = vset.pattern.permute.xlu1 %v1859_v47 }
 0x307   :  { %1046 = vperm.xlu1 %1764, %v2671_v41  }
 0x308   :  { %1759 = vset.pattern.permute.xlu0 %v1860_v19 }
 0x309   :  { %1028 = vperm.xlu0 %1759, %v1019_v15  }
 0x30b   :  { %1766 = vset.pattern.permute.xlu1 %v1861_v45 }
 0x30d   :  { %1761 = vset.pattern.permute.xlu0 %v1862_v57 }
 0x30e   :  { %731 = vperm.xlu0 %1761, %v2671_v41  }
 0x312   :  { %1763 = vset.pattern.permute.xlu0 %v1863_v30 }
 0x313   :  { %1346 = vperm.xlu0 %1763, %v1337_v54  }
 0x317   :  { %1765 = vset.pattern.permute.xlu0 %v1864_v7 }
 0x318   :  { %1205 = vperm.xlu0 %1765, %v2671_v41  }
 0x342   :  { %v708_v2 = vpop.permute.xlu1 %707 }
 0x343   :  { %v710_v49 = vsub.f32 %v2671_v41, %v708_v2 }
 0x345   :  { %721 = vperm.xlu1 %1766, %v710_v49  }
 0x349   :  { %1767 = vset.pattern.permute.xlu1 %v1865_v23 }
 0x34e   :  { %v864_v15 = vpop.permute.xlu0 %863 }
 0x34f   :  { %v866_v4 = vsub.f32 %v2671_v41, %v864_v15 }
 0x351   :  { %877 = vperm.xlu1 %1767, %v866_v4  }
 0x355   :  { %1768 = vset.pattern.permute.xlu1 %v1866_v44 }
 0x35a   :  { %v1023_v10 = vpop.permute.xlu1 %1022 }
 0x35b   :  { %v1025_v13 = vsub.f32 %v2671_v41, %v1023_v10 }
 0x35d   :  { %1036 = vperm.xlu1 %1768, %v1025_v13  }
 0x361   :  { %1769 = vset.pattern.permute.xlu1 %v1867_v62 }
 0x366   :  { %v1182_v14 = vpop.permute.xlu1 %1181 }
 0x367   :  { %v1184_v0 = vsub.f32 %v2671_v41, %v1182_v14 }
 0x369   :  { %1195 = vperm.xlu1 %1769, %v1184_v0  }
 0x36d   :  { %1770 = vset.pattern.permute.xlu1 %v1868_v48 }
 0x372   :  { %v1341_v34 = vpop.permute.xlu0 %1340 }
 0x373   :  { %v1343_v61 = vsub.f32 %v2671_v41, %v1341_v34 }
 0x375   :  { %1354 = vperm.xlu1 %1770, %v1343_v61  }
 0x377   :  { %v714_v35 = vpop.permute.xlu1 %713 }
 0x378   :  { %v716_v50 = vmul.f32 %v714_v35, %v2452_v25  ;;  %v717_v27 = vmul.f32 %v714_v35, %v2459_v17  ;;  %v718_v16 = vmul.f32 %v714_v35, %v2462_v55 }
 0x379   :  { %1771 = vset.pattern.permute.xlu1 %v1869_v6 }
 0x37a   :  { %1364 = vperm.xlu1 %1771, %v2671_v41  }
 0x37c   :  { %v1188_v46 = vpop.permute.xlu1 %1187 }
 0x37d   :  { %v1190_v47 = vmul.f32 %v1188_v46, %v2475_v53  ;;  %v1191_v30 = vmul.f32 %v1188_v46, %v2477_v42 }
 0x37e   :  { %1772 = vset.pattern.permute.xlu1 %v1870_v59 }
 0x37f   :  { %1374 = vperm.xlu1 %1772, %v2671_v41  }
 0x381   :  { %v888_v28 = vpop.permute.xlu1 %887 }
 0x383   :  { %v870_v52 = vpop.permute.xlu0 %869 }
 0x384   :  { %v872_v39 = vmul.f32 %v870_v52, %v2467_v40  ;;  %v873_v56 = vmul.f32 %v870_v52, %v2470_v60  ;;  %v874_v18 = vmul.f32 %v870_v52, %v2473_v24  ;;  %v1192_v24 = vmul.f32 %v1188_v46, %v2493_v33 }
 0x386   :  { %v1047_v12 = vpop.permute.xlu1 %1046 }
 0x388   :  { %v1029_v58 = vpop.permute.xlu0 %1028 }
 0x389   :  { %v1031_v8 = vmul.f32 %v1029_v58, %v2454_v32  ;;  %v1032_v19 = vmul.f32 %v1029_v58, %v2456_v43  ;;  %v1033_v60 = vmul.f32 %v1029_v58, %v2448_v9 }
 0x38d   :  { %v732_v29 = vpop.permute.xlu0 %731 }
 0x392   :  { %v1347_v53 = vpop.permute.xlu0 %1346 }
 0x393   :  { %v1349_v33 = vmul.f32 %v1347_v53, %v2501_v26 }
 0x397   :  { %v1206_v6 = vpop.permute.xlu0 %1205 }
 0x3c4   :  { %v722_v38 = vpop.permute.xlu1 %721 }
 0x3c5   :  { %v724_v40 = vadd.f32 %v722_v38, %v716_v50  ;;  %v725_v25 = vadd.f32 %v722_v38, %v717_v27  ;;  %v726_v32 = vadd.f32 %v722_v38, %v718_v16  ;;  %v1350_v38 = vmul.f32 %v1347_v53, %v2503_v3 }
 0x3c7   :  { %v727_v15 = vmax.f32 %v724_v40, 0.0  ;;  %v728_v4 = vmax.f32 %v725_v25, 0.0  ;;  %v729_v13 = vmax.f32 %v726_v32, 0.0 }
 0x3c9   :  { %v734_v34 = vmul.f32 %v732_v29, %v727_v15  ;;  %v735_v59 = vmul.f32 %v732_v29, %v728_v4  ;;  %v736_v58 = vmul.f32 %v732_v29, %v729_v13 }
 0x3d0   :  { %v878_v36 = vpop.permute.xlu1 %877 }
 0x3d1   :  { %v880_v54 = vadd.f32 %v878_v36, %v872_v39  ;;  %v881_v1 = vadd.f32 %v878_v36, %v873_v56  ;;  %v882_v57 = vadd.f32 %v878_v36, %v874_v18  ;;  %v1351_v36 = vmul.f32 %v1347_v53, %v2506_v11 }
 0x3d3   :  { %v883_v2 = vmax.f32 %v880_v54, 0.0  ;;  %v884_v49 = vmax.f32 %v881_v1, 0.0  ;;  %v885_v44 = vmax.f32 %v882_v57, 0.0 }
 0x3d5   :  { %v890_v14 = vmul.f32 %v888_v28, %v883_v2  ;;  %v891_v0 = vmul.f32 %v888_v28, %v884_v49  ;;  %v892_v35 = vmul.f32 %v888_v28, %v885_v44 }
 0x3d7   :  { %v893_v39 = vadd.f32 %v890_v14, %v734_v34  ;;  %v894_v56 = vadd.f32 %v891_v0, %v735_v59  ;;  %v895_v16 = vadd.f32 %v892_v35, %v736_v58 }
 0x3dc   :  { %v1037_v5 = vpop.permute.xlu1 %1036 }
 0x3dd   :  { %v1039_v17 = vadd.f32 %v1037_v5, %v1031_v8  ;;  %v1040_v7 = vadd.f32 %v1037_v5, %v1032_v19  ;;  %v1041_v55 = vadd.f32 %v1037_v5, %v1033_v60 }
 0x3df   :  { %v1042_v10 = vmax.f32 %v1039_v17, 0.0  ;;  %v1043_v62 = vmax.f32 %v1040_v7, 0.0  ;;  %v1044_v42 = vmax.f32 %v1041_v55, 0.0 }
 0x3e1   :  { %v1049_v46 = vmul.f32 %v1047_v12, %v1042_v10  ;;  %v1050_v5 = vmul.f32 %v1047_v12, %v1043_v62  ;;  %v1051_v50 = vmul.f32 %v1047_v12, %v1044_v42 }
 0x3e3   :  { %v1053_v19 = vadd.f32 %v1050_v5, %v894_v56  ;;  %v1054_v60 = vadd.f32 %v1051_v50, %v895_v16  ;;  %v1871_v50 = vmov 66  }
 0x3e4   :  { %1773 = vset.pattern.permute.xlu0 %v1871_v50 }
 0x3e8   :  { %v1196_v45 = vpop.permute.xlu1 %1195 }
 0x3e9   :  { %v1198_v23 = vadd.f32 %v1196_v45, %v1190_v47  ;;  %v1199_v43 = vadd.f32 %v1196_v45, %v1191_v30  ;;  %v1200_v9 = vadd.f32 %v1196_v45, %v1192_v24  ;;  %v1052_v47 = vadd.f32 %v1049_v46, %v893_v39 }
 0x3eb   :  { %v1201_v48 = vmax.f32 %v1198_v23, 0.0  ;;  %v1202_v61 = vmax.f32 %v1199_v43, 0.0  ;;  %v1203_v52 = vmax.f32 %v1200_v9, 0.0 }
 0x3ed   :  { %v1208_v27 = vmul.f32 %v1206_v6, %v1201_v48  ;;  %v1209_v8 = vmul.f32 %v1206_v6, %v1202_v61  ;;  %v1210_v28 = vmul.f32 %v1206_v6, %v1203_v52 }
 0x3ef   :  { %v1211_v11 = vadd.f32 %v1208_v27, %v1052_v47  ;;  %v1212_v29 = vadd.f32 %v1209_v8, %v1053_v19  ;;  %v1213_v57 = vadd.f32 %v1210_v28, %v1054_v60 }
 0x3f4   :  { %v1355_v18 = vpop.permute.xlu1 %1354 }
 0x3f5   :  { %v1357_v26 = vadd.f32 %v1355_v18, %v1349_v33  ;;  %v1358_v54 = vadd.f32 %v1355_v18, %v1350_v38  ;;  %v1359_v1 = vadd.f32 %v1355_v18, %v1351_v36 }
 0x3f7   :  { %v1360_v40 = vmax.f32 %v1357_v26, 0.0  ;;  %v1361_v45 = vmax.f32 %v1358_v54, 0.0  ;;  %v1362_v3 = vmax.f32 %v1359_v1, 0.0 }
 0x3f9   :  { %v1365_v25 = vpop.permute.xlu1 %1364 }
 0x3fa   :  { %v1367_v17 = vmul.f32 %v1365_v25, %v1360_v40  ;;  %v1368_v12 = vmul.f32 %v1365_v25, %v1361_v45  ;;  %v1369_v30 = vmul.f32 %v1365_v25, %v1362_v3 }
 0x3fc   :  { %v1370_v24 = vadd.f32 %v1367_v17, %v1211_v11  ;;  %v1371_v32 = vadd.f32 %v1368_v12, %v1212_v29  ;;  %v1372_v7 = vadd.f32 %v1369_v30, %v1213_v57 }
 0x3fe   :  { %v1375_v2 = vpop.permute.xlu1 %1374 }
 0x3ff   :  { %v2777_v49 = vadd.f32 %v1375_v2, %v1370_v24  ;;  %v2779_v55 = vadd.f32 %v1375_v2, %v1371_v32  ;;  %v2781_v23 = vadd.f32 %v1375_v2, %v1372_v7 }
 0x401   :  { %v1380_v53 = vmul.f32 %v2777_v49, %v2272_v21  ;;  %v1381_v15 = vmul.f32 %v2779_v55, %v2280_v37  ;;  %v1382_v43 = vmul.f32 %v2781_v23, %v2277_v63 }
 0x403   :  { %v1390_v4 = vmul.f32 %v1380_v53, %v2777_v49  ;;  %v1391_v44 = vmul.f32 %v1381_v15, %v2779_v55  ;;  %v1383_v10 = vsel %vm589_vm8, %v1380_v53, 0.0  ;;  %v1384_v9 = vsel %vm589_vm8, %v1381_v15, 0.0 }
 0x404   :  { %v1385_v13 = vadd.f32 %v1384_v9, %v1383_v10  ;;  %v1392_v62 = vmul.f32 %v1382_v43, %v2781_v23  ;;  %v1386_v14 = vsel %vm589_vm8, %v1382_v43, 0.0 }
 0x405   :  { %v1393_v21 = vsel %vm589_vm8, %v1390_v4, 0.0  ;;  %v1394_v37 = vsel %vm589_vm8, %v1391_v44, 0.0 }
 0x406   :  { %v1387_v0 = vadd.f32 %v1386_v14, %v1385_v13  ;;  %v1395_v42 = vadd.f32 %v1394_v37, %v1393_v21  ;;  %v1396_v63 = vsel %vm589_vm8, %v1392_v62, 0.0 }
 0x408   :  { %1388 = vadd.xlane.f32.xlu0 %v1387_v0  ;;  %v1397_v48 = vadd.f32 %v1396_v63, %v1395_v42 }
 0x40a   :  { %1398 = vadd.xlane.f32.xlu1 %v1397_v48 }
 0x495   :  { %v1389_v33 = vpop.xlane.xlu0 %1388 }
 0x496   :  { %v1400_v34 = vmul.f32 %v1389_v33, %v2919_v20  ;;  %v1426_v61 = vmul.f32 %v1389_v33, %v2920_v22  ;;  %v1452_v59 = vmul.f32 %v1389_v33, %v2921_v51 }
 0x497   :  { %v1399_v6 = vpop.xlane.xlu1 %1398 }
 0x498   :  { %v1427_v35 = vsel %vm608_vm9, %v1426_v61, 0.0  ;;  %v1411_v46 = vmul.f32 %v1399_v6, %v2919_v20  ;;  %v1401_v52 = vsel %vm608_vm9, %v1400_v34, 0.0  ;;  %v1453_v38 = vsel %vm608_vm9, %v1452_v59, 0.0 }
 0x499   :  { %1428 = vadd.xlane.f32.xlu1 %v1427_v35  ;;  %1402 = vadd.xlane.f32.xlu0 %v1401_v52  ;;  %v1437_v36 = vmul.f32 %v1399_v6, %v2920_v22  ;;  %v1463_v5 = vmul.f32 %v1399_v6, %v2921_v51 }
 0x49a   :  { %v1412_v58 = vsel %vm608_vm9, %v1411_v46, 0.0 }
 0x49b   :  { %v1438_v39 = vsel %vm608_vm9, %v1437_v36, 0.0  ;;  %v1464_v56 = vsel %vm608_vm9, %v1463_v5, 0.0  ;;  %v1872_v5 = vmov 67  }
 0x49c   :  { %1774 = vset.pattern.permute.xlu1 %v1872_v5 }
 0x49d   :  { %1454 = vadd.xlane.f32.xlu1 %v1453_v38  ;;  %1413 = vadd.xlane.f32.xlu0 %v1412_v58 }
 0x4a1   :  { %1439 = vadd.xlane.f32.xlu0 %v1438_v39 }
 0x4a5   :  { %1465 = vadd.xlane.f32.xlu0 %v1464_v56 }
 0x526   :  { %v1429_v27 = vpop.xlane.xlu1 %1428  ;;  %v1403_v8 = vpop.xlane.xlu0 %1402 }
 0x527   :  { %v1430_v18 = vrot.slane %v1429_v27, 4  ;;  %v1404_v26 = vrot.slane %v1403_v8, 4 }
 0x529   :  { %v1431_v54 = vadd.f32 %v1430_v18, %v1429_v27  ;;  %v1405_v1 = vadd.f32 %v1404_v26, %v1403_v8 }
 0x52a   :  { %v1455_v16 = vpop.xlane.xlu1 %1454  ;;  %v1414_v19 = vpop.xlane.xlu0 %1413 }
 0x52b   :  { %v1432_v47 = vrot.slane %v1431_v54, 2  ;;  %v1456_v28 = vrot.slane %v1455_v16, 4  ;;  %v1406_v40 = vrot.slane %v1405_v1, 2  ;;  %v1415_v45 = vrot.slane %v1414_v19, 4 }
 0x52d   :  { %v1457_v3 = vadd.f32 %v1456_v28, %v1455_v16  ;;  %v1416_v60 = vadd.f32 %v1415_v45, %v1414_v19  ;;  %v1407_v11 = vadd.f32 %v1406_v40, %v1405_v1  ;;  %v1433_v57 = vadd.f32 %v1432_v47, %v1431_v54 }
 0x52e   :  { %v1440_v25 = vpop.xlane.xlu0 %1439 }
 0x52f   :  { %v1458_v29 = vrot.slane %v1457_v3, 2  ;;  %v1417_v17 = vrot.slane %v1416_v60, 2  ;;  %v1441_v12 = vrot.slane %v1440_v25, 4  ;;  %v1408_v30 = vrot.slane %v1407_v11, 1 }
 0x530   :  { %v1434_v53 = vrot.slane %v1433_v57, 1 }
 0x531   :  { %v1442_v24 = vadd.f32 %v1441_v12, %v1440_v25  ;;  %v1409_v32 = vadd.f32 %v1408_v30, %v1407_v11  ;;  %v1418_v7 = vadd.f32 %v1417_v17, %v1416_v60  ;;  %v1459_v15 = vadd.f32 %v1458_v29, %v1457_v3 }
 0x532   :  { %v1466_v2 = vpop.xlane.xlu0 %1465  ;;  %v1435_v62 = vadd.f32 %v1434_v53, %v1433_v57 }
 0x533   :  { %v1443_v43 = vrot.slane %v1442_v24, 2  ;;  %v1467_v4 = vrot.slane %v1466_v2, 4  ;;  %1616 = vpush %v1409_v32  ;;  %v1419_v44 = vrot.slane %v1418_v7, 1  ;;  %v1460_v14 = vrot.slane %v1459_v15, 1 }
 0x535   :  { %v1468_v10 = vadd.f32 %v1467_v4, %v1466_v2  ;;  %v1420_v9 = vadd.f32 %v1419_v44, %v1418_v7  ;;  %v1444_v13 = vadd.f32 %v1443_v43, %v1442_v24  ;;  %v1461_v63 = vadd.f32 %v1460_v14, %v1459_v15  ;;  %v2923_v14 = vld [vmem:[#allocation19_spill] sm:$0xff] }
 0x537   :  { %v1469_v21 = vrot.slane %v1468_v10, 2  ;;  %1618 = vpush %v1420_v9  ;;  %v1445_v37 = vrot.slane %v1444_v13, 1 }
 0x538   :  { %1620 = vpush %v1435_v62 }
 0x539   :  { %v1446_v0 = vadd.f32 %v1445_v37, %v1444_v13  ;;  %v1470_v42 = vadd.f32 %v1469_v21, %v1468_v10  ;;  %v2922_v13 = vld [vmem:[#allocation9_spill] sm:$0xff] }
 0x53b   :  { %1622 = vpush %v1446_v0  ;;  %v1471_v48 = vrot.slane %v1470_v42, 1 }
 0x53c   :  { %1624 = vpush %v1461_v63 }
 0x53d   :  { %v1472_v33 = vadd.f32 %v1471_v48, %v1470_v42 }
 0x53f   :  { %1626 = vpush %v1472_v33 }
 0x564   :  { %s1617_s1 = spop %1616 }
 0x565   :  { %s2810_s27 = smul.f32 0.001953125, %s1617_s1 }
 0x567   :  { %s1424_s4 = smul.f32 %s2810_s27, %s2810_s27  ;;  %v1478_v39 = vstv %s2810_s27 }
 0x568   :  { %s1619_s6 = spop %1618  ;;  %v1479_v27 = vmul.f32 %v1478_v39, %v2919_v20 }
 0x569   :  { %s1423_s7 = smul.f32 0.001953125, %s1619_s6  ;;  %s1621_s9 = spop %1620 }
 0x56a   :  { %s1448_s10 = smul.f32 0.001953125, %s1621_s9 }
 0x56b   :  { %s1425_s11 = ssub.f32 %s1423_s7, %s1424_s4 }
 0x56c   :  { %s1450_s25 = smul.f32 %s1448_s10, %s1448_s10  ;;  %s1623_s8 = spop %1622  ;;  %v1480_v58 = vstv %s1448_s10 }
 0x56d   :  { %s1449_s12 = smul.f32 0.001953125, %s1623_s8  ;;  %s1625_s13 = spop %1624  ;;  %v1486_v34 = vstv %s1425_s11  ;;  %v1481_v50 = vmul.f32 %v1480_v58, %v2920_v22 }
 0x56e   :  { %s1474_s15 = smul.f32 0.001953125, %s1625_s13  ;;  %v1487_v59 = vmul.f32 %v1486_v34, %v2919_v20 }
 0x56f   :  { %s1451_s17 = ssub.f32 %s1449_s12, %s1450_s25  ;;  %v1482_v8 = vadd.f32 %v1481_v50, %v1479_v27 }
 0x570   :  { %s1476_s18 = smul.f32 %s1474_s15, %s1474_s15  ;;  %s1627_s0 = spop %1626  ;;  %v1483_v56 = vstv %s1474_s15 }
 0x571   :  { %v1488_v61 = vstv %s1451_s17  ;;  %s1475_s20 = smul.f32 0.001953125, %s1627_s0  ;;  %v1484_v18 = vmul.f32 %v1483_v56, %v2921_v51 }
 0x572   :  { %v1489_v6 = vmul.f32 %v1488_v61, %v2920_v22 }
 0x573   :  { %s1477_s30 = ssub.f32 %s1475_s20, %s1476_s18  ;;  %v1485_v54 = vadd.f32 %v1484_v18, %v1482_v8 }
 0x574   :  { %v1490_v46 = vadd.f32 %v1489_v6, %v1487_v59 }
 0x575   :  { %v1491_v35 = vstv %s1477_s30 }
 0x576   :  { %v1492_v52 = vmul.f32 %v1491_v35, %v2921_v51 }
 0x578   :  { %v1493_v38 = vadd.f32 %v1492_v52, %v1490_v46 }
 0x57a   :  { %v1494_v36 = vadd.f32 1e-05, %v1493_v38 }
 0x57c   :  { %1786 = vrsqrt.f32 %v1494_v36 }
 0x586   :  { %v1787_v26 = vpop.eup %1786 }
 0x587   :  { %v1496_v1 = vmul.f32 %v2671_v41, %v1787_v26 }
 0x589   :  { %1505 = vperm.xlu0 %1773, %v1496_v1   ;;  %v1497_v16 = vmul.f32 %v1496_v1, %v1485_v54 }
 0x58b   :  { %1499 = vrot.lane.b32.xlu1 %v1497_v16, %s1873_s21 }
 0x58d   :  { %1775 = vset.pattern.permute.xlu0 %v1872_v5 }
 0x5fd   :  { %v1500_v47 = vpop.permute.xlu1 %1499 }
 0x5fe   :  { %v1502_v28 = vsub.f32 %v2671_v41, %v1500_v47 }
 0x600   :  { %1513 = vperm.xlu1 %1774, %v1502_v28  }
 0x608   :  { %v1506_v19 = vpop.permute.xlu0 %1505 }
 0x609   :  { %v1508_v22 = vmul.f32 %v1506_v19, %v2777_v49  ;;  %v1509_v20 = vmul.f32 %v1506_v19, %v2779_v55  ;;  %v1510_v51 = vmul.f32 %v1506_v19, %v2781_v23 }
 0x67f   :  { %v1514_v40 = vpop.permute.xlu1 %1513 }
 0x680   :  { %v1516_v45 = vadd.f32 %v1514_v40, %v1508_v22  ;;  %v1517_v3 = vadd.f32 %v1514_v40, %v1509_v20  ;;  %v1518_v60 = vadd.f32 %v1514_v40, %v1510_v51 }
 0x682   :  { %v1522_v11 = vmin.f32 %v1516_v45, 0.0  ;;  %v1523_v29 = vmin.f32 %v1517_v3, 0.0  ;;  %v1524_v25 = vmin.f32 %v1518_v60, 0.0  ;;  %vm1519_vm10 = vcmp.gt.f32.partialorder %v1516_v45, 0.0 }
 0x683   :  { %vm1520_vm11 = vcmp.gt.f32.partialorder %v1517_v3, 0.0  ;;  %vm1521_vm12 = vcmp.gt.f32.partialorder %v1518_v60, 0.0 }
 0x684   :  { %v1525_v57 = vmul.f32 1.442695, %v1522_v11  ;;  %v1527_v17 = vmul.f32 1.442695, %v1523_v29  ;;  %v1529_v12 = vmul.f32 1.442695, %v1524_v25 }
 0x686   :  { %1788 = vpow2.f32 %v1525_v57 }
 0x687   :  { %1790 = vpow2.f32 %v1527_v17 }
 0x688   :  { %1792 = vpow2.f32 %v1529_v12 }
 0x690   :  { %v1789_v41 = vpop.eup %1788 }
 0x691   :  { %v1791_v30 = vpop.eup %1790  ;;  %v1553_v49 = vadd.f32 -1.0, %v1789_v41 }
 0x692   :  { %v1793_v24 = vpop.eup %1792  ;;  %v1554_v55 = vadd.f32 -1.0, %v1791_v30 }
 0x693   :  { %v1555_v32 = vadd.f32 -1.0, %v1793_v24  ;;  %v1534_v23 = vmul.f32 1.6732632, %v1553_v49 }
 0x694   :  { %v1535_v7 = vmul.f32 1.6732632, %v1554_v55 }
 0x695   :  { %v1536_v2 = vmul.f32 1.6732632, %v1555_v32  ;;  %v1537_v53 = vsel %vm1519_vm10, %v1516_v45, %v1534_v23 }
 0x696   :  { %v1538_v15 = vsel %vm1520_vm11, %v1517_v3, %v1535_v7  ;;  %v1540_v43 = vmul.f32 1.050701, %v1537_v53 }
 0x697   :  { %v1539_v4 = vsel %vm1521_vm12, %v1518_v60, %v1536_v2  ;;  %v1541_v44 = vmul.f32 1.050701, %v1538_v15 }
 0x698   :  { %v1542_v10 = vmul.f32 1.050701, %v1539_v4  ;;  %v1543_v9 = vadd.f32 %v1540_v43, %v2312_v31 }
 0x699   :  { %v1544_v62 = vadd.f32 %v1541_v44, %v2922_v13 }
 0x69a   :  { %v1545_v21 = vadd.f32 %v1542_v10, %v2923_v14  ;;  %1546 = vst [vmem:[%s2840_s2] sm:$0x3f] %v1543_v9 }
 0x69b   :  { %1547 = vst [vmem:[%s2840_s2 + $0x8] sm:$0x3f] %v1544_v62 }
 0x69c   :  { %1548 = vst [vmem:[%s2840_s2 + $0x10] sm:$0x3f] %v1545_v21 }

</bundles_post_ra>
